<compile_context>
chip_gen: v6e
topology: v6e:2x2x1
jax: 0.10.0
libtpu: 0.0.40
codegen_flags: <defaults>
</compile_context>

<pallas_src>
import jax
import jax.numpy as jnp
from jax import lax
from jax.experimental import pallas as pl
from jax.experimental.pallas import tpu as pltpu


_BT_MAX = 128  # images per grid step (always a multiple of 16)


# ----------------------------------------------------------------------------
# Fused forward kernel
# ----------------------------------------------------------------------------
def _net_kernel(x_ref, r1_ref, b1_ref, w2_ref, b2_ref,
                wf1_ref, bf1_ref, wf2_ref, bf2_ref, o_ref):
    bt = o_ref.shape[0]                      # images in this batch tile
    X = x_ref[0]                             # (28, bt, 28) bf16 : [h, b, w]

    # ---- conv1: 5 matmuls (one per kernel row di). ---------------------------
    # LHS rows = (output row oh, batch b); RHS columns are ordered
    # (col-parity bb)*128 + pooled-col pw*10 + channel co, so pooling over
    # columns becomes a max of two 128-aligned lane slices.
    c1 = None
    for di in range(5):
        lhs = X[di:di + 24].reshape(24 * bt, 28)
        part = jnp.dot(lhs, r1_ref[di], preferred_element_type=jnp.float32)
        c1 = part if c1 is None else c1 + part                 # (24*bt, 256)
    # 2x2 max-pool: rows via leading-dim split, cols via aligned lane halves.
    c1 = c1.reshape(12, 2, bt, 256)
    c1 = jnp.maximum(c1[:, 0], c1[:, 1])                       # (12, bt, 256)
    h1 = jnp.maximum(c1[:, :, 0:120], c1[:, :, 128:248])       # (12, bt, 120)
    # bias after max (per-channel constant) and relu after pool are exact.
    h1 = jnp.maximum(h1 + b1_ref[...], 0.0).astype(jnp.bfloat16)

    # ---- conv2: same structure (contract 12 pooled cols x 10 ch = 120 lanes).
    c2 = None
    for di in range(5):
        lhs = h1[di:di + 8].reshape(8 * bt, 120)
        part = jnp.dot(lhs, w2_ref[di], preferred_element_type=jnp.float32)
        c2 = part if c2 is None else c2 + part                 # (8*bt, 256)
    c2 = c2.reshape(4, 2, bt, 256)
    c2 = jnp.maximum(c2[:, 0], c2[:, 1])                       # (4, bt, 256)
    h2 = jnp.maximum(c2[:, :, 0:80], c2[:, :, 128:208])        # (4, bt, 80)
    h2 = jnp.maximum(h2 + b2_ref[...], 0.0).astype(jnp.bfloat16)

    # ---- fc1 (+relu) as 4 partial matmuls: the PyTorch view(-1, 320) flatten
    # is folded into the pre-permuted (4, 80, 50) weight slabs -> no concat.
    h = None
    for p in range(4):
        part = jnp.dot(h2[p], wf1_ref[p], preferred_element_type=jnp.float32)
        h = part if h is None else h + part                    # (bt, 50)
    h = jnp.maximum(h + bf1_ref[...], 0.0).astype(jnp.bfloat16)

    # ---- fc2 + log_softmax --------------------------------------------------
    logits = jnp.dot(h, wf2_ref[...], preferred_element_type=jnp.float32)
    logits = logits + bf2_ref[...]                             # (bt, 10)
    m = jnp.max(logits, axis=-1, keepdims=True)
    lse = m + jnp.log(jnp.sum(jnp.exp(logits - m), axis=-1, keepdims=True))
    o_ref[...] = logits - lse


# ----------------------------------------------------------------------------
# Host-side weight prep (tiny, runs once per call inside the jit)
# ----------------------------------------------------------------------------
def _prep_params(params):
    f32, bf16 = jnp.float32, jnp.bfloat16

    # conv1 RHS: r1[di, w, bb*128 + pw*10 + co] = w1[co, di, w - (2*pw + bb)]
    # when 0 <= w - ow <= 4, else 0.  Lanes 120..127 / 248..255 are zero pad.
    w1 = params["conv1_w"].astype(f32)[:, 0]                   # (10, 5, 5)
    ow_col = jnp.broadcast_to(
        2 * jnp.arange(12)[None, :, None] + jnp.arange(2)[:, None, None],
        (2, 12, 10)).reshape(2, 120)
    co_col = jnp.broadcast_to(jnp.arange(10)[None, None, :],
                              (2, 12, 10)).reshape(2, 120)
    dj = jnp.arange(28)[None, :, None] - ow_col[:, None, :]    # (2, 28, 120)
    valid = (dj >= 0) & (dj <= 4)
    djc = jnp.clip(dj, 0, 4)
    r1 = jnp.zeros((5, 28, 256), f32)
    for di in range(5):
        vals = jnp.where(valid, w1[co_col[:, None, :], di, djc], 0.0)
        r1 = r1.at[di, :, 0:120].set(vals[0])
        r1 = r1.at[di, :, 128:248].set(vals[1])
    b1_t = jnp.tile(params["conv1_b"].astype(f32), 12).reshape(1, 120)

    # conv2 RHS: rows k = pw*10 + ci, cols bb2*128 + pw2*20 + c2.
    w2 = params["conv2_w"].astype(f32)                         # (20, 10, 5, 5)
    row_pw = jnp.repeat(jnp.arange(12), 10)                    # (120,)
    row_ci = jnp.tile(jnp.arange(10), 12)                      # (120,)
    ow2_col = jnp.broadcast_to(
        2 * jnp.arange(4)[None, :, None] + jnp.arange(2)[:, None, None],
        (2, 4, 20)).reshape(2, 80)
    c2_col = jnp.broadcast_to(jnp.arange(20)[None, None, :],
                              (2, 4, 20)).reshape(2, 80)
    dj2 = row_pw[None, :, None] - ow2_col[:, None, :]          # (2, 120, 80)
    valid2 = (dj2 >= 0) & (dj2 <= 4)
    dj2c = jnp.clip(dj2, 0, 4)
    w2s = jnp.zeros((5, 120, 256), f32)
    for di in range(5):
        vals = jnp.where(
            valid2, w2[c2_col[:, None, :], row_ci[None, :, None], di, dj2c], 0.0)
        w2s = w2s.at[di, :, 0:80].set(vals[0])
        w2s = w2s.at[di, :, 128:208].set(vals[1])
    b2_t = jnp.tile(params["conv2_b"].astype(f32), 4).reshape(1, 80)

    # fc1 weights permuted to the kernel's (ph2, pw2*20 + c, out) layout.
    wf1 = params["fc1_w"].astype(f32).reshape(50, 20, 4, 4)
    wf1 = wf1.transpose(2, 3, 1, 0).reshape(4, 80, 50)
    bf1 = params["fc1_b"].astype(f32).reshape(1, 50)
    wf2 = params["fc2_w"].astype(f32).T                         # (50, 10)
    bf2 = params["fc2_b"].astype(f32).reshape(1, 10)

    return (r1.astype(bf16), b1_t, w2s.astype(bf16), b2_t,
            wf1.astype(bf16), bf1, wf2.astype(bf16), bf2)


@jax.jit
def net_forward(x_nchw, params):
    B = x_nchw.shape[0]
    x = x_nchw.reshape(B, 28, 28).astype(jnp.bfloat16)

    # Batch tiling: bt multiple of 16 (bf16 sublane tile), >= 2 grid tiles so
    # a megacore (v7x) can split the "parallel" axis across both TensorCores.
    half = -(-B // 2)
    bt = min(_BT_MAX, -(-half // 16) * 16)
    n_tiles = max(2, -(-B // bt))
    b_pad = n_tiles * bt
    if b_pad != B:
        x = jnp.concatenate([x, jnp.zeros((b_pad - B, 28, 28), x.dtype)], 0)

    # (b, h, w) -> (tile, h, b_local, w): cheap transpose of raw pixels only.
    xt = x.reshape(n_tiles, bt, 28, 28).transpose(0, 2, 1, 3)

    r1, b1_t, w2s, b2_t, wf1, bf1, wf2, bf2 = _prep_params(params)

    flops = n_tiles * 2 * bt * (5 * 24 * 28 * 256 + 5 * 8 * 120 * 256
                                + 4 * 80 * 50 + 50 * 10)
    cost = pl.CostEstimate(flops=flops, transcendentals=b_pad * 11,
                           bytes_accessed=xt.size * 2 + b_pad * 10 * 4 + 400_000)

    out = pl.pallas_call(
        _net_kernel,
        out_shape=jax.ShapeDtypeStruct((b_pad, 10), jnp.float32),
        grid=(n_tiles,),
        in_specs=[
            pl.BlockSpec((1, 28, bt, 28), lambda i: (i, 0, 0, 0)),
            pl.BlockSpec((5, 28, 256), lambda i: (0, 0, 0)),
            pl.BlockSpec((1, 120), lambda i: (0, 0)),
            pl.BlockSpec((5, 120, 256), lambda i: (0, 0, 0)),
            pl.BlockSpec((1, 80), lambda i: (0, 0)),
            pl.BlockSpec((4, 80, 50), lambda i: (0, 0, 0)),
            pl.BlockSpec((1, 50), lambda i: (0, 0)),
            pl.BlockSpec((50, 10), lambda i: (0, 0)),
            pl.BlockSpec((1, 10), lambda i: (0, 0)),
        ],
        out_specs=pl.BlockSpec((bt, 10), lambda i: (i, 0)),
        compiler_params=pltpu.CompilerParams(
            dimension_semantics=("parallel",),
            vmem_limit_bytes=48 * 1024 * 1024,
        ),
        cost_estimate=cost,
    )(xt, r1, b1_t, w2s, b2_t, wf1, bf1, wf2, bf2)
    return out[:B]


# ----------------------------------------------------------------------------
# Pure-JAX reference (for correctness check)
# ----------------------------------------------------------------------------
def net_reference(x, params):
    hp = lax.Precision.HIGHEST

    def conv(y, w, b):
        dn = lax.conv_dimension_numbers(y.shape, w.shape, ("NCHW", "OIHW", "NCHW"))
        y = lax.conv_general_dilated(y, w, (1, 1), "VALID",
                                     dimension_numbers=dn, precision=hp)
        return y + b[None, :, None, None]

    def pool_relu(y):
        y = lax.reduce_window(y, -jnp.inf, lax.max, (1, 1, 2, 2), (1, 1, 2, 2), "VALID")
        return jnp.maximum(y, 0.0)

    y = pool_relu(conv(x, params["conv1_w"], params["conv1_b"]))
    y = pool_relu(conv(y, params["conv2_w"], params["conv2_b"]))
    y = y.reshape(y.shape[0], -1)
    y = jnp.maximum(jnp.dot(y, params["fc1_w"].T, precision=hp) + params["fc1_b"], 0.0)
    logits = jnp.dot(y, params["fc2_w"].T, precision=hp) + params["fc2_b"]
    return jax.nn.log_softmax(logits, axis=1)


def init_params(key):
    ks = jax.random.split(key, 8)

    def u(k, shape, fan_in):
        bound = 1.0 / jnp.sqrt(fan_in)
        return jax.random.uniform(k, shape, jnp.float32, -bound, bound)

    return {
        "conv1_w": u(ks[0], (10, 1, 5, 5), 25),
        "conv1_b": u(ks[1], (10,), 25),
        "conv2_w": u(ks[2], (20, 10, 5, 5), 250),
        "conv2_b": u(ks[3], (20,), 250),
        "fc1_w": u(ks[4], (50, 320), 320),
        "fc1_b": u(ks[5], (50,), 320),
        "fc2_w": u(ks[6], (10, 50), 50),
        "fc2_b": u(ks[7], (10,), 50),
    }


if __name__ == "__main__":
    key = jax.random.PRNGKey(0)
    pkey, xkey = jax.random.split(key)
    params = init_params(pkey)
    x = jax.random.normal(xkey, (2, 1, 28, 28), jnp.float32)  # MNIST-sized input

    out = net_forward(x, params)
    out = jax.block_until_ready(out)

    ref = net_reference(x, params)
    assert out.shape == (2, 10), out.shape
    assert jnp.allclose(out, ref, atol=1e-2, rtol=1e-2), (
        f"max abs diff {jnp.max(jnp.abs(out - ref))}")
    print("KERNEL_OK")
</pallas_src>

<mosaic_0001>
module attributes {stable_mosaic.version = 11 : i64} {
  func.func @_net_kernel(%arg0: i32, %arg1: memref<1x28x16x28xbf16, #tpu.memory_space<vmem>>, %arg2: memref<5x28x256xbf16, #tpu.memory_space<vmem>>, %arg3: memref<1x120xf32, #tpu.memory_space<vmem>>, %arg4: memref<5x120x256xbf16, #tpu.memory_space<vmem>>, %arg5: memref<1x80xf32, #tpu.memory_space<vmem>>, %arg6: memref<4x80x50xbf16, #tpu.memory_space<vmem>>, %arg7: memref<1x50xf32, #tpu.memory_space<vmem>>, %arg8: memref<50x10xbf16, #tpu.memory_space<vmem>>, %arg9: memref<1x10xf32, #tpu.memory_space<vmem>>, %arg10: memref<16x10xf32, #tpu.memory_space<vmem>>) attributes {dimension_semantics = [#tpu.dimension_semantics<parallel>], iteration_bounds = array<i64: 2>, scalar_prefetch = 0 : i64, scratch_operands = 0 : i64, tpu.core_type = #tpu.core_type<tc>, window_params = [{transform_indices = @transform_0, window_bounds = array<i64: 1, 28, 16, 28>}, {pipeline_mode = #tpu.pipeline_mode<synchronous>, transform_indices = @transform_1, window_bounds = array<i64: 5, 28, 256>}, {pipeline_mode = #tpu.pipeline_mode<synchronous>, transform_indices = @transform_2, window_bounds = array<i64: 1, 120>}, {pipeline_mode = #tpu.pipeline_mode<synchronous>, transform_indices = @transform_3, window_bounds = array<i64: 5, 120, 256>}, {pipeline_mode = #tpu.pipeline_mode<synchronous>, transform_indices = @transform_4, window_bounds = array<i64: 1, 80>}, {pipeline_mode = #tpu.pipeline_mode<synchronous>, transform_indices = @transform_5, window_bounds = array<i64: 4, 80, 50>}, {pipeline_mode = #tpu.pipeline_mode<synchronous>, transform_indices = @transform_6, window_bounds = array<i64: 1, 50>}, {pipeline_mode = #tpu.pipeline_mode<synchronous>, transform_indices = @transform_7, window_bounds = array<i64: 50, 10>}, {pipeline_mode = #tpu.pipeline_mode<synchronous>, transform_indices = @transform_8, window_bounds = array<i64: 1, 10>}, {transform_indices = @transform_9, window_bounds = array<i64: 16, 10>}]} {
    %c0 = arith.constant 0 : index
    %c0_0 = arith.constant 0 : index
    %c0_1 = arith.constant 0 : index
    %c0_2 = arith.constant 0 : index
    %0 = vector.load %arg1[%c0, %c0_0, %c0_1, %c0_2] : memref<1x28x16x28xbf16, #tpu.memory_space<vmem>>, vector<1x28x16x28xbf16>
    %1 = vector.shape_cast %0 : vector<1x28x16x28xbf16> to vector<28x16x28xbf16>
    %2 = vector.extract_strided_slice %1 {offsets = [0, 0, 0], sizes = [24, 16, 28], strides = [1, 1, 1]} : vector<28x16x28xbf16> to vector<24x16x28xbf16>
    %3 = vector.shape_cast %2 : vector<24x16x28xbf16> to vector<384x28xbf16>
    %c0_3 = arith.constant 0 : index
    %c0_4 = arith.constant 0 : index
    %c0_5 = arith.constant 0 : index
    %4 = vector.load %arg2[%c0_3, %c0_4, %c0_5] : memref<5x28x256xbf16, #tpu.memory_space<vmem>>, vector<1x28x256xbf16>
    %5 = vector.shape_cast %4 : vector<1x28x256xbf16> to vector<28x256xbf16>
    %cst = arith.constant dense<0.000000e+00> : vector<384x256xf32>
    %6 = tpu.matmul %3, %5, %cst {dimension_numbers = #tpu.dot_dimension_numbers<[1], [0], [0], [1], [0, 0, 1, 1], [], []>} : vector<384x28xbf16>, vector<28x256xbf16>, vector<384x256xf32> -> vector<384x256xf32>
    %7 = vector.extract_strided_slice %1 {offsets = [1, 0, 0], sizes = [24, 16, 28], strides = [1, 1, 1]} : vector<28x16x28xbf16> to vector<24x16x28xbf16>
    %8 = vector.shape_cast %7 : vector<24x16x28xbf16> to vector<384x28xbf16>
    %c1 = arith.constant 1 : index
    %c0_6 = arith.constant 0 : index
    %c0_7 = arith.constant 0 : index
    %9 = vector.load %arg2[%c1, %c0_6, %c0_7] : memref<5x28x256xbf16, #tpu.memory_space<vmem>>, vector<1x28x256xbf16>
    %10 = vector.shape_cast %9 : vector<1x28x256xbf16> to vector<28x256xbf16>
    %cst_8 = arith.constant dense<0.000000e+00> : vector<384x256xf32>
    %11 = tpu.matmul %8, %10, %cst_8 {dimension_numbers = #tpu.dot_dimension_numbers<[1], [0], [0], [1], [0, 0, 1, 1], [], []>} : vector<384x28xbf16>, vector<28x256xbf16>, vector<384x256xf32> -> vector<384x256xf32>
    %12 = arith.addf %6, %11 : vector<384x256xf32>
    %13 = vector.extract_strided_slice %1 {offsets = [2, 0, 0], sizes = [24, 16, 28], strides = [1, 1, 1]} : vector<28x16x28xbf16> to vector<24x16x28xbf16>
    %14 = vector.shape_cast %13 : vector<24x16x28xbf16> to vector<384x28xbf16>
    %c2 = arith.constant 2 : index
    %c0_9 = arith.constant 0 : index
    %c0_10 = arith.constant 0 : index
    %15 = vector.load %arg2[%c2, %c0_9, %c0_10] : memref<5x28x256xbf16, #tpu.memory_space<vmem>>, vector<1x28x256xbf16>
    %16 = vector.shape_cast %15 : vector<1x28x256xbf16> to vector<28x256xbf16>
    %cst_11 = arith.constant dense<0.000000e+00> : vector<384x256xf32>
    %17 = tpu.matmul %14, %16, %cst_11 {dimension_numbers = #tpu.dot_dimension_numbers<[1], [0], [0], [1], [0, 0, 1, 1], [], []>} : vector<384x28xbf16>, vector<28x256xbf16>, vector<384x256xf32> -> vector<384x256xf32>
    %18 = arith.addf %12, %17 : vector<384x256xf32>
    %19 = vector.extract_strided_slice %1 {offsets = [3, 0, 0], sizes = [24, 16, 28], strides = [1, 1, 1]} : vector<28x16x28xbf16> to vector<24x16x28xbf16>
    %20 = vector.shape_cast %19 : vector<24x16x28xbf16> to vector<384x28xbf16>
    %c3 = arith.constant 3 : index
    %c0_12 = arith.constant 0 : index
    %c0_13 = arith.constant 0 : index
    %21 = vector.load %arg2[%c3, %c0_12, %c0_13] : memref<5x28x256xbf16, #tpu.memory_space<vmem>>, vector<1x28x256xbf16>
    %22 = vector.shape_cast %21 : vector<1x28x256xbf16> to vector<28x256xbf16>
    %cst_14 = arith.constant dense<0.000000e+00> : vector<384x256xf32>
    %23 = tpu.matmul %20, %22, %cst_14 {dimension_numbers = #tpu.dot_dimension_numbers<[1], [0], [0], [1], [0, 0, 1, 1], [], []>} : vector<384x28xbf16>, vector<28x256xbf16>, vector<384x256xf32> -> vector<384x256xf32>
    %24 = arith.addf %18, %23 : vector<384x256xf32>
    %25 = vector.extract_strided_slice %1 {offsets = [4, 0, 0], sizes = [24, 16, 28], strides = [1, 1, 1]} : vector<28x16x28xbf16> to vector<24x16x28xbf16>
    %26 = vector.shape_cast %25 : vector<24x16x28xbf16> to vector<384x28xbf16>
    %c4 = arith.constant 4 : index
    %c0_15 = arith.constant 0 : index
    %c0_16 = arith.constant 0 : index
    %27 = vector.load %arg2[%c4, %c0_15, %c0_16] : memref<5x28x256xbf16, #tpu.memory_space<vmem>>, vector<1x28x256xbf16>
    %28 = vector.shape_cast %27 : vector<1x28x256xbf16> to vector<28x256xbf16>
    %cst_17 = arith.constant dense<0.000000e+00> : vector<384x256xf32>
    %29 = tpu.matmul %26, %28, %cst_17 {dimension_numbers = #tpu.dot_dimension_numbers<[1], [0], [0], [1], [0, 0, 1, 1], [], []>} : vector<384x28xbf16>, vector<28x256xbf16>, vector<384x256xf32> -> vector<384x256xf32>
    %30 = arith.addf %24, %29 : vector<384x256xf32>
    %31 = vector.shape_cast %30 : vector<384x256xf32> to vector<12x2x16x256xf32>
    %32 = vector.extract_strided_slice %31 {offsets = [0, 0, 0, 0], sizes = [12, 1, 16, 256], strides = [1, 1, 1, 1]} : vector<12x2x16x256xf32> to vector<12x1x16x256xf32>
    %33 = vector.shape_cast %32 : vector<12x1x16x256xf32> to vector<12x16x256xf32>
    %34 = vector.extract_strided_slice %31 {offsets = [0, 1, 0, 0], sizes = [12, 1, 16, 256], strides = [1, 1, 1, 1]} : vector<12x2x16x256xf32> to vector<12x1x16x256xf32>
    %35 = vector.shape_cast %34 : vector<12x1x16x256xf32> to vector<12x16x256xf32>
    %36 = arith.maximumf %33, %35 : vector<12x16x256xf32>
    %37 = vector.extract_strided_slice %36 {offsets = [0, 0, 0], sizes = [12, 16, 120], strides = [1, 1, 1]} : vector<12x16x256xf32> to vector<12x16x120xf32>
    %38 = vector.extract_strided_slice %36 {offsets = [0, 0, 128], sizes = [12, 16, 120], strides = [1, 1, 1]} : vector<12x16x256xf32> to vector<12x16x120xf32>
    %39 = arith.maximumf %37, %38 : vector<12x16x120xf32>
    %c0_18 = arith.constant 0 : index
    %c0_19 = arith.constant 0 : index
    %40 = vector.load %arg3[%c0_18, %c0_19] : memref<1x120xf32, #tpu.memory_space<vmem>>, vector<1x120xf32>
    %41 = vector.shape_cast %40 : vector<1x120xf32> to vector<1x1x120xf32>
    %42 = vector.broadcast %41 : vector<1x1x120xf32> to vector<12x16x120xf32>
    %43 = arith.addf %39, %42 : vector<12x16x120xf32>
    %cst_20 = arith.constant 0.000000e+00 : f32
    %44 = vector.broadcast %cst_20 : f32 to vector<12x16x120xf32>
    %45 = arith.maximumf %43, %44 : vector<12x16x120xf32>
    %46 = arith.truncf %45 : vector<12x16x120xf32> to vector<12x16x120xbf16>
    %47 = vector.extract_strided_slice %46 {offsets = [0, 0, 0], sizes = [8, 16, 120], strides = [1, 1, 1]} : vector<12x16x120xbf16> to vector<8x16x120xbf16>
    %48 = vector.shape_cast %47 : vector<8x16x120xbf16> to vector<128x120xbf16>
    %c0_21 = arith.constant 0 : index
    %c0_22 = arith.constant 0 : index
    %c0_23 = arith.constant 0 : index
    %49 = vector.load %arg4[%c0_21, %c0_22, %c0_23] : memref<5x120x256xbf16, #tpu.memory_space<vmem>>, vector<1x120x256xbf16>
    %50 = vector.shape_cast %49 : vector<1x120x256xbf16> to vector<120x256xbf16>
    %cst_24 = arith.constant dense<0.000000e+00> : vector<128x256xf32>
    %51 = tpu.matmul %48, %50, %cst_24 {dimension_numbers = #tpu.dot_dimension_numbers<[1], [0], [0], [1], [0, 0, 1, 1], [], []>} : vector<128x120xbf16>, vector<120x256xbf16>, vector<128x256xf32> -> vector<128x256xf32>
    %52 = vector.extract_strided_slice %46 {offsets = [1, 0, 0], sizes = [8, 16, 120], strides = [1, 1, 1]} : vector<12x16x120xbf16> to vector<8x16x120xbf16>
    %53 = vector.shape_cast %52 : vector<8x16x120xbf16> to vector<128x120xbf16>
    %c1_25 = arith.constant 1 : index
    %c0_26 = arith.constant 0 : index
    %c0_27 = arith.constant 0 : index
    %54 = vector.load %arg4[%c1_25, %c0_26, %c0_27] : memref<5x120x256xbf16, #tpu.memory_space<vmem>>, vector<1x120x256xbf16>
    %55 = vector.shape_cast %54 : vector<1x120x256xbf16> to vector<120x256xbf16>
    %cst_28 = arith.constant dense<0.000000e+00> : vector<128x256xf32>
    %56 = tpu.matmul %53, %55, %cst_28 {dimension_numbers = #tpu.dot_dimension_numbers<[1], [0], [0], [1], [0, 0, 1, 1], [], []>} : vector<128x120xbf16>, vector<120x256xbf16>, vector<128x256xf32> -> vector<128x256xf32>
    %57 = arith.addf %51, %56 : vector<128x256xf32>
    %58 = vector.extract_strided_slice %46 {offsets = [2, 0, 0], sizes = [8, 16, 120], strides = [1, 1, 1]} : vector<12x16x120xbf16> to vector<8x16x120xbf16>
    %59 = vector.shape_cast %58 : vector<8x16x120xbf16> to vector<128x120xbf16>
    %c2_29 = arith.constant 2 : index
    %c0_30 = arith.constant 0 : index
    %c0_31 = arith.constant 0 : index
    %60 = vector.load %arg4[%c2_29, %c0_30, %c0_31] : memref<5x120x256xbf16, #tpu.memory_space<vmem>>, vector<1x120x256xbf16>
    %61 = vector.shape_cast %60 : vector<1x120x256xbf16> to vector<120x256xbf16>
    %cst_32 = arith.constant dense<0.000000e+00> : vector<128x256xf32>
    %62 = tpu.matmul %59, %61, %cst_32 {dimension_numbers = #tpu.dot_dimension_numbers<[1], [0], [0], [1], [0, 0, 1, 1], [], []>} : vector<128x120xbf16>, vector<120x256xbf16>, vector<128x256xf32> -> vector<128x256xf32>
    %63 = arith.addf %57, %62 : vector<128x256xf32>
    %64 = vector.extract_strided_slice %46 {offsets = [3, 0, 0], sizes = [8, 16, 120], strides = [1, 1, 1]} : vector<12x16x120xbf16> to vector<8x16x120xbf16>
    %65 = vector.shape_cast %64 : vector<8x16x120xbf16> to vector<128x120xbf16>
    %c3_33 = arith.constant 3 : index
    %c0_34 = arith.constant 0 : index
    %c0_35 = arith.constant 0 : index
    %66 = vector.load %arg4[%c3_33, %c0_34, %c0_35] : memref<5x120x256xbf16, #tpu.memory_space<vmem>>, vector<1x120x256xbf16>
    %67 = vector.shape_cast %66 : vector<1x120x256xbf16> to vector<120x256xbf16>
    %cst_36 = arith.constant dense<0.000000e+00> : vector<128x256xf32>
    %68 = tpu.matmul %65, %67, %cst_36 {dimension_numbers = #tpu.dot_dimension_numbers<[1], [0], [0], [1], [0, 0, 1, 1], [], []>} : vector<128x120xbf16>, vector<120x256xbf16>, vector<128x256xf32> -> vector<128x256xf32>
    %69 = arith.addf %63, %68 : vector<128x256xf32>
    %70 = vector.extract_strided_slice %46 {offsets = [4, 0, 0], sizes = [8, 16, 120], strides = [1, 1, 1]} : vector<12x16x120xbf16> to vector<8x16x120xbf16>
    %71 = vector.shape_cast %70 : vector<8x16x120xbf16> to vector<128x120xbf16>
    %c4_37 = arith.constant 4 : index
    %c0_38 = arith.constant 0 : index
    %c0_39 = arith.constant 0 : index
    %72 = vector.load %arg4[%c4_37, %c0_38, %c0_39] : memref<5x120x256xbf16, #tpu.memory_space<vmem>>, vector<1x120x256xbf16>
    %73 = vector.shape_cast %72 : vector<1x120x256xbf16> to vector<120x256xbf16>
    %cst_40 = arith.constant dense<0.000000e+00> : vector<128x256xf32>
    %74 = tpu.matmul %71, %73, %cst_40 {dimension_numbers = #tpu.dot_dimension_numbers<[1], [0], [0], [1], [0, 0, 1, 1], [], []>} : vector<128x120xbf16>, vector<120x256xbf16>, vector<128x256xf32> -> vector<128x256xf32>
    %75 = arith.addf %69, %74 : vector<128x256xf32>
    %76 = vector.shape_cast %75 : vector<128x256xf32> to vector<4x2x16x256xf32>
    %77 = vector.extract_strided_slice %76 {offsets = [0, 0, 0, 0], sizes = [4, 1, 16, 256], strides = [1, 1, 1, 1]} : vector<4x2x16x256xf32> to vector<4x1x16x256xf32>
    %78 = vector.shape_cast %77 : vector<4x1x16x256xf32> to vector<4x16x256xf32>
    %79 = vector.extract_strided_slice %76 {offsets = [0, 1, 0, 0], sizes = [4, 1, 16, 256], strides = [1, 1, 1, 1]} : vector<4x2x16x256xf32> to vector<4x1x16x256xf32>
    %80 = vector.shape_cast %79 : vector<4x1x16x256xf32> to vector<4x16x256xf32>
    %81 = arith.maximumf %78, %80 : vector<4x16x256xf32>
    %82 = vector.extract_strided_slice %81 {offsets = [0, 0, 0], sizes = [4, 16, 80], strides = [1, 1, 1]} : vector<4x16x256xf32> to vector<4x16x80xf32>
    %83 = vector.extract_strided_slice %81 {offsets = [0, 0, 128], sizes = [4, 16, 80], strides = [1, 1, 1]} : vector<4x16x256xf32> to vector<4x16x80xf32>
    %84 = arith.maximumf %82, %83 : vector<4x16x80xf32>
    %c0_41 = arith.constant 0 : index
    %c0_42 = arith.constant 0 : index
    %85 = vector.load %arg5[%c0_41, %c0_42] : memref<1x80xf32, #tpu.memory_space<vmem>>, vector<1x80xf32>
    %86 = vector.shape_cast %85 : vector<1x80xf32> to vector<1x1x80xf32>
    %87 = vector.broadcast %86 : vector<1x1x80xf32> to vector<4x16x80xf32>
    %88 = arith.addf %84, %87 : vector<4x16x80xf32>
    %cst_43 = arith.constant 0.000000e+00 : f32
    %89 = vector.broadcast %cst_43 : f32 to vector<4x16x80xf32>
    %90 = arith.maximumf %88, %89 : vector<4x16x80xf32>
    %91 = arith.truncf %90 : vector<4x16x80xf32> to vector<4x16x80xbf16>
    %92 = vector.extract_strided_slice %91 {offsets = [0, 0, 0], sizes = [1, 16, 80], strides = [1, 1, 1]} : vector<4x16x80xbf16> to vector<1x16x80xbf16>
    %93 = vector.shape_cast %92 : vector<1x16x80xbf16> to vector<16x80xbf16>
    %c0_44 = arith.constant 0 : index
    %c0_45 = arith.constant 0 : index
    %c0_46 = arith.constant 0 : index
    %94 = vector.load %arg6[%c0_44, %c0_45, %c0_46] : memref<4x80x50xbf16, #tpu.memory_space<vmem>>, vector<1x80x50xbf16>
    %95 = vector.shape_cast %94 : vector<1x80x50xbf16> to vector<80x50xbf16>
    %cst_47 = arith.constant dense<0.000000e+00> : vector<16x50xf32>
    %96 = tpu.matmul %93, %95, %cst_47 {dimension_numbers = #tpu.dot_dimension_numbers<[1], [0], [0], [1], [0, 0, 1, 1], [], []>} : vector<16x80xbf16>, vector<80x50xbf16>, vector<16x50xf32> -> vector<16x50xf32>
    %97 = vector.extract_strided_slice %91 {offsets = [1, 0, 0], sizes = [1, 16, 80], strides = [1, 1, 1]} : vector<4x16x80xbf16> to vector<1x16x80xbf16>
    %98 = vector.shape_cast %97 : vector<1x16x80xbf16> to vector<16x80xbf16>
    %c1_48 = arith.constant 1 : index
    %c0_49 = arith.constant 0 : index
    %c0_50 = arith.constant 0 : index
    %99 = vector.load %arg6[%c1_48, %c0_49, %c0_50] : memref<4x80x50xbf16, #tpu.memory_space<vmem>>, vector<1x80x50xbf16>
    %100 = vector.shape_cast %99 : vector<1x80x50xbf16> to vector<80x50xbf16>
    %cst_51 = arith.constant dense<0.000000e+00> : vector<16x50xf32>
    %101 = tpu.matmul %98, %100, %cst_51 {dimension_numbers = #tpu.dot_dimension_numbers<[1], [0], [0], [1], [0, 0, 1, 1], [], []>} : vector<16x80xbf16>, vector<80x50xbf16>, vector<16x50xf32> -> vector<16x50xf32>
    %102 = arith.addf %96, %101 : vector<16x50xf32>
    %103 = vector.extract_strided_slice %91 {offsets = [2, 0, 0], sizes = [1, 16, 80], strides = [1, 1, 1]} : vector<4x16x80xbf16> to vector<1x16x80xbf16>
    %104 = vector.shape_cast %103 : vector<1x16x80xbf16> to vector<16x80xbf16>
    %c2_52 = arith.constant 2 : index
    %c0_53 = arith.constant 0 : index
    %c0_54 = arith.constant 0 : index
    %105 = vector.load %arg6[%c2_52, %c0_53, %c0_54] : memref<4x80x50xbf16, #tpu.memory_space<vmem>>, vector<1x80x50xbf16>
    %106 = vector.shape_cast %105 : vector<1x80x50xbf16> to vector<80x50xbf16>
    %cst_55 = arith.constant dense<0.000000e+00> : vector<16x50xf32>
    %107 = tpu.matmul %104, %106, %cst_55 {dimension_numbers = #tpu.dot_dimension_numbers<[1], [0], [0], [1], [0, 0, 1, 1], [], []>} : vector<16x80xbf16>, vector<80x50xbf16>, vector<16x50xf32> -> vector<16x50xf32>
    %108 = arith.addf %102, %107 : vector<16x50xf32>
    %109 = vector.extract_strided_slice %91 {offsets = [3, 0, 0], sizes = [1, 16, 80], strides = [1, 1, 1]} : vector<4x16x80xbf16> to vector<1x16x80xbf16>
    %110 = vector.shape_cast %109 : vector<1x16x80xbf16> to vector<16x80xbf16>
    %c3_56 = arith.constant 3 : index
    %c0_57 = arith.constant 0 : index
    %c0_58 = arith.constant 0 : index
    %111 = vector.load %arg6[%c3_56, %c0_57, %c0_58] : memref<4x80x50xbf16, #tpu.memory_space<vmem>>, vector<1x80x50xbf16>
    %112 = vector.shape_cast %111 : vector<1x80x50xbf16> to vector<80x50xbf16>
    %cst_59 = arith.constant dense<0.000000e+00> : vector<16x50xf32>
    %113 = tpu.matmul %110, %112, %cst_59 {dimension_numbers = #tpu.dot_dimension_numbers<[1], [0], [0], [1], [0, 0, 1, 1], [], []>} : vector<16x80xbf16>, vector<80x50xbf16>, vector<16x50xf32> -> vector<16x50xf32>
    %114 = arith.addf %108, %113 : vector<16x50xf32>
    %c0_60 = arith.constant 0 : index
    %c0_61 = arith.constant 0 : index
    %115 = vector.load %arg7[%c0_60, %c0_61] : memref<1x50xf32, #tpu.memory_space<vmem>>, vector<1x50xf32>
    %116 = vector.broadcast %115 : vector<1x50xf32> to vector<16x50xf32>
    %117 = arith.addf %114, %116 : vector<16x50xf32>
    %cst_62 = arith.constant 0.000000e+00 : f32
    %118 = vector.broadcast %cst_62 : f32 to vector<16x50xf32>
    %119 = arith.maximumf %117, %118 : vector<16x50xf32>
    %120 = arith.truncf %119 : vector<16x50xf32> to vector<16x50xbf16>
    %c0_63 = arith.constant 0 : index
    %c0_64 = arith.constant 0 : index
    %121 = vector.load %arg8[%c0_63, %c0_64] : memref<50x10xbf16, #tpu.memory_space<vmem>>, vector<50x10xbf16>
    %cst_65 = arith.constant dense<0.000000e+00> : vector<16x10xf32>
    %122 = tpu.matmul %120, %121, %cst_65 {dimension_numbers = #tpu.dot_dimension_numbers<[1], [0], [0], [1], [0, 0, 1, 1], [], []>} : vector<16x50xbf16>, vector<50x10xbf16>, vector<16x10xf32> -> vector<16x10xf32>
    %c0_66 = arith.constant 0 : index
    %c0_67 = arith.constant 0 : index
    %123 = vector.load %arg9[%c0_66, %c0_67] : memref<1x10xf32, #tpu.memory_space<vmem>>, vector<1x10xf32>
    %124 = vector.broadcast %123 : vector<1x10xf32> to vector<16x10xf32>
    %125 = arith.addf %122, %124 : vector<16x10xf32>
    %cst_68 = arith.constant dense<0xFF800000> : vector<16xf32>
    %126 = vector.multi_reduction <maximumf>, %125, %cst_68 [1] : vector<16x10xf32> to vector<16xf32>
    %127 = vector.shape_cast %126 : vector<16xf32> to vector<16x1xf32>
    %128 = vector.broadcast %127 : vector<16x1xf32> to vector<16x10xf32>
    %129 = arith.subf %125, %128 : vector<16x10xf32>
    %130 = math.exp %129 : vector<16x10xf32>
    %cst_69 = arith.constant dense<0.000000e+00> : vector<16xf32>
    %131 = vector.multi_reduction <add>, %130, %cst_69 [1] : vector<16x10xf32> to vector<16xf32>
    %132 = vector.shape_cast %131 : vector<16xf32> to vector<16x1xf32>
    %133 = math.log %132 : vector<16x1xf32>
    %134 = arith.addf %127, %133 : vector<16x1xf32>
    %135 = vector.broadcast %134 : vector<16x1xf32> to vector<16x10xf32>
    %136 = arith.subf %125, %135 : vector<16x10xf32>
    %c0_70 = arith.constant 0 : index
    %c0_71 = arith.constant 0 : index
    %137 = vector.load %arg10[%c0_70, %c0_71] : memref<16x10xf32, #tpu.memory_space<vmem>>, vector<16x10xf32>
    tpu.vector_store %arg10[%c0_70, %c0_71], %136 {strides = array<i32>} : memref<16x10xf32, #tpu.memory_space<vmem>>, vector<16x10xf32>,
    return
  }
  func.func @transform_0(%arg0: i32) -> (i32, i32, i32, i32) {
    %c0_i32 = arith.constant 0 : i32
    %c0_i32_0 = arith.constant 0 : i32
    %c0_i32_1 = arith.constant 0 : i32
    %c0_i32_2 = arith.constant 0 : i32
    return %arg0, %c0_i32, %c0_i32_0, %c0_i32_1 : i32, i32, i32, i32
  }
  func.func @transform_1(%arg0: i32) -> (i32, i32, i32) {
    %c0_i32 = arith.constant 0 : i32
    %c0_i32_0 = arith.constant 0 : i32
    %c0_i32_1 = arith.constant 0 : i32
    %c0_i32_2 = arith.constant 0 : i32
    return %c0_i32, %c0_i32_0, %c0_i32_1 : i32, i32, i32
  }
  func.func @transform_2(%arg0: i32) -> (i32, i32) {
    %c0_i32 = arith.constant 0 : i32
    %c0_i32_0 = arith.constant 0 : i32
    %c0_i32_1 = arith.constant 0 : i32
    return %c0_i32, %c0_i32_0 : i32, i32
  }
  func.func @transform_3(%arg0: i32) -> (i32, i32, i32) {
    %c0_i32 = arith.constant 0 : i32
    %c0_i32_0 = arith.constant 0 : i32
    %c0_i32_1 = arith.constant 0 : i32
    %c0_i32_2 = arith.constant 0 : i32
    return %c0_i32, %c0_i32_0, %c0_i32_1 : i32, i32, i32
  }
  func.func @transform_4(%arg0: i32) -> (i32, i32) {
    %c0_i32 = arith.constant 0 : i32
    %c0_i32_0 = arith.constant 0 : i32
    %c0_i32_1 = arith.constant 0 : i32
    return %c0_i32, %c0_i32_0 : i32, i32
  }
  func.func @transform_5(%arg0: i32) -> (i32, i32, i32) {
    %c0_i32 = arith.constant 0 : i32
    %c0_i32_0 = arith.constant 0 : i32
    %c0_i32_1 = arith.constant 0 : i32
    %c0_i32_2 = arith.constant 0 : i32
    return %c0_i32, %c0_i32_0, %c0_i32_1 : i32, i32, i32
  }
  func.func @transform_6(%arg0: i32) -> (i32, i32) {
    %c0_i32 = arith.constant 0 : i32
    %c0_i32_0 = arith.constant 0 : i32
    %c0_i32_1 = arith.constant 0 : i32
    return %c0_i32, %c0_i32_0 : i32, i32
  }
  func.func @transform_7(%arg0: i32) -> (i32, i32) {
    %c0_i32 = arith.constant 0 : i32
    %c0_i32_0 = arith.constant 0 : i32
    %c0_i32_1 = arith.constant 0 : i32
    return %c0_i32, %c0_i32_0 : i32, i32
  }
  func.func @transform_8(%arg0: i32) -> (i32, i32) {
    %c0_i32 = arith.constant 0 : i32
    %c0_i32_0 = arith.constant 0 : i32
    %c0_i32_1 = arith.constant 0 : i32
    return %c0_i32, %c0_i32_0 : i32, i32
  }
  func.func @transform_9(%arg0: i32) -> (i32, i32) {
    %c0_i32 = arith.constant 0 : i32
    %c0_i32_0 = arith.constant 0 : i32
    return %arg0, %c0_i32 : i32, i32
  }
}

</mosaic_0001>

<bundles_post_ra>
// kernel: sub.25
= control target key start
LH: loop header
LB: loop body
LE: loop exit
PB: predicated region body
PF: predicated region fallthrough
CT: control target
= control target key end

     0   :  { %s30_s10 = smov 3  ;;  %s11_s11 = smov 3  ;;  %vm13_vm0 = vcmask 162816   ;;  %vm20_vm1 = vcmask 654816   ;;  %vm27_vm2 = vcmask 490816   ;;  %vm34_vm3 = vcmask 326816   ;;  %s70_s0 = inlined_call_operand.vmem [shape: s32[2,4,20], index: 0, kind: input, shape index: {}]   ;;  %s71_s1 = inlined_call_operand.vmem [shape: s32[2,80], index: 1, kind: output, shape index: {}]  }
   0x1   :  { %v44_v0 = vld [vmem:[%s70_s0 + $0x4] sm:$0xf]  ;;  %v9_v1 = vld [vmem:[%s70_s0] sm:$0xf]  ;;  %s16_s0 = smov 3  ;;  %s23_s12 = smov 3 }
   0x2   :  { %8 = vst [vmem:[#allocation1 + $0x8] sm:$0xf] %v44_v0  ;;  %10 = vst [vmem:[#allocation1] sm:$0xf] %v9_v1  ;;  %s48_s13 = smov 60   ;;  %s49_s14 = smov 20  }
   0x3   :  { %s50_s15 = smov 40  }
   0x9   :  { %v17_v2 = vld [vmem:[#allocation1 + $0x3] ss:$8 sm:%s16_s0]   ;;  %v31_v3 = vld [vmem:[#allocation1 + $0x1] ss:$8 sm:%s30_s10]   ;;  %v12_v4 = vld [vmem:[#allocation1] ss:$8 sm:%s11_s11]  }
   0xa   :  { %18 = vrot.lane.b32.xlu0 %v17_v2, %s48_s13  ;;  %32 = vrot.lane.b32.xlu1 %v31_v3, %s49_s14  ;;  %v24_v5 = vld [vmem:[#allocation1 + $0x2] ss:$8 sm:%s23_s12]   ;;  %14 = vst.msk [vmem:[#allocation0] sm:$0x3] %vm13_vm0, %v12_v4  }
   0xe   :  { %25 = vrot.lane.b32.xlu0 %v24_v5, %s50_s15 }
  0x7c   :  { %v19_v6 = vpop.permute.xlu0 %18   ;;  %v33_v7 = vpop.permute.xlu1 %32  }
  0x7d   :  { %21 = vst.msk [vmem:[#allocation0] sm:$0x3] %vm20_vm1, %v19_v6  }
  0x80   :  { %v26_v8 = vpop.permute.xlu0 %25  }
  0x81   :  { %28 = vst.msk [vmem:[#allocation0] sm:$0x3] %vm27_vm2, %v26_v8  }
  0x82   :  { %35 = vst.msk [vmem:[#allocation0] sm:$0x3] %vm34_vm3, %v33_v7  }
  0x89   :  { %v40_v9 = vld [vmem:[#allocation0] sm:$0x3] }
  0x8a   :  { %43 = vst [vmem:[%s71_s1] sm:$0x3] %v40_v9 }

// kernel: sub.18
= control target key start
LH: loop header
LB: loop body
LE: loop exit
PB: predicated region body
PF: predicated region fallthrough
CT: control target
= control target key end

     0   :  { %s7_s6 = smov 3  ;;  %s21_s9 = smov 3  ;;  %vm4_vm0 = vcmask 80896   ;;  %vm11_vm1 = vcmask 982896   ;;  %vm18_vm2 = vcmask 900896   ;;  %vm25_vm3 = vcmask 818896   ;;  %s173_s0 = inlined_call_operand.vmem [shape: s32[2,12,10], index: 0, kind: input, shape index: {}]   ;;  %s174_s1 = inlined_call_operand.vmem [shape: s32[2,120], index: 1, kind: output, shape index: {}]  }
   0x1   :  { %v91_v0 = vld [vmem:[%s173_s0 + $0xb] ss:$16 sm:%s7_s6]   ;;  %s113_s10 = smov 110   ;;  %v93_v1 = vld [vmem:[%s173_s0 + $0x9] ss:$16 sm:%s21_s9]   ;;  %s14_s13 = smov 3 }
   0x2   :  { %9 = vrot.lane.b32.xlu0 %v91_v0, %s113_s10  ;;  %s114_s14 = smov 90   ;;  %v92_v2 = vld [vmem:[%s173_s0 + $0xa] ss:$16 sm:%s14_s13]   ;;  %s28_s17 = smov 3  ;;  %vm32_vm4 = vcmask 736896   ;;  %vm39_vm5 = vcmask 654896  }
   0x3   :  { %23 = vrot.lane.b32.xlu1 %v93_v1, %s114_s14  ;;  %v94_v3 = vld [vmem:[%s173_s0 + $0x8] ss:$16 sm:%s28_s17]   ;;  %s35_s20 = smov 3  ;;  %s42_s21 = smov 3  ;;  %vm46_vm6 = vcmask 572896   ;;  %vm53_vm7 = vcmask 490896  }
   0x4   :  { %s115_s22 = smov 100   ;;  %s116_s23 = smov 80   ;;  %v95_v4 = vld [vmem:[%s173_s0 + $0x7] ss:$16 sm:%s35_s20]   ;;  %v96_v5 = vld [vmem:[%s173_s0 + $0x6] ss:$16 sm:%s42_s21]  }
   0x5   :  { %s49_s28 = smov 3  ;;  %s56_s29 = smov 3  ;;  %vm60_vm8 = vcmask 408896   ;;  %vm67_vm9 = vcmask 326896   ;;  %vm74_vm10 = vcmask 244896   ;;  %vm81_vm11 = vcmask 162896  }
   0x6   :  { %16 = vrot.lane.b32.xlu0 %v92_v2, %s115_s22  ;;  %s117_s30 = smov 70   ;;  %s118_s2 = smov 60   ;;  %v97_v6 = vld [vmem:[%s173_s0 + $0x5] ss:$16 sm:%s49_s28]  }
   0x7   :  { %30 = vrot.lane.b32.xlu1 %v94_v3, %s116_s23  ;;  %s2_s5 = smov 3  ;;  %v98_v7 = vld [vmem:[%s173_s0 + $0x4] ss:$16 sm:%s56_s29]   ;;  %s63_s8 = smov 3 }
   0x8   :  { %v3_v8 = vld [vmem:[%s173_s0] ss:$16 sm:%s2_s5]   ;;  %s70_s11 = smov 3  ;;  %s119_s12 = smov 50   ;;  %v99_v9 = vld [vmem:[%s173_s0 + $0x3] ss:$16 sm:%s63_s8]  }
   0x9   :  { %5 = vst.msk [vmem:[#allocation0] sm:$0x3] %vm4_vm0, %v3_v8   ;;  %s120_s13 = smov 40   ;;  %v100_v10 = vld [vmem:[%s173_s0 + $0x2] ss:$16 sm:%s70_s11]   ;;  %s77_s18 = smov 3 }
   0xa   :  { %37 = vrot.lane.b32.xlu0 %v95_v4, %s117_s30  ;;  %s121_s19 = smov 30   ;;  %s122_s20 = smov 20   ;;  %v101_v11 = vld [vmem:[%s173_s0 + $0x1] ss:$16 sm:%s77_s18]  }
   0xb   :  { %44 = vrot.lane.b32.xlu1 %v96_v5, %s118_s2  ;;  %s123_s0 = smov 10  }
   0xe   :  { %51 = vrot.lane.b32.xlu0 %v97_v6, %s119_s12 }
   0xf   :  { %58 = vrot.lane.b32.xlu1 %v98_v7, %s120_s13 }
  0x12   :  { %65 = vrot.lane.b32.xlu0 %v99_v9, %s121_s19 }
  0x13   :  { %72 = vrot.lane.b32.xlu1 %v100_v10, %s122_s20 }
  0x16   :  { %79 = vrot.lane.b32.xlu0 %v101_v11, %s123_s0 }
  0x74   :  { %v10_v12 = vpop.permute.xlu0 %9  }
  0x75   :  { %12 = vst.msk [vmem:[#allocation0] sm:$0x3] %vm11_vm1, %v10_v12   ;;  %v24_v13 = vpop.permute.xlu1 %23  }
  0x78   :  { %v17_v14 = vpop.permute.xlu0 %16  }
  0x79   :  { %19 = vst.msk [vmem:[#allocation0] sm:$0x3] %vm18_vm2, %v17_v14   ;;  %v31_v15 = vpop.permute.xlu1 %30  }
  0x7a   :  { %26 = vst.msk [vmem:[#allocation0] sm:$0x3] %vm25_vm3, %v24_v13  }
  0x7b   :  { %33 = vst.msk [vmem:[#allocation0] sm:$0x3] %vm32_vm4, %v31_v15  }
  0x7c   :  { %v38_v16 = vpop.permute.xlu0 %37  }
  0x7d   :  { %40 = vst.msk [vmem:[#allocation0] sm:$0x3] %vm39_vm5, %v38_v16   ;;  %v45_v17 = vpop.permute.xlu1 %44  }
  0x7e   :  { %47 = vst.msk [vmem:[#allocation0] sm:$0x3] %vm46_vm6, %v45_v17  }
  0x80   :  { %v52_v18 = vpop.permute.xlu0 %51  }
  0x81   :  { %54 = vst.msk [vmem:[#allocation0] sm:$0x3] %vm53_vm7, %v52_v18   ;;  %v59_v19 = vpop.permute.xlu1 %58  }
  0x82   :  { %61 = vst.msk [vmem:[#allocation0] sm:$0x3] %vm60_vm8, %v59_v19  }
  0x84   :  { %v66_v20 = vpop.permute.xlu0 %65  }
  0x85   :  { %68 = vst.msk [vmem:[#allocation0] sm:$0x3] %vm67_vm9, %v66_v20   ;;  %v73_v21 = vpop.permute.xlu1 %72  }
  0x86   :  { %75 = vst.msk [vmem:[#allocation0] sm:$0x3] %vm74_vm10, %v73_v21  }
  0x88   :  { %v80_v22 = vpop.permute.xlu0 %79  }
  0x89   :  { %82 = vst.msk [vmem:[#allocation0] sm:$0x3] %vm81_vm11, %v80_v22  }
  0x90   :  { %v87_v23 = vld [vmem:[#allocation0] sm:$0x3] }
  0x91   :  { %90 = vst [vmem:[%s174_s1] sm:$0x3] %v87_v23 }

// kernel: tile.22
= control target key start
LH: loop header
LB: loop body
LE: loop exit
PB: predicated region body
PF: predicated region fallthrough
CT: control target
= control target key end

     0   :  { %s28_s0 = inlined_call_operand.vmem [shape: f32[10], index: 0, kind: input, shape index: {}]   ;;  %s29_s1 = inlined_call_operand.vmem [shape: f32[12,10], index: 1, kind: output, shape index: {}]  }
   0x1   :  { %v4_v0 = vld [vmem:[%s28_s0] ss:$0 sm:$0xff] }
   0x2   :  { %5 = vst [vmem:[%s29_s1] sm:$0xff] %v4_v0  ;;  %8 = vst [vmem:[%s29_s1 + $0x8] sm:$0xff] %v4_v0 }

// kernel: tile.23
= control target key start
LH: loop header
LB: loop body
LE: loop exit
PB: predicated region body
PF: predicated region fallthrough
CT: control target
= control target key end

     0   :  { %s101_s10 = smov 110   ;;  %s102_s11 = smov 90   ;;  %vm3_vm0 = vcmask 80896   ;;  %vm9_vm1 = vcmask 982896   ;;  %vm15_vm2 = vcmask 900896   ;;  %vm21_vm3 = vcmask 818896   ;;  %s161_s0 = inlined_call_operand.vmem [shape: f32[12,10], index: 0, kind: input, shape index: {}]   ;;  %s162_s1 = inlined_call_operand.vmem [shape: f32[1,120], index: 1, kind: output, shape index: {}]  }
   0x1   :  { %v79_v0 = vld [vmem:[%s161_s0 + $0xb] sm:$0x1]   ;;  %v81_v1 = vld [vmem:[%s161_s0 + $0x9] sm:$0x1]   ;;  %v80_v2 = vld [vmem:[%s161_s0 + $0xa] sm:$0x1]  }
   0x2   :  { %7 = vrot.lane.b32.xlu0 %v79_v0, %s101_s10  ;;  %19 = vrot.lane.b32.xlu1 %v81_v1, %s102_s11  ;;  %v82_v3 = vld [vmem:[%s161_s0 + $0x8] sm:$0x1]   ;;  %s103_s16 = smov 100   ;;  %s104_s17 = smov 80   ;;  %v83_v4 = vld [vmem:[%s161_s0 + $0x7] sm:$0x1]  }
   0x3   :  { %v2_v5 = vld [vmem:[%s161_s0] sm:$0x1]   ;;  %v84_v6 = vld [vmem:[%s161_s0 + $0x6] sm:$0x1]   ;;  %s105_s24 = smov 70   ;;  %s106_s25 = smov 60  }
   0x4   :  { %4 = vst.msk [vmem:[#allocation0] sm:$0x1] %vm3_vm0, %v2_v5   ;;  %v85_v7 = vld [vmem:[%s161_s0 + $0x5] sm:$0x1]   ;;  %v86_v8 = vld [vmem:[%s161_s0 + $0x4] sm:$0x1]  }
   0x5   :  { %s107_s30 = smov 50   ;;  %s108_s2 = smov 40   ;;  %v87_v9 = vld [vmem:[%s161_s0 + $0x3] sm:$0x1]   ;;  %v88_v10 = vld [vmem:[%s161_s0 + $0x2] sm:$0x1]  }
   0x6   :  { %13 = vrot.lane.b32.xlu0 %v80_v2, %s103_s16  ;;  %25 = vrot.lane.b32.xlu1 %v82_v3, %s104_s17  ;;  %s109_s7 = smov 30   ;;  %s110_s8 = smov 20   ;;  %v89_v11 = vld [vmem:[%s161_s0 + $0x1] sm:$0x1]   ;;  %vm27_vm4 = vcmask 736896   ;;  %vm33_vm5 = vcmask 654896  }
   0x7   :  { %s111_s0 = smov 10   ;;  %vm39_vm6 = vcmask 572896   ;;  %vm45_vm7 = vcmask 490896   ;;  %vm51_vm8 = vcmask 408896   ;;  %vm57_vm9 = vcmask 326896  }
   0x8   :  { %vm63_vm10 = vcmask 244896   ;;  %vm69_vm11 = vcmask 162896  }
   0xa   :  { %31 = vrot.lane.b32.xlu0 %v83_v4, %s105_s24  ;;  %37 = vrot.lane.b32.xlu1 %v84_v6, %s106_s25 }
   0xe   :  { %43 = vrot.lane.b32.xlu0 %v85_v7, %s107_s30  ;;  %49 = vrot.lane.b32.xlu1 %v86_v8, %s108_s2 }
  0x12   :  { %55 = vrot.lane.b32.xlu0 %v87_v9, %s109_s7  ;;  %61 = vrot.lane.b32.xlu1 %v88_v10, %s110_s8 }
  0x16   :  { %67 = vrot.lane.b32.xlu0 %v89_v11, %s111_s0 }
  0x74   :  { %v8_v12 = vpop.permute.xlu0 %7   ;;  %v20_v13 = vpop.permute.xlu1 %19  }
  0x75   :  { %10 = vst.msk [vmem:[#allocation0] sm:$0x1] %vm9_vm1, %v8_v12  }
  0x78   :  { %v14_v14 = vpop.permute.xlu0 %13   ;;  %v26_v15 = vpop.permute.xlu1 %25  }
  0x79   :  { %16 = vst.msk [vmem:[#allocation0] sm:$0x1] %vm15_vm2, %v14_v14  }
  0x7a   :  { %22 = vst.msk [vmem:[#allocation0] sm:$0x1] %vm21_vm3, %v20_v13  }
  0x7b   :  { %28 = vst.msk [vmem:[#allocation0] sm:$0x1] %vm27_vm4, %v26_v15  }
  0x7c   :  { %v32_v16 = vpop.permute.xlu0 %31   ;;  %v38_v17 = vpop.permute.xlu1 %37  }
  0x7d   :  { %34 = vst.msk [vmem:[#allocation0] sm:$0x1] %vm33_vm5, %v32_v16  }
  0x7e   :  { %40 = vst.msk [vmem:[#allocation0] sm:$0x1] %vm39_vm6, %v38_v17  }
  0x80   :  { %v44_v18 = vpop.permute.xlu0 %43   ;;  %v50_v19 = vpop.permute.xlu1 %49  }
  0x81   :  { %46 = vst.msk [vmem:[#allocation0] sm:$0x1] %vm45_vm7, %v44_v18  }
  0x82   :  { %52 = vst.msk [vmem:[#allocation0] sm:$0x1] %vm51_vm8, %v50_v19  }
  0x84   :  { %v56_v20 = vpop.permute.xlu0 %55   ;;  %v62_v21 = vpop.permute.xlu1 %61  }
  0x85   :  { %58 = vst.msk [vmem:[#allocation0] sm:$0x1] %vm57_vm9, %v56_v20  }
  0x86   :  { %64 = vst.msk [vmem:[#allocation0] sm:$0x1] %vm63_vm10, %v62_v21  }
  0x88   :  { %v68_v22 = vpop.permute.xlu0 %67  }
  0x89   :  { %70 = vst.msk [vmem:[#allocation0] sm:$0x1] %vm69_vm11, %v68_v22  }
  0x90   :  { %v75_v23 = vld [vmem:[#allocation0] sm:$0x1] }
  0x91   :  { %78 = vst [vmem:[%s162_s1] sm:$0x1] %v75_v23 }

// kernel: tile.36
= control target key start
LH: loop header
LB: loop body
LE: loop exit
PB: predicated region body
PF: predicated region fallthrough
CT: control target
= control target key end

     0   :  { %s22_s0 = inlined_call_operand.vmem [shape: f32[20], index: 0, kind: input, shape index: {}]   ;;  %s23_s1 = inlined_call_operand.vmem [shape: f32[4,20], index: 1, kind: output, shape index: {}]  }
   0x1   :  { %v4_v0 = vld [vmem:[%s22_s0] ss:$0 sm:$0xff] }
   0x2   :  { %5 = vst [vmem:[%s23_s1] sm:$0xf] %v4_v0 }

// kernel: tile.37
= control target key start
LH: loop header
LB: loop body
LE: loop exit
PB: predicated region body
PF: predicated region fallthrough
CT: control target
= control target key end

     0   :  { %vm8_vm0 = vcmask 162816   ;;  %s40_s8 = smov 20   ;;  %s41_s9 = smov 40   ;;  %vm14_vm1 = vcmask 654816   ;;  %vm20_vm2 = vcmask 490816   ;;  %vm26_vm3 = vcmask 326816   ;;  %s58_s0 = inlined_call_operand.vmem [shape: f32[4,20], index: 0, kind: input, shape index: {}]   ;;  %s59_s1 = inlined_call_operand.vmem [shape: f32[1,80], index: 1, kind: output, shape index: {}]  }
   0x1   :  { %v5_v0 = vld [vmem:[%s58_s0] sm:$0xf]  ;;  %s39_s0 = smov 60  }
   0x2   :  { %6 = vst [vmem:[#allocation1] sm:$0xf] %v5_v0 }
   0x9   :  { %v11_v1 = vld [vmem:[#allocation1 + $0x3] sm:$0x1]   ;;  %v23_v2 = vld [vmem:[#allocation1 + $0x1] sm:$0x1]   ;;  %v7_v3 = vld [vmem:[#allocation1] sm:$0x1]  }
   0xa   :  { %12 = vrot.lane.b32.xlu0 %v11_v1, %s39_s0  ;;  %24 = vrot.lane.b32.xlu1 %v23_v2, %s40_s8  ;;  %v17_v4 = vld [vmem:[#allocation1 + $0x2] sm:$0x1]   ;;  %9 = vst.msk [vmem:[#allocation0] sm:$0x1] %vm8_vm0, %v7_v3  }
   0xe   :  { %18 = vrot.lane.b32.xlu0 %v17_v4, %s41_s9 }
  0x7c   :  { %v13_v5 = vpop.permute.xlu0 %12   ;;  %v25_v6 = vpop.permute.xlu1 %24  }
  0x7d   :  { %15 = vst.msk [vmem:[#allocation0] sm:$0x1] %vm14_vm1, %v13_v5  }
  0x80   :  { %v19_v7 = vpop.permute.xlu0 %18  }
  0x81   :  { %21 = vst.msk [vmem:[#allocation0] sm:$0x1] %vm20_vm2, %v19_v7  }
  0x82   :  { %27 = vst.msk [vmem:[#allocation0] sm:$0x1] %vm26_vm3, %v25_v6  }
  0x89   :  { %v32_v8 = vld [vmem:[#allocation0] sm:$0x1] }
  0x8a   :  { %35 = vst [vmem:[%s59_s1] sm:$0x1] %v32_v8 }

// kernel: net_forward.1
= control target key start
LH: loop header
LB: loop body
LE: loop exit
PB: predicated region body
PF: predicated region fallthrough
CT: control target
= control target key end

     0   :  { %s5160_s30 = smov 0   ;;  %s7451_s0 = inlined_call_operand.vmem [shape: bf16[2,28,16,28], index: 0, kind: input, shape index: {}]   ;;  %s7452_s1 = inlined_call_operand.vmem [shape: bf16[5,28,256], index: 1, kind: input, shape index: {}]   ;;  %s7453_s2 = inlined_call_operand.vmem [shape: f32[1,120], index: 2, kind: input, shape index: {}]   ;;  %s7454_s3 = inlined_call_operand.vmem [shape: bf16[5,120,256], index: 3, kind: input, shape index: {}]   ;;  %s7455_s4 = inlined_call_operand.vmem [shape: f32[1,80], index: 4, kind: input, shape index: {}]   ;;  %s7456_s5 = inlined_call_operand.vmem [shape: bf16[4,80,50], index: 5, kind: input, shape index: {}]   ;;  %s7457_s6 = inlined_call_operand.vmem [shape: f32[1,50], index: 6, kind: input, shape index: {}]   ;;  %s7458_s7 = inlined_call_operand.vmem [shape: bf16[50,10], index: 7, kind: input, shape index: {}]   ;;  %s7459_s8 = inlined_call_operand.vmem [shape: f32[1,10], index: 8, kind: input, shape index: {}]   ;;  %s7460_s9 = inlined_call_operand.vmem [shape: f32[32,10], index: 9, kind: output, shape index: {}]  }
   0x1 LB: > { %s5166_s10 = sadd.s32 4294967295, %s5105_s30   ;;  %p4316_p0 = scmp.ge.s32.totalorder %s5105_s30, 1  ;;  %s5105_s30 = sphi %s5160_s30, %s19_s30  }
   0x2   : > { %p287_p1 = scmp.lt.s32.totalorder %s5105_s30, 3 }
   0x4   : > { %p288_p2 = pnand %p4316_p0, %p287_p1 }
   0x6   : > { %291 = sbr.rel (%p288_p2) target bundleno = 1869 (0x74d), region = 56 }
   0xb   : > { %v4872_v0 = vld [vmem:[%s7452_s1 + $0x34] ss:$8 sps:$4 sm:$0x3f]   ;;  %vm611_vm0 = vcmask 1045504   ;;  %v4875_v2 = vld [vmem:[%s7452_s1 + $0x24] ss:$8 sps:$4 sm:$0xff]  }
   0xc   : > { %v4874_v1 = vld [vmem:[%s7452_s1 + $0x30] ss:$8 sps:$4 sm:$0x3f]   ;;  %4352 = vmatprep.subr.msk.bf16.mxu0 %vm611_vm0, %v4872_v0  ;;  %4856 = vmatprep.subr.msk.bf16.mxu1 %vm611_vm0, %v4872_v0  ;;  %v4877_v3 = vld [vmem:[%s7452_s1 + $0x20] ss:$8 sps:$4 sm:$0xff]   ;;  %p323_p3 = scmp.lt.s32.totalorder %s5166_s10, 1 }
   0xd   : > { %v613_v4 = vsel %vm611_vm0, %v4874_v1, 0  ;;  %v7461_v5 = vmov 0   ;;  %v4880_v6 = vld [vmem:[%s7452_s1 + $0x14] ss:$8 sps:$4 sm:$0x3f]   ;;  %vm538_vm1 = vcmask 228352  }
   0xe   : > { %650 = vmatprep.mubr.bf16.mxu0 %v7461_v5  ;;  %880 = vmatprep.mubr.bf16.mxu1 %v7461_v5  ;;  %s324_s19 = scalar_select %p323_p3, %s5166_s10, 1  ;;  %v4882_v7 = vld [vmem:[%s7452_s1 + $0x54] ss:$8 sps:$4 sm:$0x3f]   ;;  %v4888_v10 = vld [vmem:[%s7452_s1 + $0x4] ss:$8 sps:$4 sm:$0xff]  }
   0xf   : > { %631 = vmatpush1.bf16.msra.mxu0 %v613_v4  ;;  %4858 = vmatpush1.bf16.msra.mxu1 %v613_v4  ;;  %v4884_v8 = vld [vmem:[%s7452_s1 + $0x10] ss:$8 sps:$4 sm:$0x3f]   ;;  %v4903_v15 = vld [vmem:[%s7452_s1 + $0x44] ss:$8 sps:$4 sm:$0xff]   ;;  %vm2684_vm2 = vcmask 1043456  }
  0x10   : > { %632 = vmatprep.subr.bf16.mxu0 %v4875_v2  ;;  %4857 = vmatprep.subr.bf16.mxu1 %v4875_v2  ;;  %s4860_s26 = smul.u32 224, %s324_s19  ;;  %v4885_v9 = vld [vmem:[%s7452_s1 + $0x50] ss:$8 sps:$4 sm:$0x3f]   ;;  %v918_v14 = vsel %vm611_vm0, %v4884_v8, 0  ;;  %vm2659_vm3 = vcmask 982016  }
  0x11   : > { %v1228_v12 = vsel %vm611_vm0, %v4885_v9, 0  ;;  %v4901_v16 = vld [vmem:[%s7452_s1 + $0x40] ss:$8 sps:$4 sm:$0xff]   ;;  %v4915_v25 = vld [vmem:[%s7452_s1 + $0x74] ss:$8 sps:$4 sm:$0x3f]  }
  0x12   : > { %s5204_s12 = scalar_lea.vmem %s7451_s0, %s4860_s26  ;;  %v4886_v17 = vld [vmem:[%s7452_s1] ss:$8 sps:$4 sm:$0xff]   ;;  %v4917_v26 = vld [vmem:[%s7452_s1 + $0x70] ss:$8 sps:$4 sm:$0x3f]   ;;  %vm5109_vm4 = vmmov 0  }
  0x13   : > { %633 = vmatpush1.bf16.msra.mxu0 %v4877_v3  ;;  %4859 = vmatpush1.bf16.msra.mxu1 %v4877_v3  ;;  %v4878_v11 = vld [vmem:[%s5204_s12 + $0x8] sm:$0xff]   ;;  %v4879_v13 = vld [vmem:[%s5204_s12 + $0xc0] sm:$0xff]   ;;  %v5229_v18 = vld [vmem:[%s5204_s12 + $0x10] sm:$0xff]   ;;  %v1634_v28 = vsel %vm611_vm0, %v4917_v26, 0  ;;  %vm3838_vm5 = vcmask 654336   ;;  %vm4182_vm6 = vcmask 1040384  }
  0x14   : > { %4382 = vmatprep.subr.msk.bf16.mxu1 %vm611_vm0, %v4880_v6  ;;  %4416 = vmatprep.subr.msk.bf16.mxu0 %vm611_vm0, %v4882_v7  ;;  %v4890_v19 = vld [vmem:[%s5204_s12] sm:$0xff]   ;;  %v5238_v20 = vld [vmem:[%s5204_s12 + $0x18] sm:$0xff]   ;;  %v5255_v22 = vld [vmem:[%s5204_s12 + $0x28] sm:$0xff]   ;;  %vm4178_vm7 = vcmask 408576   ;;  %vm4227_vm8 = vcmask 80896   ;;  %s4318_s21 = sshll.u32 %s5166_s10, 1 }
  0x15   : > { %v5246_v21 = vld [vmem:[%s5204_s12 + $0x20] sm:$0xff]   ;;  %v5264_v23 = vld [vmem:[%s5204_s12 + $0x30] sm:$0xff]   ;;  %v5273_v24 = vld [vmem:[%s5204_s12 + $0x38] sm:$0xff]   ;;  %p329_p4 = scmp.lt.s32.totalorder %s4318_s21, 3 }
  0x16   : > { %4353 = vmatmul.mubr.msk.bf16.vlgmr.msra.gmra.mxu0 %vm538_vm1, %v4878_v11  ;;  %4376 = vmatmul.mubr.msk.bf16.vlgmr.msra.gmra.mxu1 %vm538_vm1, %v4879_v13  ;;  %v5289_v27 = vld [vmem:[%s5204_s12 + $0x40] sm:$0xff]   ;;  %v4918_v29 = vld [vmem:[%s7452_s1 + $0x94] ss:$8 sps:$4 sm:$0x3f]   ;;  %v5302_v30 = vld [vmem:[%s5204_s12 + $0x48] sm:$0xff]  }
  0x17   : > { %1246 = vmatpush1.bf16.msra.mxu0 %v1228_v12  ;;  %936 = vmatpush1.bf16.msra.mxu1 %v918_v14  ;;  %v5312_v31 = vld [vmem:[%s5204_s12 + $0x50] sm:$0xff]   ;;  %v4923_v32 = vld [vmem:[%s7452_s1 + $0x64] ss:$8 sps:$4 sm:$0xff]   ;;  %v4921_v33 = vld [vmem:[%s7452_s1 + $0x60] ss:$8 sps:$4 sm:$0xff]   ;;  %s7787_s21 = smov (!%p329_p4, %s4318_s21), 3 }
  0x18   : > { %660 = vmatprep.mubr.bf16.mxu0 %v7461_v5  ;;  %937 = vmatprep.subr.bf16.mxu1 %v4888_v10  ;;  %v5327_v34 = vld [vmem:[%s5204_s12 + $0x58] sm:$0xff]   ;;  %v5336_v35 = vld [vmem:[%s5204_s12 + $0x60] sm:$0xff]   ;;  %v5345_v36 = vld [vmem:[%s5204_s12 + $0x68] sm:$0xff]   ;;  %s4319_s22 = sshll.u32 %s7787_s21, 3 }
  0x19   : > { %955 = vmatprep.mubr.bf16.mxu1 %v7461_v5  ;;  %1247 = vmatprep.subr.bf16.mxu0 %v4903_v15  ;;  %v5354_v37 = vld [vmem:[%s5204_s12 + $0x70] sm:$0xff]   ;;  %v5363_v38 = vld [vmem:[%s5204_s12 + $0x78] sm:$0xff]   ;;  %v5372_v39 = vld [vmem:[%s5204_s12 + $0x80] sm:$0xff]   ;;  %s332_s25 = scalar_lea.vmem %s7460_s9, %s4319_s22 }
  0x1a   : > { %v5381_v40 = vld [vmem:[%s5204_s12 + $0x88] sm:$0xff]   ;;  %v5390_v41 = vld [vmem:[%s5204_s12 + $0x90] sm:$0xff]   ;;  %v5399_v42 = vld [vmem:[%s5204_s12 + $0x98] sm:$0xff]  }
  0x1b   : > { %1248 = vmatpush1.bf16.msra.mxu0 %v4901_v16  ;;  %938 = vmatpush1.bf16.msra.mxu1 %v4886_v17  ;;  %v5408_v43 = vld [vmem:[%s5204_s12 + $0xa0] sm:$0xff]   ;;  %v5417_v44 = vld [vmem:[%s5204_s12 + $0xa8] sm:$0xff]   ;;  %v5426_v45 = vld [vmem:[%s5204_s12 + $0xb0] sm:$0xff]  }
  0x1c   : > { %4450 = vmatprep.subr.msk.bf16.mxu1 %vm611_vm0, %v4915_v25  ;;  %4484 = vmatprep.subr.msk.bf16.mxu0 %vm611_vm0, %v4918_v29  ;;  %v5435_v46 = vld [vmem:[%s5204_s12 + $0xb8] sm:$0xff]   ;;  %v4926_v49 = vld [vmem:[%s7452_s1 + $0x84] ss:$8 sps:$4 sm:$0xff]   ;;  %v4924_v50 = vld [vmem:[%s7452_s1 + $0x80] ss:$8 sps:$4 sm:$0xff]  }
  0x1d   : > { %v4920_v47 = vld [vmem:[%s7452_s1 + $0x90] ss:$8 sps:$4 sm:$0x3f]  }
  0x1e   : > { %4354 = vmatmul.mubr.msk.bf16.gmra.mxu0 %vm538_vm1, %v5229_v18  ;;  %4383 = vmatmul.mubr.msk.bf16.vlgmr.msra.gmra.mxu1 %vm538_vm1, %v4890_v19  ;;  %v2040_v48 = vsel %vm611_vm0, %v4920_v47, 0 }
  0x1f   : > { %670 = vmatprep.mubr.bf16.mxu0 %v7461_v5  ;;  %965 = vmatprep.mubr.bf16.mxu1 %v7461_v5 }
  0x20   : > { %1652 = vmatpush1.bf16.msra.mxu1 %v1634_v28 }
  0x21   : > { %1653 = vmatprep.subr.bf16.mxu1 %v4923_v32 }
  0x24   : > { %1654 = vmatpush1.bf16.msra.mxu1 %v4921_v33 }
  0x26   : > { %4355 = vmatmul.mubr.msk.bf16.gmra.mxu0 %vm538_vm1, %v5238_v20  ;;  %4384 = vmatmul.mubr.msk.bf16.gmra.mxu1 %vm538_vm1, %v4878_v11 }
  0x27   : > { %680 = vmatprep.mubr.bf16.mxu0 %v7461_v5  ;;  %975 = vmatprep.mubr.bf16.mxu1 %v7461_v5 }
  0x2e   : > { %4356 = vmatmul.mubr.msk.bf16.gmra.mxu0 %vm538_vm1, %v5246_v21  ;;  %4385 = vmatmul.mubr.msk.bf16.gmra.mxu1 %vm538_vm1, %v5229_v18 }
  0x2f   : > { %690 = vmatprep.mubr.bf16.mxu0 %v7461_v5  ;;  %985 = vmatprep.mubr.bf16.mxu1 %v7461_v5 }
  0x36   : > { %4357 = vmatmul.mubr.msk.bf16.gmra.mxu0 %vm538_vm1, %v5255_v22  ;;  %4386 = vmatmul.mubr.msk.bf16.gmra.mxu1 %vm538_vm1, %v5238_v20 }
  0x37   : > { %700 = vmatprep.mubr.bf16.mxu0 %v7461_v5  ;;  %995 = vmatprep.mubr.bf16.mxu1 %v7461_v5 }
  0x3e   : > { %4358 = vmatmul.mubr.msk.bf16.gmra.mxu0 %vm538_vm1, %v5264_v23  ;;  %4387 = vmatmul.mubr.msk.bf16.gmra.mxu1 %vm538_vm1, %v5246_v21 }
  0x3f   : > { %710 = vmatprep.mubr.bf16.mxu0 %v7461_v5  ;;  %1005 = vmatprep.mubr.bf16.mxu1 %v7461_v5 }
  0x46   : > { %4359 = vmatmul.mubr.msk.bf16.gmra.mxu0 %vm538_vm1, %v5273_v24  ;;  %4388 = vmatmul.mubr.msk.bf16.gmra.mxu1 %vm538_vm1, %v5255_v22 }
  0x47   : > { %720 = vmatprep.mubr.bf16.mxu0 %v7461_v5  ;;  %1015 = vmatprep.mubr.bf16.mxu1 %v7461_v5 }
  0x4e   : > { %4360 = vmatmul.mubr.msk.bf16.gmra.mxu0 %vm538_vm1, %v5289_v27  ;;  %4389 = vmatmul.mubr.msk.bf16.gmra.mxu1 %vm538_vm1, %v5264_v23 }
  0x4f   : > { %730 = vmatprep.mubr.bf16.mxu0 %v7461_v5  ;;  %1025 = vmatprep.mubr.bf16.mxu1 %v7461_v5 }
  0x56   : > { %4361 = vmatmul.mubr.msk.bf16.gmra.mxu0 %vm538_vm1, %v5302_v30  ;;  %4390 = vmatmul.mubr.msk.bf16.gmra.mxu1 %vm538_vm1, %v5273_v24 }
  0x57   : > { %740 = vmatprep.mubr.bf16.mxu0 %v7461_v5  ;;  %1035 = vmatprep.mubr.bf16.mxu1 %v7461_v5 }
  0x5e   : > { %4362 = vmatmul.mubr.msk.bf16.gmra.mxu0 %vm538_vm1, %v5312_v31  ;;  %4391 = vmatmul.mubr.msk.bf16.gmra.mxu1 %vm538_vm1, %v5289_v27 }
  0x5f   : > { %750 = vmatprep.mubr.bf16.mxu0 %v7461_v5  ;;  %1045 = vmatprep.mubr.bf16.mxu1 %v7461_v5 }
  0x66   : > { %4363 = vmatmul.mubr.msk.bf16.gmra.mxu0 %vm538_vm1, %v5327_v34  ;;  %4392 = vmatmul.mubr.msk.bf16.gmra.mxu1 %vm538_vm1, %v5302_v30 }
  0x67   : > { %760 = vmatprep.mubr.bf16.mxu0 %v7461_v5  ;;  %1055 = vmatprep.mubr.bf16.mxu1 %v7461_v5 }
  0x6e   : > { %4364 = vmatmul.mubr.msk.bf16.gmra.mxu0 %vm538_vm1, %v5336_v35  ;;  %4393 = vmatmul.mubr.msk.bf16.gmra.mxu1 %vm538_vm1, %v5312_v31 }
  0x6f   : > { %770 = vmatprep.mubr.bf16.mxu0 %v7461_v5  ;;  %1065 = vmatprep.mubr.bf16.mxu1 %v7461_v5 }
  0x76   : > { %4365 = vmatmul.mubr.msk.bf16.gmra.mxu0 %vm538_vm1, %v5345_v36  ;;  %4394 = vmatmul.mubr.msk.bf16.gmra.mxu1 %vm538_vm1, %v5327_v34 }
  0x77   : > { %780 = vmatprep.mubr.bf16.mxu0 %v7461_v5  ;;  %1075 = vmatprep.mubr.bf16.mxu1 %v7461_v5 }
  0x7e   : > { %4366 = vmatmul.mubr.msk.bf16.gmra.mxu0 %vm538_vm1, %v5354_v37  ;;  %4395 = vmatmul.mubr.msk.bf16.gmra.mxu1 %vm538_vm1, %v5336_v35 }
  0x7f   : > { %790 = vmatprep.mubr.bf16.mxu0 %v7461_v5  ;;  %1085 = vmatprep.mubr.bf16.mxu1 %v7461_v5 }
  0x86   : > { %4367 = vmatmul.mubr.msk.bf16.gmra.mxu0 %vm538_vm1, %v5363_v38  ;;  %4396 = vmatmul.mubr.msk.bf16.gmra.mxu1 %vm538_vm1, %v5345_v36 }
  0x87   : > { %800 = vmatprep.mubr.bf16.mxu0 %v7461_v5  ;;  %1095 = vmatprep.mubr.bf16.mxu1 %v7461_v5 }
  0x8e   : > { %4368 = vmatmul.mubr.msk.bf16.gmra.mxu0 %vm538_vm1, %v5372_v39  ;;  %4397 = vmatmul.mubr.msk.bf16.gmra.mxu1 %vm538_vm1, %v5354_v37 }
  0x8f   : > { %810 = vmatprep.mubr.bf16.mxu0 %v7461_v5  ;;  %1105 = vmatprep.mubr.bf16.mxu1 %v7461_v5 }
  0x96   : > { %4369 = vmatmul.mubr.msk.bf16.gmra.mxu0 %vm538_vm1, %v5381_v40  ;;  %4398 = vmatmul.mubr.msk.bf16.gmra.mxu1 %vm538_vm1, %v5363_v38 }
  0x97   : > { %820 = vmatprep.mubr.bf16.mxu0 %v7461_v5  ;;  %1115 = vmatprep.mubr.bf16.mxu1 %v7461_v5 }
  0x9e   : > { %4370 = vmatmul.mubr.msk.bf16.gmra.mxu0 %vm538_vm1, %v5390_v41  ;;  %4399 = vmatmul.mubr.msk.bf16.gmra.mxu1 %vm538_vm1, %v5372_v39 }
  0x9f   : > { %830 = vmatprep.mubr.bf16.mxu0 %v7461_v5  ;;  %1125 = vmatprep.mubr.bf16.mxu1 %v7461_v5 }
  0xa6   : > { %4371 = vmatmul.mubr.msk.bf16.gmra.mxu0 %vm538_vm1, %v5399_v42  ;;  %4400 = vmatmul.mubr.msk.bf16.gmra.mxu1 %vm538_vm1, %v5381_v40 }
  0xa7   : > { %840 = vmatprep.mubr.bf16.mxu0 %v7461_v5  ;;  %1135 = vmatprep.mubr.bf16.mxu1 %v7461_v5 }
  0xae   : > { %4372 = vmatmul.mubr.msk.bf16.gmra.mxu0 %vm538_vm1, %v5408_v43  ;;  %4401 = vmatmul.mubr.msk.bf16.gmra.mxu1 %vm538_vm1, %v5390_v41 }
  0xaf   : > { %850 = vmatprep.mubr.bf16.mxu0 %v7461_v5  ;;  %1145 = vmatprep.mubr.bf16.mxu1 %v7461_v5 }
  0xb6   : > { %4373 = vmatmul.mubr.msk.bf16.gmra.mxu0 %vm538_vm1, %v5417_v44  ;;  %4402 = vmatmul.mubr.msk.bf16.gmra.mxu1 %vm538_vm1, %v5399_v42 }
  0xb7   : > { %860 = vmatprep.mubr.bf16.mxu0 %v7461_v5  ;;  %1155 = vmatprep.mubr.bf16.mxu1 %v7461_v5 }
  0xbe   : > { %4374 = vmatmul.mubr.msk.bf16.gmra.mxu0 %vm538_vm1, %v5426_v45  ;;  %4403 = vmatmul.mubr.msk.bf16.gmra.mxu1 %vm538_vm1, %v5408_v43 }
  0xbf   : > { %870 = vmatprep.mubr.bf16.mxu0 %v7461_v5  ;;  %1165 = vmatprep.mubr.bf16.mxu1 %v7461_v5 }
  0xc6   : > { %4375 = vmatmul.mubr.msk.bf16.gmra.mxu0 %vm538_vm1, %v5435_v46  ;;  %4404 = vmatmul.mubr.msk.bf16.gmra.mxu1 %vm538_vm1, %v5417_v44 }
  0xc7   : > { %1265 = vmatprep.mubr.bf16.mxu0 %v7461_v5  ;;  %1175 = vmatprep.mubr.bf16.mxu1 %v7461_v5 }
  0xce   : > { %4417 = vmatmul.mubr.msk.bf16.vlgmr.msra.gmra.mxu0 %vm538_vm1, %v5229_v18  ;;  %4405 = vmatmul.mubr.msk.bf16.gmra.mxu1 %vm538_vm1, %v5426_v45 }
  0xcf   : > { %2058 = vmatpush1.bf16.msra.mxu0 %v2040_v48  ;;  %1185 = vmatprep.mubr.bf16.mxu1 %v7461_v5 }
  0xd0   : > { %1275 = vmatprep.mubr.bf16.mxu0 %v7461_v5  ;;  %2059 = vmatprep.subr.bf16.mxu0 %v4926_v49 }
  0xd3   : > { %2060 = vmatpush1.bf16.msra.mxu0 %v4924_v50 }
  0xd6   : > { %v652_v51 = vpop.f32.mrf.mxu0  ;;  %4418 = vmatmul.mubr.msk.bf16.gmra.mxu0 %vm538_vm1, %v5238_v20  ;;  %v5461_v52 = vpop.f32.mrf.mxu1  ;;  %4406 = vmatmul.mubr.msk.bf16.gmra.mxu1 %vm538_vm1, %v5435_v46 }
  0xd7   : > { %7466 = vst [vmem:[#allocation2_spill] sm:$0xff] %v5461_v52  ;;  %1285 = vmatprep.mubr.bf16.mxu0 %v7461_v5  ;;  %1671 = vmatprep.mubr.bf16.mxu1 %v7461_v5 }
  0xd8   : > { %v654_v53 = vpop.f32.mrf.mxu0  ;;  %v5467_v54 = vpop.f32.mrf.mxu1 }
  0xd9   : > { %7467 = vst [vmem:[#allocation3_spill] sm:$0xff] %v5467_v54 }
  0xda   : > { %v656_v55 = vpop.f32.mrf.mxu0  ;;  %v5469_v56 = vpop.f32.mrf.mxu1 }
  0xdb   : > { %7468 = vst [vmem:[#allocation4_spill] sm:$0xff] %v5469_v56 }
  0xdc   : > { %v658_v57 = vpop.f32.mrf.mxu0  ;;  %v5471_v58 = vpop.f32.mrf.mxu1 }
  0xdd   : > { %7469 = vst [vmem:[#allocation5_spill] sm:$0xff] %v5471_v58 }
  0xde   : > { %v662_v59 = vpop.f32.mrf.mxu0  ;;  %4419 = vmatmul.mubr.msk.bf16.gmra.mxu0 %vm538_vm1, %v5246_v21  ;;  %v957_v60 = vpop.f32.mrf.mxu1  ;;  %4451 = vmatmul.mubr.msk.bf16.vlgmr.msra.gmra.mxu1 %vm538_vm1, %v5238_v20 }
  0xdf   : > { %1295 = vmatprep.mubr.bf16.mxu0 %v7461_v5  ;;  %v5478_v61 = vadd.f32 %v957_v60, %v652_v51  ;;  %1681 = vmatprep.mubr.bf16.mxu1 %v7461_v5 }
  0xe0   : > { %v664_v62 = vpop.f32.mrf.mxu0  ;;  %v959_v63 = vpop.f32.mrf.mxu1 }
  0xe1   : > { %v5481_v0 = vadd.f32 %v959_v63, %v654_v53 }
  0xe2   : > { %v666_v1 = vpop.f32.mrf.mxu0  ;;  %v961_v2 = vpop.f32.mrf.mxu1 }
  0xe3   : > { %v5483_v3 = vadd.f32 %v961_v2, %v656_v55 }
  0xe4   : > { %v668_v4 = vpop.f32.mrf.mxu0  ;;  %v963_v6 = vpop.f32.mrf.mxu1 }
  0xe5   : > { %v5485_v7 = vadd.f32 %v963_v6, %v658_v57 }
  0xe6   : > { %v672_v8 = vpop.f32.mrf.mxu0  ;;  %4420 = vmatmul.mubr.msk.bf16.gmra.mxu0 %vm538_vm1, %v5255_v22  ;;  %v967_v9 = vpop.f32.mrf.mxu1  ;;  %4452 = vmatmul.mubr.msk.bf16.gmra.mxu1 %vm538_vm1, %v5246_v21 }
  0xe7   : > { %1305 = vmatprep.mubr.bf16.mxu0 %v7461_v5  ;;  %v5492_v10 = vadd.f32 %v967_v9, %v662_v59  ;;  %1691 = vmatprep.mubr.bf16.mxu1 %v7461_v5 }
  0xe8   : > { %v674_v11 = vpop.f32.mrf.mxu0  ;;  %v969_v12 = vpop.f32.mrf.mxu1 }
  0xe9   : > { %v5495_v13 = vadd.f32 %v969_v12, %v664_v62 }
  0xea   : > { %v676_v14 = vpop.f32.mrf.mxu0  ;;  %v971_v15 = vpop.f32.mrf.mxu1 }
  0xeb   : > { %v5497_v16 = vadd.f32 %v971_v15, %v666_v1 }
  0xec   : > { %v678_v17 = vpop.f32.mrf.mxu0  ;;  %v973_v18 = vpop.f32.mrf.mxu1 }
  0xed   : > { %v5499_v19 = vadd.f32 %v973_v18, %v668_v4 }
  0xee   : > { %v682_v20 = vpop.f32.mrf.mxu0  ;;  %4421 = vmatmul.mubr.msk.bf16.gmra.mxu0 %vm538_vm1, %v5264_v23  ;;  %v977_v21 = vpop.f32.mrf.mxu1  ;;  %4453 = vmatmul.mubr.msk.bf16.gmra.mxu1 %vm538_vm1, %v5255_v22 }
  0xef   : > { %1315 = vmatprep.mubr.bf16.mxu0 %v7461_v5  ;;  %v5506_v25 = vadd.f32 %v977_v21, %v672_v8  ;;  %1701 = vmatprep.mubr.bf16.mxu1 %v7461_v5 }
  0xf0   : > { %v684_v26 = vpop.f32.mrf.mxu0  ;;  %v979_v28 = vpop.f32.mrf.mxu1 }
  0xf1   : > { %v5509_v29 = vadd.f32 %v979_v28, %v674_v11 }
  0xf2   : > { %v686_v32 = vpop.f32.mrf.mxu0  ;;  %v981_v33 = vpop.f32.mrf.mxu1 }
  0xf3   : > { %v5511_v47 = vadd.f32 %v981_v33, %v676_v14 }
  0xf4   : > { %v688_v48 = vpop.f32.mrf.mxu0  ;;  %v983_v49 = vpop.f32.mrf.mxu1 }
  0xf5   : > { %v5513_v50 = vadd.f32 %v983_v49, %v678_v17 }
  0xf6   : > { %v692_v51 = vpop.f32.mrf.mxu0  ;;  %4422 = vmatmul.mubr.msk.bf16.gmra.mxu0 %vm538_vm1, %v5273_v24  ;;  %v987_v22 = vpop.f32.mrf.mxu1  ;;  %4454 = vmatmul.mubr.msk.bf16.gmra.mxu1 %vm538_vm1, %v5264_v23 }
  0xf7   : > { %1325 = vmatprep.mubr.bf16.mxu0 %v7461_v5  ;;  %v5520_v53 = vadd.f32 %v987_v22, %v682_v20  ;;  %1711 = vmatprep.mubr.bf16.mxu1 %v7461_v5 }
  0xf8   : > { %v694_v55 = vpop.f32.mrf.mxu0  ;;  %v989_v57 = vpop.f32.mrf.mxu1 }
  0xf9   : > { %v5523_v59 = vadd.f32 %v989_v57, %v684_v26 }
  0xfa   : > { %v696_v60 = vpop.f32.mrf.mxu0  ;;  %v991_v62 = vpop.f32.mrf.mxu1 }
  0xfb   : > { %v5525_v63 = vadd.f32 %v991_v62, %v686_v32 }
  0xfc   : > { %v698_v1 = vpop.f32.mrf.mxu0  ;;  %v993_v2 = vpop.f32.mrf.mxu1 }
  0xfd   : > { %v5527_v4 = vadd.f32 %v993_v2, %v688_v48 }
  0xfe   : > { %v702_v6 = vpop.f32.mrf.mxu0  ;;  %4423 = vmatmul.mubr.msk.bf16.gmra.mxu0 %vm538_vm1, %v5289_v27  ;;  %v997_v23 = vpop.f32.mrf.mxu1  ;;  %4455 = vmatmul.mubr.msk.bf16.gmra.mxu1 %vm538_vm1, %v5273_v24 }
  0xff   : > { %1335 = vmatprep.mubr.bf16.mxu0 %v7461_v5  ;;  %v5534_v8 = vadd.f32 %v997_v23, %v692_v51  ;;  %1721 = vmatprep.mubr.bf16.mxu1 %v7461_v5 }
 0x100   : > { %v704_v9 = vpop.f32.mrf.mxu0  ;;  %v999_v11 = vpop.f32.mrf.mxu1 }
 0x101   : > { %v5537_v12 = vadd.f32 %v999_v11, %v694_v55 }
 0x102   : > { %v706_v14 = vpop.f32.mrf.mxu0  ;;  %v1001_v15 = vpop.f32.mrf.mxu1 }
 0x103   : > { %v5539_v17 = vadd.f32 %v1001_v15, %v696_v60 }
 0x104   : > { %v708_v18 = vpop.f32.mrf.mxu0  ;;  %v1003_v20 = vpop.f32.mrf.mxu1 }
 0x105   : > { %v5541_v21 = vadd.f32 %v1003_v20, %v698_v1 }
 0x106   : > { %v712_v26 = vpop.f32.mrf.mxu0  ;;  %4424 = vmatmul.mubr.msk.bf16.gmra.mxu0 %vm538_vm1, %v5302_v30  ;;  %v1007_v24 = vpop.f32.mrf.mxu1  ;;  %4456 = vmatmul.mubr.msk.bf16.gmra.mxu1 %vm538_vm1, %v5289_v27 }
 0x107   : > { %1345 = vmatprep.mubr.bf16.mxu0 %v7461_v5  ;;  %v5548_v28 = vadd.f32 %v1007_v24, %v702_v6  ;;  %1731 = vmatprep.mubr.bf16.mxu1 %v7461_v5 }
 0x108   : > { %v714_v32 = vpop.f32.mrf.mxu0  ;;  %v1009_v33 = vpop.f32.mrf.mxu1 }
 0x109   : > { %v5551_v48 = vadd.f32 %v1009_v33, %v704_v9 }
 0x10a   : > { %v716_v49 = vpop.f32.mrf.mxu0  ;;  %v1011_v51 = vpop.f32.mrf.mxu1 }
 0x10b   : > { %v5553_v22 = vadd.f32 %v1011_v51, %v706_v14 }
 0x10c   : > { %v718_v55 = vpop.f32.mrf.mxu0  ;;  %v1013_v57 = vpop.f32.mrf.mxu1 }
 0x10d   : > { %v5555_v60 = vadd.f32 %v1013_v57, %v708_v18 }
 0x10e   : > { %v722_v62 = vpop.f32.mrf.mxu0  ;;  %4425 = vmatmul.mubr.msk.bf16.gmra.mxu0 %vm538_vm1, %v5312_v31  ;;  %v1017_v27 = vpop.f32.mrf.mxu1  ;;  %4457 = vmatmul.mubr.msk.bf16.gmra.mxu1 %vm538_vm1, %v5302_v30 }
 0x10f   : > { %1355 = vmatprep.mubr.bf16.mxu0 %v7461_v5  ;;  %v5562_v1 = vadd.f32 %v1017_v27, %v712_v26  ;;  %1741 = vmatprep.mubr.bf16.mxu1 %v7461_v5 }
 0x110   : > { %v724_v2 = vpop.f32.mrf.mxu0  ;;  %v1019_v6 = vpop.f32.mrf.mxu1 }
 0x111   : > { %v5565_v23 = vadd.f32 %v1019_v6, %v714_v32 }
 0x112   : > { %v726_v9 = vpop.f32.mrf.mxu0  ;;  %v1021_v11 = vpop.f32.mrf.mxu1 }
 0x113   : > { %v5567_v14 = vadd.f32 %v1021_v11, %v716_v49 }
 0x114   : > { %v728_v15 = vpop.f32.mrf.mxu0  ;;  %v1023_v18 = vpop.f32.mrf.mxu1 }
 0x115   : > { %v5569_v20 = vadd.f32 %v1023_v18, %v718_v55 }
 0x116   : > { %v732_v24 = vpop.f32.mrf.mxu0  ;;  %4426 = vmatmul.mubr.msk.bf16.gmra.mxu0 %vm538_vm1, %v5327_v34  ;;  %v1027_v30 = vpop.f32.mrf.mxu1  ;;  %4458 = vmatmul.mubr.msk.bf16.gmra.mxu1 %vm538_vm1, %v5312_v31 }
 0x117   : > { %1365 = vmatprep.mubr.bf16.mxu0 %v7461_v5  ;;  %v5576_v26 = vadd.f32 %v1027_v30, %v722_v62  ;;  %1751 = vmatprep.mubr.bf16.mxu1 %v7461_v5 }
 0x118   : > { %v734_v32 = vpop.f32.mrf.mxu0  ;;  %v1029_v33 = vpop.f32.mrf.mxu1 }
 0x119   : > { %v5579_v49 = vadd.f32 %v1029_v33, %v724_v2 }
 0x11a   : > { %v736_v51 = vpop.f32.mrf.mxu0  ;;  %v1031_v55 = vpop.f32.mrf.mxu1 }
 0x11b   : > { %v5581_v57 = vadd.f32 %v1031_v55, %v726_v9 }
 0x11c   : > { %v738_v27 = vpop.f32.mrf.mxu0  ;;  %v1033_v6 = vpop.f32.mrf.mxu1 }
 0x11d   : > { %v5583_v11 = vadd.f32 %v1033_v6, %v728_v15 }
 0x11e   : > { %v742_v18 = vpop.f32.mrf.mxu0  ;;  %4427 = vmatmul.mubr.msk.bf16.gmra.mxu0 %vm538_vm1, %v5336_v35  ;;  %v1037_v31 = vpop.f32.mrf.mxu1  ;;  %4459 = vmatmul.mubr.msk.bf16.gmra.mxu1 %vm538_vm1, %v5327_v34 }
 0x11f   : > { %1375 = vmatprep.mubr.bf16.mxu0 %v7461_v5  ;;  %v5590_v62 = vadd.f32 %v1037_v31, %v732_v24  ;;  %1761 = vmatprep.mubr.bf16.mxu1 %v7461_v5 }
 0x120   : > { %v744_v2 = vpop.f32.mrf.mxu0  ;;  %v1039_v9 = vpop.f32.mrf.mxu1 }
 0x121   : > { %v5593_v30 = vadd.f32 %v1039_v9, %v734_v32 }
 0x122   : > { %v746_v15 = vpop.f32.mrf.mxu0  ;;  %v1041_v33 = vpop.f32.mrf.mxu1 }
 0x123   : > { %v5595_v55 = vadd.f32 %v1041_v33, %v736_v51 }
 0x124   : > { %v748_v6 = vpop.f32.mrf.mxu0  ;;  %v1043_v58 = vpop.f32.mrf.mxu1 }
 0x125   : > { %7470 = vst [vmem:[#allocation6_spill] sm:$0xff] %v5595_v55  ;;  %v5597_v56 = vadd.f32 %v1043_v58, %v738_v27 }
 0x126   : > { %v752_v54 = vpop.f32.mrf.mxu0  ;;  %4428 = vmatmul.mubr.msk.bf16.gmra.mxu0 %vm538_vm1, %v5345_v36  ;;  %v1047_v34 = vpop.f32.mrf.mxu1  ;;  %4460 = vmatmul.mubr.msk.bf16.gmra.mxu1 %vm538_vm1, %v5336_v35 }
 0x127   : > { %7471 = vst [vmem:[#allocation7_spill] sm:$0xff] %v5597_v56  ;;  %1385 = vmatprep.mubr.bf16.mxu0 %v7461_v5  ;;  %v5604_v24 = vadd.f32 %v1047_v34, %v742_v18  ;;  %1771 = vmatprep.mubr.bf16.mxu1 %v7461_v5 }
 0x128   : > { %v754_v32 = vpop.f32.mrf.mxu0  ;;  %v1049_v51 = vpop.f32.mrf.mxu1 }
 0x129   : > { %v5607_v31 = vadd.f32 %v1049_v51, %v744_v2 }
 0x12a   : > { %v756_v58 = vpop.f32.mrf.mxu0  ;;  %v1051_v27 = vpop.f32.mrf.mxu1 }
 0x12b   : > { %7472 = vst [vmem:[#allocation8_spill] sm:$0xff] %v5607_v31  ;;  %v5609_v9 = vadd.f32 %v1051_v27, %v746_v15 }
 0x12c   : > { %v758_v33 = vpop.f32.mrf.mxu0  ;;  %v1053_v52 = vpop.f32.mrf.mxu1 }
 0x12d   : > { %7473 = vst [vmem:[#allocation9_spill] sm:$0xff] %v5609_v9  ;;  %v5611_v56 = vadd.f32 %v1053_v52, %v748_v6 }
 0x12e   : > { %v762_v55 = vpop.f32.mrf.mxu0  ;;  %4429 = vmatmul.mubr.msk.bf16.gmra.mxu0 %vm538_vm1, %v5354_v37  ;;  %v1057_v35 = vpop.f32.mrf.mxu1  ;;  %4461 = vmatmul.mubr.msk.bf16.gmra.mxu1 %vm538_vm1, %v5345_v36 }
 0x12f   : > { %7474 = vst [vmem:[#allocation10_spill] sm:$0xff] %v5611_v56  ;;  %1395 = vmatprep.mubr.bf16.mxu0 %v7461_v5  ;;  %v5618_v18 = vadd.f32 %v1057_v35, %v752_v54  ;;  %1781 = vmatprep.mubr.bf16.mxu1 %v7461_v5 }
 0x130   : > { %v764_v2 = vpop.f32.mrf.mxu0  ;;  %v1059_v15 = vpop.f32.mrf.mxu1 }
 0x131   : > { %v5621_v34 = vadd.f32 %v1059_v15, %v754_v32 }
 0x132   : > { %v766_v52 = vpop.f32.mrf.mxu0  ;;  %v1061_v6 = vpop.f32.mrf.mxu1 }
 0x133   : > { %7475 = vst [vmem:[#allocation11_spill] sm:$0xff] %v5621_v34  ;;  %v5623_v51 = vadd.f32 %v1061_v6, %v756_v58 }
 0x134   : > { %v768_v27 = vpop.f32.mrf.mxu0  ;;  %v1063_v56 = vpop.f32.mrf.mxu1 }
 0x135   : > { %7476 = vst [vmem:[#allocation12_spill] sm:$0xff] %v5623_v51  ;;  %v5625_v9 = vadd.f32 %v1063_v56, %v758_v33 }
 0x136   : > { %v772_v31 = vpop.f32.mrf.mxu0  ;;  %4430 = vmatmul.mubr.msk.bf16.gmra.mxu0 %vm538_vm1, %v5363_v38  ;;  %v1067_v36 = vpop.f32.mrf.mxu1  ;;  %4462 = vmatmul.mubr.msk.bf16.gmra.mxu1 %vm538_vm1, %v5354_v37 }
 0x137   : > { %7477 = vst [vmem:[#allocation13_spill] sm:$0xff] %v5625_v9  ;;  %1405 = vmatprep.mubr.bf16.mxu0 %v7461_v5  ;;  %v5632_v54 = vadd.f32 %v1067_v36, %v762_v55  ;;  %1791 = vmatprep.mubr.bf16.mxu1 %v7461_v5 }
 0x138   : > { %v774_v32 = vpop.f32.mrf.mxu0  ;;  %v1069_v58 = vpop.f32.mrf.mxu1 }
 0x139   : > { %v5635_v35 = vadd.f32 %v1069_v58, %v764_v2 }
 0x13a   : > { %v776_v56 = vpop.f32.mrf.mxu0  ;;  %v1071_v33 = vpop.f32.mrf.mxu1 }
 0x13b   : > { %7478 = vst [vmem:[#allocation14_spill] sm:$0xff] %v5635_v35  ;;  %v5637_v15 = vadd.f32 %v1071_v33, %v766_v52 }
 0x13c   : > { %v778_v6 = vpop.f32.mrf.mxu0  ;;  %v1073_v9 = vpop.f32.mrf.mxu1 }
 0x13d   : > { %7479 = vst [vmem:[#allocation15_spill] sm:$0xff] %v5637_v15  ;;  %v5639_v51 = vadd.f32 %v1073_v9, %v768_v27 }
 0x13e   : > { %v782_v34 = vpop.f32.mrf.mxu0  ;;  %4431 = vmatmul.mubr.msk.bf16.gmra.mxu0 %vm538_vm1, %v5372_v39  ;;  %v1077_v37 = vpop.f32.mrf.mxu1  ;;  %4463 = vmatmul.mubr.msk.bf16.gmra.mxu1 %vm538_vm1, %v5363_v38 }
 0x13f   : > { %7480 = vst [vmem:[#allocation16_spill] sm:$0xff] %v5639_v51  ;;  %1415 = vmatprep.mubr.bf16.mxu0 %v7461_v5  ;;  %v5646_v55 = vadd.f32 %v1077_v37, %v772_v31  ;;  %1801 = vmatprep.mubr.bf16.mxu1 %v7461_v5 }
 0x140   : > { %v784_v2 = vpop.f32.mrf.mxu0  ;;  %v1079_v52 = vpop.f32.mrf.mxu1 }
 0x141   : > { %v5649_v36 = vadd.f32 %v1079_v52, %v774_v32 }
 0x142   : > { %v786_v9 = vpop.f32.mrf.mxu0  ;;  %v1081_v27 = vpop.f32.mrf.mxu1 }
 0x143   : > { %7481 = vst [vmem:[#allocation17_spill] sm:$0xff] %v5649_v36  ;;  %v5651_v58 = vadd.f32 %v1081_v27, %v776_v56 }
 0x144   : > { %v788_v33 = vpop.f32.mrf.mxu0  ;;  %v1083_v51 = vpop.f32.mrf.mxu1 }
 0x145   : > { %7482 = vst [vmem:[#allocation18_spill] sm:$0xff] %v5651_v58  ;;  %v5653_v15 = vadd.f32 %v1083_v51, %v778_v6 }
 0x146   : > { %v792_v35 = vpop.f32.mrf.mxu0  ;;  %4432 = vmatmul.mubr.msk.bf16.gmra.mxu0 %vm538_vm1, %v5381_v40  ;;  %v1087_v38 = vpop.f32.mrf.mxu1  ;;  %4464 = vmatmul.mubr.msk.bf16.gmra.mxu1 %vm538_vm1, %v5372_v39 }
 0x147   : > { %7483 = vst [vmem:[#allocation19_spill] sm:$0xff] %v5653_v15  ;;  %1425 = vmatprep.mubr.bf16.mxu0 %v7461_v5  ;;  %v5660_v31 = vadd.f32 %v1087_v38, %v782_v34  ;;  %1811 = vmatprep.mubr.bf16.mxu1 %v7461_v5 }
 0x148   : > { %v794_v32 = vpop.f32.mrf.mxu0  ;;  %v1089_v56 = vpop.f32.mrf.mxu1 }
 0x149   : > { %v5663_v37 = vadd.f32 %v1089_v56, %v784_v2 }
 0x14a   : > { %v796_v51 = vpop.f32.mrf.mxu0  ;;  %v1091_v6 = vpop.f32.mrf.mxu1 }
 0x14b   : > { %7484 = vst [vmem:[#allocation20_spill] sm:$0xff] %v5663_v37  ;;  %v5665_v52 = vadd.f32 %v1091_v6, %v786_v9 }
 0x14c   : > { %v798_v27 = vpop.f32.mrf.mxu0  ;;  %v1093_v15 = vpop.f32.mrf.mxu1 }
 0x14d   : > { %7485 = vst [vmem:[#allocation21_spill] sm:$0xff] %v5665_v52  ;;  %v5667_v58 = vadd.f32 %v1093_v15, %v788_v33 }
 0x14e   : > { %v802_v36 = vpop.f32.mrf.mxu0  ;;  %4433 = vmatmul.mubr.msk.bf16.gmra.mxu0 %vm538_vm1, %v5390_v41  ;;  %v1097_v39 = vpop.f32.mrf.mxu1  ;;  %4465 = vmatmul.mubr.msk.bf16.gmra.mxu1 %vm538_vm1, %v5381_v40 }
 0x14f   : > { %7486 = vst [vmem:[#allocation22_spill] sm:$0xff] %v5667_v58  ;;  %1435 = vmatprep.mubr.bf16.mxu0 %v7461_v5  ;;  %v5674_v34 = vadd.f32 %v1097_v39, %v792_v35  ;;  %1821 = vmatprep.mubr.bf16.mxu1 %v7461_v5 }
 0x150   : > { %v804_v2 = vpop.f32.mrf.mxu0  ;;  %v1099_v9 = vpop.f32.mrf.mxu1 }
 0x151   : > { %v5677_v38 = vadd.f32 %v1099_v9, %v794_v32 }
 0x152   : > { %v806_v15 = vpop.f32.mrf.mxu0  ;;  %v1101_v33 = vpop.f32.mrf.mxu1 }
 0x153   : > { %7487 = vst [vmem:[#allocation23_spill] sm:$0xff] %v5677_v38  ;;  %v5679_v56 = vadd.f32 %v1101_v33, %v796_v51 }
 0x154   : > { %v808_v6 = vpop.f32.mrf.mxu0  ;;  %v1103_v58 = vpop.f32.mrf.mxu1 }
 0x155   : > { %7488 = vst [vmem:[#allocation24_spill] sm:$0xff] %v5679_v56  ;;  %v5681_v52 = vadd.f32 %v1103_v58, %v798_v27 }
 0x156   : > { %v812_v37 = vpop.f32.mrf.mxu0  ;;  %4434 = vmatmul.mubr.msk.bf16.gmra.mxu0 %vm538_vm1, %v5399_v42  ;;  %v1107_v40 = vpop.f32.mrf.mxu1  ;;  %4466 = vmatmul.mubr.msk.bf16.gmra.mxu1 %vm538_vm1, %v5390_v41 }
 0x157   : > { %7489 = vst [vmem:[#allocation25_spill] sm:$0xff] %v5681_v52  ;;  %1445 = vmatprep.mubr.bf16.mxu0 %v7461_v5  ;;  %v5688_v35 = vadd.f32 %v1107_v40, %v802_v36  ;;  %1831 = vmatprep.mubr.bf16.mxu1 %v7461_v5 }
 0x158   : > { %v814_v32 = vpop.f32.mrf.mxu0  ;;  %v1109_v51 = vpop.f32.mrf.mxu1 }
 0x159   : > { %v5691_v39 = vadd.f32 %v1109_v51, %v804_v2 }
 0x15a   : > { %v816_v58 = vpop.f32.mrf.mxu0  ;;  %v1111_v27 = vpop.f32.mrf.mxu1 }
 0x15b   : > { %7490 = vst [vmem:[#allocation26_spill] sm:$0xff] %v5691_v39  ;;  %v5693_v9 = vadd.f32 %v1111_v27, %v806_v15 }
 0x15c   : > { %v818_v33 = vpop.f32.mrf.mxu0  ;;  %v1113_v52 = vpop.f32.mrf.mxu1 }
 0x15d   : > { %7491 = vst [vmem:[#allocation27_spill] sm:$0xff] %v5693_v9  ;;  %v5695_v56 = vadd.f32 %v1113_v52, %v808_v6 }
 0x15e   : > { %v822_v38 = vpop.f32.mrf.mxu0  ;;  %4435 = vmatmul.mubr.msk.bf16.gmra.mxu0 %vm538_vm1, %v5408_v43  ;;  %v1117_v41 = vpop.f32.mrf.mxu1  ;;  %4467 = vmatmul.mubr.msk.bf16.gmra.mxu1 %vm538_vm1, %v5399_v42 }
 0x15f   : > { %7492 = vst [vmem:[#allocation28_spill] sm:$0xff] %v5695_v56  ;;  %1455 = vmatprep.mubr.bf16.mxu0 %v7461_v5  ;;  %v5702_v36 = vadd.f32 %v1117_v41, %v812_v37  ;;  %1841 = vmatprep.mubr.bf16.mxu1 %v7461_v5 }
 0x160   : > { %v824_v2 = vpop.f32.mrf.mxu0  ;;  %v1119_v15 = vpop.f32.mrf.mxu1 }
 0x161   : > { %v5705_v40 = vadd.f32 %v1119_v15, %v814_v32 }
 0x162   : > { %v826_v52 = vpop.f32.mrf.mxu0  ;;  %v1121_v6 = vpop.f32.mrf.mxu1 }
 0x163   : > { %7493 = vst [vmem:[#allocation29_spill] sm:$0xff] %v5705_v40  ;;  %v5707_v51 = vadd.f32 %v1121_v6, %v816_v58 }
 0x164   : > { %v828_v27 = vpop.f32.mrf.mxu0  ;;  %v1123_v56 = vpop.f32.mrf.mxu1 }
 0x165   : > { %7494 = vst [vmem:[#allocation30_spill] sm:$0xff] %v5707_v51  ;;  %v5709_v9 = vadd.f32 %v1123_v56, %v818_v33 }
 0x166   : > { %v832_v39 = vpop.f32.mrf.mxu0  ;;  %4436 = vmatmul.mubr.msk.bf16.gmra.mxu0 %vm538_vm1, %v5417_v44  ;;  %v1127_v42 = vpop.f32.mrf.mxu1  ;;  %4468 = vmatmul.mubr.msk.bf16.gmra.mxu1 %vm538_vm1, %v5408_v43 }
 0x167   : > { %7495 = vst [vmem:[#allocation31_spill] sm:$0xff] %v5709_v9  ;;  %1465 = vmatprep.mubr.bf16.mxu0 %v7461_v5  ;;  %v5716_v37 = vadd.f32 %v1127_v42, %v822_v38  ;;  %1851 = vmatprep.mubr.bf16.mxu1 %v7461_v5 }
 0x168   : > { %v834_v32 = vpop.f32.mrf.mxu0  ;;  %v1129_v58 = vpop.f32.mrf.mxu1 }
 0x169   : > { %v5719_v41 = vadd.f32 %v1129_v58, %v824_v2 }
 0x16a   : > { %v836_v56 = vpop.f32.mrf.mxu0  ;;  %v1131_v33 = vpop.f32.mrf.mxu1 }
 0x16b   : > { %v5721_v15 = vadd.f32 %v1131_v33, %v826_v52 }
 0x16c   : > { %v838_v6 = vpop.f32.mrf.mxu0  ;;  %v1133_v9 = vpop.f32.mrf.mxu1 }
 0x16d   : > { %7496 = vst [vmem:[#allocation32_spill] sm:$0xff] %v5721_v15  ;;  %v5723_v51 = vadd.f32 %v1133_v9, %v828_v27  ;;  %v4524_v27 = vld [vmem:[%s7454_s3 + $0xe8] sm:$0xff] }
 0x16e   : > { %v842_v40 = vpop.f32.mrf.mxu0  ;;  %4437 = vmatmul.mubr.msk.bf16.gmra.mxu0 %vm538_vm1, %v5426_v45  ;;  %v1137_v43 = vpop.f32.mrf.mxu1  ;;  %4469 = vmatmul.mubr.msk.bf16.gmra.mxu1 %vm538_vm1, %v5417_v44  ;;  %v4540_v33 = vcombine.high %v4524_v27, %v4524_v27  ;;  %v4539_v15 = vcombine.low %v4524_v27, %v4524_v27 }
 0x16f   : > { %7497 = vst [vmem:[#allocation33_spill] sm:$0xff] %v5723_v51  ;;  %1475 = vmatprep.mubr.bf16.mxu0 %v7461_v5  ;;  %v5730_v38 = vadd.f32 %v1137_v43, %v832_v39  ;;  %1861 = vmatprep.mubr.bf16.mxu1 %v7461_v5 }
 0x170   : > { %v844_v2 = vpop.f32.mrf.mxu0  ;;  %v1139_v52 = vpop.f32.mrf.mxu1  ;;  %4541 = vmatprep.subr.msk.bf16.mxu1 %vm2684_vm2, %v4540_v33 }
 0x171   : > { %7498 = vst [vmem:[#allocation34_spill] sm:$0xff] %v5730_v38  ;;  %v5733_v42 = vadd.f32 %v1139_v52, %v834_v32  ;;  %v2686_v32 = vsel %vm2684_vm2, %v4539_v15, 0 }
 0x172   : > { %v846_v9 = vpop.f32.mrf.mxu0  ;;  %v1141_v58 = vpop.f32.mrf.mxu1  ;;  %2692 = vmatpush1.bf16.msra.mxu1 %v2686_v32 }
 0x173   : > { %7499 = vst [vmem:[#allocation35_spill] sm:$0xff] %v5733_v42  ;;  %v5738_v51 = vadd.f32 %v1141_v58, %v836_v56  ;;  %v7502_v56 = vmov 0  }
 0x174   : > { %v848_v44 = vpop.f32.mrf.mxu0  ;;  %v1143_v39 = vpop.f32.mrf.mxu1 }
 0x175   : > { %7500 = vst [vmem:[#allocation36_spill] sm:$0xff] %v5738_v51  ;;  %v5741_v43 = vadd.f32 %v1143_v39, %v838_v6 }
 0x176   : > { %v852_v5 = vpop.f32.mrf.mxu0  ;;  %4438 = vmatmul.mubr.msk.bf16.gmra.mxu0 %vm538_vm1, %v5435_v46  ;;  %v1147_v52 = vpop.f32.mrf.mxu1  ;;  %4470 = vmatmul.mubr.msk.bf16.gmra.mxu1 %vm538_vm1, %v5426_v45 }
 0x177   : > { %7501 = vst [vmem:[#allocation37_spill] sm:$0xff] %v5741_v43  ;;  %1485 = vmatprep.mubr.bf16.mxu0 %v7502_v56  ;;  %v5749_v58 = vadd.f32 %v1147_v52, %v842_v40  ;;  %1871 = vmatprep.mubr.bf16.mxu1 %v7502_v56  ;;  %v5761_v40 = vld [vmem:[%s5204_s12 + $0xc0] sm:$0xff]   ;;  %v5774_v52 = vld [vmem:[%s5204_s12 + $0xc8] sm:$0xff]  }
 0x178   : > { %v854_v27 = vpop.f32.mrf.mxu0  ;;  %v1149_v6 = vpop.f32.mrf.mxu1  ;;  %7508 = vst [vmem:[#allocation43_spill] sm:$0xff] %v5774_v52 }
 0x179   : > { %v5752_v33 = vadd.f32 %v1149_v6, %v844_v2 }
 0x17a   : > { %v856_v39 = vpop.f32.mrf.mxu0  ;;  %v1151_v43 = vpop.f32.mrf.mxu1 }
 0x17b   : > { %v5754_v51 = vadd.f32 %v1151_v43, %v846_v9 }
 0x17c   : > { %v5756_v15 = vpop.f32.mrf.mxu0  ;;  %v1153_v42 = vpop.f32.mrf.mxu1 }
 0x17d   : > { %7503 = vst [vmem:[#allocation38_spill] sm:$0xff] %v5754_v51  ;;  %7504 = vst [vmem:[#allocation39_spill] sm:$0xff] %v5756_v15  ;;  %v5758_v45 = vadd.f32 %v1153_v42, %v848_v44 }
 0x17e   : > { %v862_v38 = vpop.f32.mrf.mxu0  ;;  %4439 = vmatmul.mubr.msk.bf16.gmra.mxu0 %vm538_vm1, %v5761_v40  ;;  %v1157_v32 = vpop.f32.mrf.mxu1  ;;  %4471 = vmatmul.mubr.msk.bf16.gmra.mxu1 %vm538_vm1, %v5435_v46 }
 0x17f   : > { %7505 = vst [vmem:[#allocation40_spill] sm:$0xff] %v5758_v45  ;;  %1495 = vmatprep.mubr.bf16.mxu0 %v7502_v56  ;;  %v5768_v2 = vadd.f32 %v1157_v32, %v852_v5  ;;  %1881 = vmatprep.mubr.bf16.mxu1 %v7502_v56 }
 0x180   : > { %v864_v9 = vpop.f32.mrf.mxu0  ;;  %v1159_v43 = vpop.f32.mrf.mxu1 }
 0x181   : > { %7506 = vst [vmem:[#allocation41_spill] sm:$0xff] %v5768_v2  ;;  %v5771_v42 = vadd.f32 %v1159_v43, %v854_v27 }
 0x182   : > { %v866_v44 = vpop.f32.mrf.mxu0  ;;  %v1161_v6 = vpop.f32.mrf.mxu1 }
 0x183   : > { %7507 = vst [vmem:[#allocation42_spill] sm:$0xff] %v5771_v42  ;;  %v5776_v15 = vadd.f32 %v1161_v6, %v856_v39 }
 0x184   : > { %v5778_v45 = vpop.f32.mrf.mxu0  ;;  %v5780_v51 = vpop.f32.mrf.mxu1 }
 0x185   : > { %7509 = vst [vmem:[#allocation44_spill] sm:$0xff] %v5776_v15  ;;  %7510 = vst [vmem:[#allocation45_spill] sm:$0xff] %v5778_v45  ;;  %v4931_v45 = vld [vmem:[%s7454_s3 + $0xd8] ss:$8 sps:$4 sm:$0xff]  }
 0x186   : > { %7511 = vst [vmem:[#allocation46_spill] sm:$0xff] %v5780_v51  ;;  %v872_v46 = vpop.f32.mrf.mxu0  ;;  %4440 = vmatmul.mubr.msk.bf16.gmra.mxu0 %vm538_vm1, %v5774_v52  ;;  %v1167_v5 = vpop.f32.mrf.mxu1  ;;  %4472 = vmatmul.mubr.msk.bf16.gmra.mxu1 %vm538_vm1, %v5761_v40  ;;  %v4933_v51 = vld [vmem:[%s7454_s3 + $0xdc] ss:$8 sps:$4 sm:$0xff]  }
 0x187   : > { %2077 = vmatprep.mubr.bf16.mxu0 %v7502_v56  ;;  %v5787_v27 = vadd.f32 %v1167_v5, %v862_v38  ;;  %1891 = vmatprep.mubr.bf16.mxu1 %v7502_v56 }
 0x188   : > { %v874_v32 = vpop.f32.mrf.mxu0  ;;  %v1169_v39 = vpop.f32.mrf.mxu1  ;;  %2693 = vmatprep.subr.bf16.mxu1 %v4933_v51 }
 0x189   : > { %7512 = vst [vmem:[#allocation47_spill] sm:$0xff] %v5787_v27  ;;  %v5790_v43 = vadd.f32 %v1169_v39, %v864_v9  ;;  %2694 = vmatpush1.bf16.msra.mxu1 %v4931_v45  ;;  %v5078_v39 = vld [vmem:[%s5204_s12 + $0x20] sm:$0xff]  }
 0x18a   : > { %v876_v6 = vpop.f32.mrf.mxu0  ;;  %v1171_v15 = vpop.f32.mrf.mxu1 }
 0x18b   : > { %7513 = vst [vmem:[#allocation48_spill] sm:$0xff] %v5790_v43  ;;  %v5798_v42 = vadd.f32 %v1171_v15, %v866_v44 }
 0x18c   : > { %v5800_v38 = vpop.f32.mrf.mxu0  ;;  %v5802_v5 = vpop.f32.mrf.mxu1 }
 0x18d   : > { %7514 = vst [vmem:[#allocation49_spill] sm:$0xff] %v5798_v42  ;;  %7515 = vst [vmem:[#allocation50_spill] sm:$0xff] %v5800_v38 }
 0x18e   : > { %7516 = vst [vmem:[#allocation51_spill] sm:$0xff] %v5802_v5  ;;  %v1267_v9 = vpop.f32.mrf.mxu0  ;;  %4485 = vmatmul.mubr.msk.bf16.vlgmr.msra.gmra.mxu0 %vm538_vm1, %v5078_v39  ;;  %v1177_v43 = vpop.f32.mrf.mxu1  ;;  %4473 = vmatmul.mubr.msk.bf16.gmra.mxu1 %vm538_vm1, %v5774_v52 }
 0x18f   : > { %v1506_v27 = vadd.f32 %v1267_v9, %v5478_v61  ;;  %2087 = vmatprep.mubr.bf16.mxu0 %v7502_v56  ;;  %v5810_v15 = vadd.f32 %v1177_v43, %v872_v46  ;;  %1901 = vmatprep.mubr.bf16.mxu1 %v7502_v56  ;;  %v5818_v9 = vld [vmem:[%s5204_s12 + $0xd0] sm:$0xff]  }
 0x190   : > { %v1269_v51 = vpop.f32.mrf.mxu0  ;;  %v1179_v45 = vpop.f32.mrf.mxu1 }
 0x191   : > { %7517 = vst [vmem:[#allocation52_spill] sm:$0xff] %v5810_v15  ;;  %v1507_v44 = vadd.f32 %v1269_v51, %v5481_v0  ;;  %v5814_v38 = vadd.f32 %v1179_v45, %v874_v32  ;;  %v5079_v15 = vld [vmem:[%s5204_s12 + $0x28] sm:$0xff]  }
 0x192   : > { %v1271_v39 = vpop.f32.mrf.mxu0  ;;  %v1181_v5 = vpop.f32.mrf.mxu1 }
 0x193   : > { %v1508_v61 = vadd.f32 %v1271_v39, %v5483_v3  ;;  %v5820_v42 = vadd.f32 %v1181_v5, %v876_v6 }
 0x194   : > { %v1273_v52 = vpop.f32.mrf.mxu0  ;;  %v5822_v2 = vpop.f32.mrf.mxu1 }
 0x195   : > { %7518 = vst [vmem:[#allocation53_spill] sm:$0xff] %v5822_v2  ;;  %v5825_v46 = vadd.f32 %v1273_v52, %v5485_v7 }
 0x196   : > { %v1277_v43 = vpop.f32.mrf.mxu0  ;;  %4486 = vmatmul.mubr.msk.bf16.gmra.mxu0 %vm538_vm1, %v5079_v15  ;;  %v5829_v0 = vpop.f32.mrf.mxu1  ;;  %4474 = vmatmul.mubr.msk.bf16.gmra.mxu1 %vm538_vm1, %v5818_v9 }
 0x197   : > { %7519 = vst [vmem:[#allocation54_spill] sm:$0xff] %v5825_v46  ;;  %v1510_v32 = vadd.f32 %v1277_v43, %v5492_v10  ;;  %2097 = vmatprep.mubr.bf16.mxu0 %v7502_v56  ;;  %2723 = vmatprep.mubr.bf16.mxu1 %v7502_v56  ;;  %v5080_v43 = vld [vmem:[%s5204_s12 + $0x30] sm:$0xff]  }
 0x198   : > { %v1279_v3 = vpop.f32.mrf.mxu0  ;;  %v5836_v6 = vpop.f32.mrf.mxu1 }
 0x199   : > { %v1511_v7 = vadd.f32 %v1279_v3, %v5495_v13 }
 0x19a   : > { %v1281_v52 = vpop.f32.mrf.mxu0  ;;  %v5839_v5 = vpop.f32.mrf.mxu1 }
 0x19b   : > { %v1512_v15 = vadd.f32 %v1281_v52, %v5497_v16 }
 0x19c   : > { %v1283_v51 = vpop.f32.mrf.mxu0  ;;  %v5842_v45 = vpop.f32.mrf.mxu1 }
 0x19d   : > { %7520 = vst [vmem:[#allocation55_spill] sm:$0xff] %v5842_v45  ;;  %v5845_v10 = vadd.f32 %v1283_v51, %v5499_v19  ;;  %v5081_v45 = vld [vmem:[%s5204_s12 + $0x38] sm:$0xff]  }
 0x19e   : > { %v1287_v39 = vpop.f32.mrf.mxu0  ;;  %4487 = vmatmul.mubr.msk.bf16.gmra.mxu0 %vm538_vm1, %v5080_v43  ;;  %v1673_v46 = vpop.f32.mrf.mxu1  ;;  %v4934_v43 = vld [vmem:[%s7454_s3 + $0xc8] ss:$8 sps:$4 sm:$0xff]  }
 0x19f   : > { %v5850_v2 = vadd.f32 %v1287_v39, %v5506_v25  ;;  %2107 = vmatprep.mubr.bf16.mxu0 %v7502_v56  ;;  %v5853_v13 = vadd.f32 %v1673_v46, %v1506_v27  ;;  %v4936_v25 = vld [vmem:[%s7454_s3 + $0xcc] ss:$8 sps:$4 sm:$0xff]  }
 0x1a0   : > { %v1289_v3 = vpop.f32.mrf.mxu0  ;;  %v1675_v52 = vpop.f32.mrf.mxu1  ;;  %2695 = vmatprep.subr.bf16.mxu1 %v4936_v25 }
 0x1a1   : > { %v5856_v16 = vadd.f32 %v1289_v3, %v5509_v29  ;;  %v5858_v19 = vadd.f32 %v1675_v52, %v1507_v44  ;;  %2696 = vmatpush1.bf16.msra.mxu1 %v4934_v43 }
 0x1a2   : > { %v1291_v51 = vpop.f32.mrf.mxu0  ;;  %v1677_v46 = vpop.f32.mrf.mxu1 }
 0x1a3   : > { %7521 = vst [vmem:[#allocation56_spill] sm:$0xff] %v5856_v16  ;;  %v5867_v27 = vadd.f32 %v1291_v51, %v5511_v47  ;;  %v5869_v39 = vadd.f32 %v1677_v46, %v1508_v61 }
 0x1a4   : > { %v1293_v29 = vpop.f32.mrf.mxu0  ;;  %v5874_v3 = vpop.f32.mrf.mxu1 }
 0x1a5   : > { %v5872_v44 = vadd.f32 %v1293_v29, %v5513_v50 }
 0x1a6   : > { %v1297_v52 = vpop.f32.mrf.mxu0  ;;  %4488 = vmatmul.mubr.msk.bf16.gmra.mxu0 %vm538_vm1, %v5081_v45  ;;  %v1683_v47 = vpop.f32.mrf.mxu1 }
 0x1a7   : > { %7522 = vst [vmem:[#allocation57_spill] sm:$0xff] %v5872_v44  ;;  %v5879_v16 = vadd.f32 %v1297_v52, %v5520_v53  ;;  %2117 = vmatprep.mubr.bf16.mxu0 %v7502_v56  ;;  %v5882_v61 = vadd.f32 %v1683_v47, %v1510_v32 }
 0x1a8   : > { %v1299_v51 = vpop.f32.mrf.mxu0  ;;  %v1685_v25 = vpop.f32.mrf.mxu1 }
 0x1a9   : > { %v5885_v50 = vadd.f32 %v1299_v51, %v5523_v59  ;;  %v5887_v46 = vadd.f32 %v1685_v25, %v1511_v7  ;;  %v5082_v59 = vld [vmem:[%s5204_s12 + $0x40] sm:$0xff]  }
 0x1aa   : > { %v1301_v43 = vpop.f32.mrf.mxu0  ;;  %v1687_v45 = vpop.f32.mrf.mxu1 }
 0x1ab   : > { %v5890_v29 = vadd.f32 %v1301_v43, %v5525_v63  ;;  %v5892_v53 = vadd.f32 %v1687_v45, %v1512_v15 }
 0x1ac   : > { %v1303_v52 = vpop.f32.mrf.mxu0  ;;  %v5897_v32 = vpop.f32.mrf.mxu1 }
 0x1ad   : > { %v5895_v44 = vadd.f32 %v1303_v52, %v5527_v4 }
 0x1ae   : > { %v1307_v47 = vpop.f32.mrf.mxu0  ;;  %4489 = vmatmul.mubr.msk.bf16.gmra.mxu0 %vm538_vm1, %v5082_v59  ;;  %v5904_v51 = vpop.f32.mrf.mxu1  ;;  %v5083_v59 = vld [vmem:[%s5204_s12 + $0x48] sm:$0xff]  }
 0x1af   : > { %v5902_v7 = vadd.f32 %v1307_v47, %v5534_v8  ;;  %2127 = vmatprep.mubr.bf16.mxu0 %v7502_v56 }
 0x1b0   : > { %v1309_v63 = vpop.f32.mrf.mxu0  ;;  %v5910_v4 = vpop.f32.mrf.mxu1 }
 0x1b1   : > { %7523 = vst [vmem:[#allocation58_spill] sm:$0xff] %v5902_v7  ;;  %v5908_v15 = vadd.f32 %v1309_v63, %v5537_v12 }
 0x1b2   : > { %v1311_v25 = vpop.f32.mrf.mxu0  ;;  %v5915_v45 = vpop.f32.mrf.mxu1 }
 0x1b3   : > { %v5913_v43 = vadd.f32 %v1311_v25, %v5539_v17 }
 0x1b4   : > { %v1313_v52 = vpop.f32.mrf.mxu0  ;;  %v5922_v7 = vpop.f32.mrf.mxu1 }
 0x1b5   : > { %7524 = vst [vmem:[#allocation59_spill] sm:$0xff] %v5913_v43  ;;  %v5918_v8 = vadd.f32 %v1313_v52, %v5541_v21  ;;  %v4937_v21 = vld [vmem:[%s7454_s3 + $0xb8] ss:$8 sps:$4 sm:$0xff]   ;;  %v4939_v52 = vld [vmem:[%s7454_s3 + $0xbc] ss:$8 sps:$4 sm:$0xff]  }
 0x1b6   : > { %v1317_v47 = vpop.f32.mrf.mxu0  ;;  %4490 = vmatmul.mubr.msk.bf16.gmra.mxu0 %vm538_vm1, %v5083_v59  ;;  %v5937_v59 = vpop.f32.mrf.mxu1  ;;  %2697 = vmatprep.subr.bf16.mxu1 %v4939_v52 }
 0x1b7   : > { %7525 = vst [vmem:[#allocation60_spill] sm:$0xff] %v5918_v8  ;;  %v5925_v12 = vadd.f32 %v1317_v47, %v5548_v28  ;;  %2137 = vmatprep.mubr.bf16.mxu0 %v7502_v56  ;;  %2698 = vmatpush1.bf16.msra.mxu1 %v4937_v21 }
 0x1b8   : > { %v1319_v17 = vpop.f32.mrf.mxu0  ;;  %v5947_v43 = vpop.f32.mrf.mxu1 }
 0x1b9   : > { %v5929_v63 = vadd.f32 %v1319_v17, %v5551_v48  ;;  %v5084_v17 = vld [vmem:[%s5204_s12 + $0x50] sm:$0xff]  }
 0x1ba   : > { %v1321_v25 = vpop.f32.mrf.mxu0 }
 0x1bb   : > { %7526 = vst [vmem:[#allocation61_spill] sm:$0xff] %v5929_v63  ;;  %v5940_v28 = vadd.f32 %v1321_v25, %v5553_v22 }
 0x1bc   : > { %v1323_v47 = vpop.f32.mrf.mxu0 }
 0x1bd   : > { %v5943_v8 = vadd.f32 %v1323_v47, %v5555_v60  ;;  %v5956_v60 = vpop.f32.mrf.mxu1 }
 0x1be   : > { %v1327_v48 = vpop.f32.mrf.mxu0  ;;  %4491 = vmatmul.mubr.msk.bf16.gmra.mxu0 %vm538_vm1, %v5084_v17 }
 0x1bf   : > { %7527 = vst [vmem:[#allocation62_spill] sm:$0xff] %v5943_v8  ;;  %v5950_v63 = vadd.f32 %v1327_v48, %v5562_v1  ;;  %2147 = vmatprep.mubr.bf16.mxu0 %v7502_v56  ;;  %v5085_v1 = vld [vmem:[%s5204_s12 + $0x58] sm:$0xff]   ;;  %v5966_v48 = vpop.f32.mrf.mxu1 }
 0x1c0   : > { %v1329_v22 = vpop.f32.mrf.mxu0 }
 0x1c1   : > { %7528 = vst [vmem:[#allocation63_spill] sm:$0xff] %v5950_v63  ;;  %v5954_v25 = vadd.f32 %v1329_v22, %v5565_v23 }
 0x1c2   : > { %v1331_v52 = vpop.f32.mrf.mxu0 }
 0x1c3   : > { %7529 = vst [vmem:[#allocation64_spill] sm:$0xff] %v5954_v25  ;;  %v5959_v21 = vadd.f32 %v1331_v52, %v5567_v14  ;;  %v5086_v25 = vld [vmem:[%s5204_s12 + $0x60] sm:$0xff]  }
 0x1c4   : > { %v1333_v47 = vpop.f32.mrf.mxu0 }
 0x1c5   : > { %7530 = vst [vmem:[#allocation65_spill] sm:$0xff] %v5959_v21  ;;  %v5962_v17 = vadd.f32 %v1333_v47, %v5569_v20  ;;  %v5975_v21 = vpop.f32.mrf.mxu1 }
 0x1c6   : > { %v1337_v8 = vpop.f32.mrf.mxu0  ;;  %4492 = vmatmul.mubr.msk.bf16.gmra.mxu0 %vm538_vm1, %v5085_v1 }
 0x1c7   : > { %7531 = vst [vmem:[#allocation66_spill] sm:$0xff] %v5962_v17  ;;  %v5969_v23 = vadd.f32 %v1337_v8, %v5576_v26  ;;  %2157 = vmatprep.mubr.bf16.mxu0 %v7502_v56  ;;  %v5985_v26 = vpop.f32.mrf.mxu1 }
 0x1c8   : > { %v1339_v22 = vpop.f32.mrf.mxu0 }
 0x1c9   : > { %7532 = vst [vmem:[#allocation67_spill] sm:$0xff] %v5969_v23  ;;  %v5973_v14 = vadd.f32 %v1339_v22, %v5579_v49 }
 0x1ca   : > { %v1341_v52 = vpop.f32.mrf.mxu0 }
 0x1cb   : > { %7533 = vst [vmem:[#allocation68_spill] sm:$0xff] %v5973_v14  ;;  %v5978_v20 = vadd.f32 %v1341_v52, %v5581_v57  ;;  %v6000_v52 = vpop.f32.mrf.mxu1  ;;  %v7547_v14 = vld [vmem:[#allocation10_spill] sm:$0xff] }
 0x1cc   : > { %v1343_v47 = vpop.f32.mrf.mxu0 }
 0x1cd   : > { %7534 = vst [vmem:[#allocation69_spill] sm:$0xff] %v5978_v20  ;;  %v5981_v1 = vadd.f32 %v1343_v47, %v5583_v11  ;;  %v4941_v11 = vld [vmem:[%s7454_s3 + $0xa8] ss:$8 sps:$4 sm:$0xff]   ;;  %v7538_v47 = vld [vmem:[#allocation6_spill] sm:$0xff] }
 0x1ce   : > { %v1347_v17 = vpop.f32.mrf.mxu0  ;;  %4493 = vmatmul.mubr.msk.bf16.gmra.mxu0 %vm538_vm1, %v5086_v25  ;;  %v4943_v25 = vld [vmem:[%s7454_s3 + $0xac] ss:$8 sps:$4 sm:$0xff]  }
 0x1cf   : > { %7535 = vst [vmem:[#allocation70_spill] sm:$0xff] %v5981_v1  ;;  %v5988_v49 = vadd.f32 %v1347_v17, %v5590_v62  ;;  %2167 = vmatprep.mubr.bf16.mxu0 %v7502_v56  ;;  %2699 = vmatprep.subr.bf16.mxu1 %v4943_v25 }
 0x1d0   : > { %v1349_v8 = vpop.f32.mrf.mxu0  ;;  %2700 = vmatpush1.bf16.msra.mxu1 %v4941_v11 }
 0x1d1   : > { %7536 = vst [vmem:[#allocation71_spill] sm:$0xff] %v5988_v49  ;;  %v5992_v57 = vadd.f32 %v1349_v8, %v5593_v30  ;;  %v7540_v49 = vld [vmem:[#allocation7_spill] sm:$0xff] }
 0x1d2   : > { %v1351_v22 = vpop.f32.mrf.mxu0  ;;  %v5087_v8 = vld [vmem:[%s5204_s12 + $0x68] sm:$0xff]  }
 0x1d3   : > { %7537 = vst [vmem:[#allocation72_spill] sm:$0xff] %v5992_v57  ;;  %v6003_v62 = vadd.f32 %v1351_v22, %v7538_v47  ;;  %v6010_v57 = vpop.f32.mrf.mxu1  ;;  %v7543_v47 = vld [vmem:[#allocation8_spill] sm:$0xff] }
 0x1d4   : > { %v1353_v17 = vpop.f32.mrf.mxu0 }
 0x1d5   : > { %7539 = vst [vmem:[#allocation6_spill] sm:$0xff] %v6003_v62  ;;  %v6006_v1 = vadd.f32 %v1353_v17, %v7540_v49  ;;  %v6019_v49 = vpop.f32.mrf.mxu1  ;;  %v7545_v17 = vld [vmem:[#allocation9_spill] sm:$0xff] }
 0x1d6   : > { %v1357_v30 = vpop.f32.mrf.mxu0  ;;  %4494 = vmatmul.mubr.msk.bf16.gmra.mxu0 %vm538_vm1, %v5087_v8 }
 0x1d7   : > { %7541 = vst [vmem:[#allocation7_spill] sm:$0xff] %v6006_v1  ;;  %v6013_v20 = vadd.f32 %v1357_v30, %v5604_v24  ;;  %2177 = vmatprep.mubr.bf16.mxu0 %v7502_v56  ;;  %v5088_v24 = vld [vmem:[%s5204_s12 + $0x70] sm:$0xff]   ;;  %v6029_v30 = vpop.f32.mrf.mxu1 }
 0x1d8   : > { %v1359_v22 = vpop.f32.mrf.mxu0 }
 0x1d9   : > { %7542 = vst [vmem:[#allocation73_spill] sm:$0xff] %v6013_v20  ;;  %v6017_v62 = vadd.f32 %v1359_v22, %v7543_v47  ;;  %v7554_v20 = vld [vmem:[#allocation13_spill] sm:$0xff] }
 0x1da   : > { %v1361_v25 = vpop.f32.mrf.mxu0 }
 0x1db   : > { %7544 = vst [vmem:[#allocation8_spill] sm:$0xff] %v6017_v62  ;;  %v6022_v11 = vadd.f32 %v1361_v25, %v7545_v17  ;;  %v7550_v62 = vld [vmem:[#allocation11_spill] sm:$0xff] }
 0x1dc   : > { %v1363_v1 = vpop.f32.mrf.mxu0 }
 0x1dd   : > { %7546 = vst [vmem:[#allocation9_spill] sm:$0xff] %v6022_v11  ;;  %v6025_v8 = vadd.f32 %v1363_v1, %v7547_v14  ;;  %v6038_v11 = vpop.f32.mrf.mxu1  ;;  %v7552_v14 = vld [vmem:[#allocation12_spill] sm:$0xff] }
 0x1de   : > { %v1367_v23 = vpop.f32.mrf.mxu0  ;;  %4495 = vmatmul.mubr.msk.bf16.gmra.mxu0 %vm538_vm1, %v5088_v24 }
 0x1df   : > { %7548 = vst [vmem:[#allocation10_spill] sm:$0xff] %v6025_v8  ;;  %v6032_v22 = vadd.f32 %v1367_v23, %v5618_v18  ;;  %2187 = vmatprep.mubr.bf16.mxu0 %v7502_v56  ;;  %v5089_v18 = vld [vmem:[%s5204_s12 + $0x78] sm:$0xff]   ;;  %v6048_v23 = vpop.f32.mrf.mxu1 }
 0x1e0   : > { %v1369_v47 = vpop.f32.mrf.mxu0 }
 0x1e1   : > { %7549 = vst [vmem:[#allocation74_spill] sm:$0xff] %v6032_v22  ;;  %v6036_v25 = vadd.f32 %v1369_v47, %v7550_v62  ;;  %v7561_v22 = vld [vmem:[#allocation16_spill] sm:$0xff] }
 0x1e2   : > { %v1371_v17 = vpop.f32.mrf.mxu0 }
 0x1e3   : > { %7551 = vst [vmem:[#allocation11_spill] sm:$0xff] %v6036_v25  ;;  %v6041_v1 = vadd.f32 %v1371_v17, %v7552_v14  ;;  %v7557_v25 = vld [vmem:[#allocation14_spill] sm:$0xff] }
 0x1e4   : > { %v1373_v8 = vpop.f32.mrf.mxu0 }
 0x1e5   : > { %7553 = vst [vmem:[#allocation12_spill] sm:$0xff] %v6041_v1  ;;  %v6044_v24 = vadd.f32 %v1373_v8, %v7554_v20  ;;  %v6057_v1 = vpop.f32.mrf.mxu1  ;;  %v7559_v20 = vld [vmem:[#allocation15_spill] sm:$0xff] }
 0x1e6   : > { %v1377_v63 = vpop.f32.mrf.mxu0  ;;  %4496 = vmatmul.mubr.msk.bf16.gmra.mxu0 %vm538_vm1, %v5089_v18  ;;  %v4946_v18 = vld [vmem:[%s7454_s3 + $0x9c] ss:$8 sps:$4 sm:$0xff]  }
 0x1e7   : > { %7555 = vst [vmem:[#allocation13_spill] sm:$0xff] %v6044_v24  ;;  %v6051_v62 = vadd.f32 %v1377_v63, %v5632_v54  ;;  %2197 = vmatprep.mubr.bf16.mxu0 %v7502_v56  ;;  %v4944_v63 = vld [vmem:[%s7454_s3 + $0x98] ss:$8 sps:$4 sm:$0xff]   ;;  %2701 = vmatprep.subr.bf16.mxu1 %v4946_v18  ;;  %v4947_v18 = vld [vmem:[%s7454_s3 + $0x88] ss:$8 sps:$4 sm:$0xff]  }
 0x1e8   : > { %v1379_v47 = vpop.f32.mrf.mxu0  ;;  %2702 = vmatpush1.bf16.msra.mxu1 %v4944_v63 }
 0x1e9   : > { %7556 = vst [vmem:[#allocation75_spill] sm:$0xff] %v6051_v62  ;;  %v6055_v17 = vadd.f32 %v1379_v47, %v7557_v25  ;;  %v5090_v47 = vld [vmem:[%s5204_s12 + $0x80] sm:$0xff]   ;;  %v7570_v62 = vld [vmem:[#allocation19_spill] sm:$0xff] }
 0x1ea   : > { %v1381_v14 = vpop.f32.mrf.mxu0 }
 0x1eb   : > { %7558 = vst [vmem:[#allocation14_spill] sm:$0xff] %v6055_v17  ;;  %v6060_v8 = vadd.f32 %v1381_v14, %v7559_v20  ;;  %v6073_v17 = vpop.f32.mrf.mxu1  ;;  %v7565_v20 = vld [vmem:[#allocation17_spill] sm:$0xff] }
 0x1ec   : > { %v1383_v24 = vpop.f32.mrf.mxu0  ;;  %7563 = vst [vmem:[#allocation76_spill] sm:$0xff] %v6073_v17 }
 0x1ed   : > { %7560 = vst [vmem:[#allocation15_spill] sm:$0xff] %v6060_v8  ;;  %v6066_v54 = vadd.f32 %v1383_v24, %v7561_v22  ;;  %v4949_v24 = vld [vmem:[%s7454_s3 + $0x8c] ss:$8 sps:$4 sm:$0xff]   ;;  %v4952_v8 = vld [vmem:[%s7454_s3 + $0x7c] ss:$8 sps:$4 sm:$0xff]  }
 0x1ee   : > { %v1387_v25 = vpop.f32.mrf.mxu0  ;;  %4497 = vmatmul.mubr.msk.bf16.gmra.mxu0 %vm538_vm1, %v5090_v47  ;;  %2703 = vmatprep.subr.bf16.mxu1 %v4949_v24  ;;  %v5091_v24 = vld [vmem:[%s5204_s12 + $0x88] sm:$0xff]  }
 0x1ef   : > { %7562 = vst [vmem:[#allocation16_spill] sm:$0xff] %v6066_v54  ;;  %v6076_v14 = vadd.f32 %v1387_v25, %v5646_v55  ;;  %2207 = vmatprep.mubr.bf16.mxu0 %v7502_v56  ;;  %v6088_v55 = vpop.f32.mrf.mxu1  ;;  %v7568_v25 = vld [vmem:[#allocation18_spill] sm:$0xff]  ;;  %2704 = vmatpush1.bf16.msra.mxu1 %v4947_v18 }
 0x1f0   : > { %v1389_v22 = vpop.f32.mrf.mxu0  ;;  %7567 = vst [vmem:[#allocation78_spill] sm:$0xff] %v6088_v55  ;;  %2705 = vmatprep.subr.bf16.mxu1 %v4952_v8 }
 0x1f1   : > { %7564 = vst [vmem:[#allocation77_spill] sm:$0xff] %v6076_v14  ;;  %v6083_v54 = vadd.f32 %v1389_v22, %v7565_v20  ;;  %v4950_v20 = vld [vmem:[%s7454_s3 + $0x78] ss:$8 sps:$4 sm:$0xff]  }
 0x1f2   : > { %v1391_v47 = vpop.f32.mrf.mxu0 }
 0x1f3   : > { %7566 = vst [vmem:[#allocation17_spill] sm:$0xff] %v6083_v54  ;;  %v6091_v14 = vadd.f32 %v1391_v47, %v7568_v25  ;;  %v6104_v47 = vpop.f32.mrf.mxu1  ;;  %2706 = vmatpush1.bf16.msra.mxu1 %v4950_v20 }
 0x1f4   : > { %v1393_v63 = vpop.f32.mrf.mxu0  ;;  %7572 = vst [vmem:[#allocation79_spill] sm:$0xff] %v6104_v47  ;;  %v4957_v47 = vld [vmem:[%s7454_s3 + $0x1cc] ss:$8 sps:$4 sm:$0xff]  }
 0x1f5   : > { %7569 = vst [vmem:[#allocation18_spill] sm:$0xff] %v6091_v14  ;;  %v6097_v22 = vadd.f32 %v1393_v63, %v7570_v62  ;;  %v4629_v62 = vld [vmem:[%s7454_s3 + $0x1d8] sm:$0xff]  ;;  %v7574_v14 = vld [vmem:[#allocation20_spill] sm:$0xff] }
 0x1f6   : > { %v1397_v54 = vpop.f32.mrf.mxu0  ;;  %4498 = vmatmul.mubr.msk.bf16.gmra.mxu0 %vm538_vm1, %v5091_v24  ;;  %v4645_v63 = vcombine.high %v4629_v62, %v4629_v62  ;;  %v7576_v24 = vld [vmem:[#allocation21_spill] sm:$0xff] }
 0x1f7   : > { %7571 = vst [vmem:[#allocation19_spill] sm:$0xff] %v6097_v22  ;;  %v6107_v18 = vadd.f32 %v1397_v54, %v5660_v31  ;;  %2217 = vmatprep.mubr.bf16.mxu0 %v7502_v56  ;;  %v4644_v22 = vcombine.low %v4629_v62, %v4629_v62  ;;  %v6118_v54 = vpop.f32.mrf.mxu1  ;;  %v7578_v62 = vld [vmem:[#allocation22_spill] sm:$0xff] }
 0x1f8   : > { %v1399_v25 = vpop.f32.mrf.mxu0  ;;  %4646 = vmatprep.subr.msk.bf16.mxu0 %vm2684_vm2, %v4645_v63 }
 0x1f9   : > { %7573 = vst [vmem:[#allocation80_spill] sm:$0xff] %v6107_v18  ;;  %v6114_v55 = vadd.f32 %v1399_v25, %v7574_v14  ;;  %v3341_v31 = vsel %vm2684_vm2, %v4644_v22, 0  ;;  %v4955_v14 = vld [vmem:[%s7454_s3 + $0x1c8] ss:$8 sps:$4 sm:$0xff]   ;;  %v6134_v63 = vpop.f32.mrf.mxu1 }
 0x1fa   : > { %v1401_v8 = vpop.f32.mrf.mxu0  ;;  %3347 = vmatpush1.bf16.msra.mxu0 %v3341_v31  ;;  %v5092_v22 = vld [vmem:[%s5204_s12 + $0x90] sm:$0xff]   ;;  %v4960_v31 = vld [vmem:[%s7454_s3 + $0x1bc] ss:$8 sps:$4 sm:$0xff]  }
 0x1fb   : > { %7575 = vst [vmem:[#allocation20_spill] sm:$0xff] %v6114_v55  ;;  %v6121_v20 = vadd.f32 %v1401_v8, %v7576_v24  ;;  %3348 = vmatprep.subr.bf16.mxu0 %v4957_v47  ;;  %v7581_v24 = vld [vmem:[#allocation23_spill] sm:$0xff]  ;;  %v4958_v47 = vld [vmem:[%s7454_s3 + $0x1b8] ss:$8 sps:$4 sm:$0xff]   ;;  %v7593_v55 = vld [vmem:[#allocation28_spill] sm:$0xff] }
 0x1fc   : > { %v1403_v18 = vpop.f32.mrf.mxu0 }
 0x1fd   : > { %7577 = vst [vmem:[#allocation21_spill] sm:$0xff] %v6121_v20  ;;  %v6127_v17 = vadd.f32 %v1403_v18, %v7578_v62  ;;  %v7585_v20 = vld [vmem:[#allocation25_spill] sm:$0xff] }
 0x1fe   : > { %v1407_v25 = vpop.f32.mrf.mxu0  ;;  %4499 = vmatmul.mubr.msk.bf16.gmra.mxu0 %vm538_vm1, %v5092_v22 }
 0x1ff   : > { %7579 = vst [vmem:[#allocation22_spill] sm:$0xff] %v6127_v17  ;;  %v6137_v8 = vadd.f32 %v1407_v25, %v5674_v34  ;;  %2227 = vmatprep.mubr.bf16.mxu0 %v7502_v56  ;;  %3349 = vmatpush1.bf16.msra.mxu0 %v4955_v14  ;;  %v6149_v34 = vpop.f32.mrf.mxu1  ;;  %v7583_v25 = vld [vmem:[#allocation24_spill] sm:$0xff] }
 0x200   : > { %v1409_v18 = vpop.f32.mrf.mxu0  ;;  %3350 = vmatprep.subr.bf16.mxu0 %v4960_v31  ;;  %v4963_v17 = vld [vmem:[%s7454_s3 + $0x1ac] ss:$8 sps:$4 sm:$0xff]   ;;  %v5093_v31 = vld [vmem:[%s5204_s12 + $0x98] sm:$0xff]  }
 0x201   : > { %7580 = vst [vmem:[#allocation81_spill] sm:$0xff] %v6137_v8  ;;  %v6144_v62 = vadd.f32 %v1409_v18, %v7581_v24  ;;  %v4961_v24 = vld [vmem:[%s7454_s3 + $0x1a8] ss:$8 sps:$4 sm:$0xff]  }
 0x202   : > { %v1411_v22 = vpop.f32.mrf.mxu0 }
 0x203   : > { %7582 = vst [vmem:[#allocation23_spill] sm:$0xff] %v6144_v62  ;;  %v6152_v8 = vadd.f32 %v1411_v22, %v7583_v25  ;;  %3351 = vmatpush1.bf16.msra.mxu0 %v4958_v47  ;;  %v6165_v22 = vpop.f32.mrf.mxu1  ;;  %v4966_v25 = vld [vmem:[%s7454_s3 + $0x19c] ss:$8 sps:$4 sm:$0xff]  }
 0x204   : > { %v1413_v14 = vpop.f32.mrf.mxu0  ;;  %3352 = vmatprep.subr.bf16.mxu0 %v4963_v17  ;;  %v4964_v17 = vld [vmem:[%s7454_s3 + $0x198] ss:$8 sps:$4 sm:$0xff]  }
 0x205   : > { %7584 = vst [vmem:[#allocation24_spill] sm:$0xff] %v6152_v8  ;;  %v6158_v18 = vadd.f32 %v1413_v14, %v7585_v20  ;;  %v7588_v14 = vld [vmem:[#allocation26_spill] sm:$0xff] }
 0x206   : > { %v1417_v62 = vpop.f32.mrf.mxu0  ;;  %4500 = vmatmul.mubr.msk.bf16.gmra.mxu0 %vm538_vm1, %v5093_v31 }
 0x207   : > { %7586 = vst [vmem:[#allocation25_spill] sm:$0xff] %v6158_v18  ;;  %v6168_v47 = vadd.f32 %v1417_v62, %v5688_v35  ;;  %2237 = vmatprep.mubr.bf16.mxu0 %v7502_v56  ;;  %3353 = vmatpush1.bf16.msra.mxu0 %v4961_v24  ;;  %v6180_v35 = vpop.f32.mrf.mxu1  ;;  %v7591_v62 = vld [vmem:[#allocation27_spill] sm:$0xff] }
 0x208   : > { %v1419_v20 = vpop.f32.mrf.mxu0  ;;  %3354 = vmatprep.subr.bf16.mxu0 %v4966_v25  ;;  %7590 = vst [vmem:[#allocation83_spill] sm:$0xff] %v6180_v35  ;;  %v5094_v25 = vld [vmem:[%s5204_s12 + $0xa0] sm:$0xff]   ;;  %v5097_v35 = vld [vmem:[%s5204_s12 + $0xb8] sm:$0xff]  }
 0x209   : > { %7587 = vst [vmem:[#allocation82_spill] sm:$0xff] %v6168_v47  ;;  %v6175_v18 = vadd.f32 %v1419_v20, %v7588_v14  ;;  %v4969_v47 = vld [vmem:[%s7454_s3 + $0x18c] ss:$8 sps:$4 sm:$0xff]   ;;  %v4967_v14 = vld [vmem:[%s7454_s3 + $0x188] ss:$8 sps:$4 sm:$0xff]  }
 0x20a   : > { %v1421_v31 = vpop.f32.mrf.mxu0 }
 0x20b   : > { %7589 = vst [vmem:[#allocation26_spill] sm:$0xff] %v6175_v18  ;;  %v6183_v8 = vadd.f32 %v1421_v31, %v7591_v62  ;;  %3355 = vmatpush1.bf16.msra.mxu0 %v4964_v17  ;;  %v6196_v31 = vpop.f32.mrf.mxu1  ;;  %v4972_v62 = vld [vmem:[%s7454_s3 + $0x17c] ss:$8 sps:$4 sm:$0xff]  }
 0x20c   : > { %v1423_v24 = vpop.f32.mrf.mxu0  ;;  %3356 = vmatprep.subr.bf16.mxu0 %v4969_v47  ;;  %7595 = vst [vmem:[#allocation84_spill] sm:$0xff] %v6196_v31  ;;  %v4970_v47 = vld [vmem:[%s7454_s3 + $0x178] ss:$8 sps:$4 sm:$0xff]   ;;  %v7602_v31 = vld [vmem:[#allocation31_spill] sm:$0xff] }
 0x20d   : > { %7592 = vst [vmem:[#allocation27_spill] sm:$0xff] %v6183_v8  ;;  %v6189_v20 = vadd.f32 %v1423_v24, %v7593_v55  ;;  %v7597_v24 = vld [vmem:[#allocation29_spill] sm:$0xff]  ;;  %v4975_v8 = vld [vmem:[%s7454_s3 + $0x16c] ss:$8 sps:$4 sm:$0xff]  }
 0x20e   : > { %v1427_v18 = vpop.f32.mrf.mxu0  ;;  %4501 = vmatmul.mubr.msk.bf16.gmra.mxu0 %vm538_vm1, %v5094_v25 }
 0x20f   : > { %7594 = vst [vmem:[#allocation28_spill] sm:$0xff] %v6189_v20  ;;  %v6199_v17 = vadd.f32 %v1427_v18, %v5702_v36  ;;  %2247 = vmatprep.mubr.bf16.mxu0 %v7502_v56  ;;  %3357 = vmatpush1.bf16.msra.mxu0 %v4967_v14  ;;  %v6211_v36 = vpop.f32.mrf.mxu1  ;;  %v7600_v18 = vld [vmem:[#allocation30_spill] sm:$0xff] }
 0x210   : > { %v1429_v55 = vpop.f32.mrf.mxu0  ;;  %3358 = vmatprep.subr.bf16.mxu0 %v4972_v62  ;;  %7599 = vst [vmem:[#allocation86_spill] sm:$0xff] %v6211_v36  ;;  %v5095_v62 = vld [vmem:[%s5204_s12 + $0xa8] sm:$0xff]  }
 0x211   : > { %7596 = vst [vmem:[#allocation85_spill] sm:$0xff] %v6199_v17  ;;  %v6206_v20 = vadd.f32 %v1429_v55, %v7597_v24  ;;  %v4973_v24 = vld [vmem:[%s7454_s3 + $0x168] ss:$8 sps:$4 sm:$0xff]  }
 0x212   : > { %v1431_v25 = vpop.f32.mrf.mxu0 }
 0x213   : > { %7598 = vst [vmem:[#allocation29_spill] sm:$0xff] %v6206_v20  ;;  %v6214_v17 = vadd.f32 %v1431_v25, %v7600_v18  ;;  %3359 = vmatpush1.bf16.msra.mxu0 %v4970_v47  ;;  %v6227_v25 = vpop.f32.mrf.mxu1 }
 0x214   : > { %v1433_v14 = vpop.f32.mrf.mxu0  ;;  %3360 = vmatprep.subr.bf16.mxu0 %v4975_v8  ;;  %7604 = vst [vmem:[#allocation87_spill] sm:$0xff] %v6227_v25  ;;  %v7610_v8 = vld [vmem:[#allocation33_spill] sm:$0xff] }
 0x215   : > { %7601 = vst [vmem:[#allocation30_spill] sm:$0xff] %v6214_v17  ;;  %v6220_v55 = vadd.f32 %v1433_v14, %v7602_v31  ;;  %v7608_v17 = vld [vmem:[#allocation32_spill] sm:$0xff] }
 0x216   : > { %v1437_v20 = vpop.f32.mrf.mxu0  ;;  %4502 = vmatmul.mubr.msk.bf16.gmra.mxu0 %vm538_vm1, %v5095_v62 }
 0x217   : > { %7603 = vst [vmem:[#allocation31_spill] sm:$0xff] %v6220_v55  ;;  %v6230_v47 = vadd.f32 %v1437_v20, %v5716_v37  ;;  %2257 = vmatprep.mubr.bf16.mxu0 %v7502_v56  ;;  %3361 = vmatpush1.bf16.msra.mxu0 %v4973_v24  ;;  %v6236_v55 = vpop.f32.mrf.mxu1  ;;  %v5096_v20 = vld [vmem:[%s5204_s12 + $0xb0] sm:$0xff]  }
 0x218   : > { %v1439_v31 = vpop.f32.mrf.mxu0  ;;  %7607 = vst [vmem:[#allocation90_spill] sm:$0xff] %v6236_v55  ;;  %v7619_v55 = vld [vmem:[#allocation37_spill] sm:$0xff] }
 0x219   : > { %7605 = vst [vmem:[#allocation88_spill] sm:$0xff] %v6230_v47  ;;  %v6234_v18 = vadd.f32 %v1439_v31, %v5719_v41  ;;  %v6246_v24 = vpop.f32.mrf.mxu1  ;;  %v7613_v47 = vld [vmem:[#allocation34_spill] sm:$0xff] }
 0x21a   : > { %v1441_v14 = vpop.f32.mrf.mxu0  ;;  %7612 = vst [vmem:[#allocation91_spill] sm:$0xff] %v6246_v24 }
 0x21b   : > { %7606 = vst [vmem:[#allocation89_spill] sm:$0xff] %v6234_v18  ;;  %v6239_v36 = vadd.f32 %v1441_v14, %v7608_v17  ;;  %v7615_v18 = vld [vmem:[#allocation35_spill] sm:$0xff] }
 0x21c   : > { %v1443_v62 = vpop.f32.mrf.mxu0 }
 0x21d   : > { %7609 = vst [vmem:[#allocation32_spill] sm:$0xff] %v6239_v36  ;;  %v6242_v25 = vadd.f32 %v1443_v62, %v7610_v8  ;;  %v6255_v36 = vpop.f32.mrf.mxu1  ;;  %v7617_v62 = vld [vmem:[#allocation36_spill] sm:$0xff] }
 0x21e   : > { %v1447_v37 = vpop.f32.mrf.mxu0  ;;  %4503 = vmatmul.mubr.msk.bf16.gmra.mxu0 %vm538_vm1, %v5096_v20 }
 0x21f   : > { %7611 = vst [vmem:[#allocation33_spill] sm:$0xff] %v6242_v25  ;;  %v6249_v41 = vadd.f32 %v1447_v37, %v7613_v47  ;;  %2267 = vmatprep.mubr.bf16.mxu0 %v7502_v56  ;;  %v6265_v47 = vpop.f32.mrf.mxu1 }
 0x220   : > { %v1449_v31 = vpop.f32.mrf.mxu0 }
 0x221   : > { %7614 = vst [vmem:[#allocation34_spill] sm:$0xff] %v6249_v41  ;;  %v6253_v17 = vadd.f32 %v1449_v31, %v7615_v18 }
 0x222   : > { %v1451_v14 = vpop.f32.mrf.mxu0 }
 0x223   : > { %7616 = vst [vmem:[#allocation35_spill] sm:$0xff] %v6253_v17  ;;  %v6258_v8 = vadd.f32 %v1451_v14, %v7617_v62  ;;  %v6274_v62 = vpop.f32.mrf.mxu1 }
 0x224   : > { %v1453_v25 = vpop.f32.mrf.mxu0 }
 0x225   : > { %7618 = vst [vmem:[#allocation36_spill] sm:$0xff] %v6258_v8  ;;  %v6261_v20 = vadd.f32 %v1453_v25, %v7619_v55  ;;  %v7623_v55 = vld [vmem:[#allocation38_spill] sm:$0xff]  ;;  %v7625_v8 = vld [vmem:[#allocation40_spill] sm:$0xff] }
 0x226   : > { %v1457_v24 = vpop.f32.mrf.mxu0  ;;  %4504 = vmatmul.mubr.msk.bf16.gmra.mxu0 %vm538_vm1, %v5097_v35 }
 0x227   : > { %7620 = vst [vmem:[#allocation37_spill] sm:$0xff] %v6261_v20  ;;  %v6268_v37 = vadd.f32 %v1457_v24, %v5749_v58  ;;  %2277 = vmatprep.mubr.bf16.mxu0 %v7502_v56  ;;  %v6284_v58 = vpop.f32.mrf.mxu1  ;;  %v7627_v24 = vld [vmem:[#allocation41_spill] sm:$0xff] }
 0x228   : > { %v1459_v18 = vpop.f32.mrf.mxu0 }
 0x229   : > { %7621 = vst [vmem:[#allocation92_spill] sm:$0xff] %v6268_v37  ;;  %v6272_v31 = vadd.f32 %v1459_v18, %v5752_v33  ;;  %v7629_v18 = vld [vmem:[#allocation42_spill] sm:$0xff] }
 0x22a   : > { %v1461_v14 = vpop.f32.mrf.mxu0 }
 0x22b   : > { %7622 = vst [vmem:[#allocation93_spill] sm:$0xff] %v6272_v31  ;;  %v6277_v25 = vadd.f32 %v1461_v14, %v7623_v55  ;;  %v6293_v55 = vpop.f32.mrf.mxu1 }
 0x22c   : > { %v1463_v20 = vpop.f32.mrf.mxu0  ;;  %7631 = vst [vmem:[#allocation94_spill] sm:$0xff] %v6293_v55 }
 0x22d   : > { %7624 = vst [vmem:[#allocation38_spill] sm:$0xff] %v6277_v25  ;;  %v6280_v35 = vadd.f32 %v1463_v20, %v7625_v8  ;;  %v7632_v8 = vld [vmem:[#allocation44_spill] sm:$0xff]  ;;  %v7635_v25 = vld [vmem:[#allocation43_spill] sm:$0xff] }
 0x22e   : > { %v1467_v17 = vpop.f32.mrf.mxu0  ;;  %4505 = vmatmul.mubr.msk.bf16.gmra.mxu0 %vm538_vm1, %v5761_v40 }
 0x22f   : > { %7626 = vst [vmem:[#allocation40_spill] sm:$0xff] %v6280_v35  ;;  %v6287_v37 = vadd.f32 %v1467_v17, %v7627_v24  ;;  %2287 = vmatprep.mubr.bf16.mxu0 %v7502_v56  ;;  %v6302_v17 = vpop.f32.mrf.mxu1  ;;  %v7637_v24 = vld [vmem:[#allocation47_spill] sm:$0xff] }
 0x230   : > { %v1469_v33 = vpop.f32.mrf.mxu0  ;;  %7636 = vst [vmem:[#allocation43_spill] sm:$0xff] %v6302_v17  ;;  %v7644_v17 = vld [vmem:[#allocation52_spill] sm:$0xff] }
 0x231   : > { %7628 = vst [vmem:[#allocation41_spill] sm:$0xff] %v6287_v37  ;;  %v6291_v31 = vadd.f32 %v1469_v33, %v7629_v18  ;;  %v6311_v33 = vld [vmem:[%s7454_s3 + $0x70] sm:$0xff] }
 0x232   : > { %v1471_v14 = vpop.f32.mrf.mxu0 }
 0x233   : > { %7630 = vst [vmem:[#allocation42_spill] sm:$0xff] %v6291_v31  ;;  %v6296_v20 = vadd.f32 %v1471_v14, %v7632_v8  ;;  %v4565_v14 = vcombine.high %v6311_v33, %v6311_v33  ;;  %v7639_v8 = vld [vmem:[#allocation48_spill] sm:$0xff] }
 0x234   : > { %v6298_v35 = vpop.f32.mrf.mxu0 }
 0x235   : > { %7633 = vst [vmem:[#allocation44_spill] sm:$0xff] %v6296_v20  ;;  %7634 = vst [vmem:[#allocation95_spill] sm:$0xff] %v6298_v35  ;;  %4566 = vmatprep.subr.msk.bf16.mxu1 %vm2684_vm2, %v4565_v14 }
 0x236   : > { %v1477_v40 = vpop.f32.mrf.mxu0  ;;  %4506 = vmatmul.mubr.msk.bf16.gmra.mxu0 %vm538_vm1, %v7635_v25 }
 0x237   : > { %v6305_v37 = vadd.f32 %v1477_v40, %v7637_v24  ;;  %2297 = vmatprep.mubr.bf16.mxu0 %v7502_v56  ;;  %v6319_v40 = vpop.f32.mrf.mxu1  ;;  %v7641_v24 = vld [vmem:[#allocation49_spill] sm:$0xff] }
 0x238   : > { %v1479_v18 = vpop.f32.mrf.mxu0 }
 0x239   : > { %7638 = vst [vmem:[#allocation47_spill] sm:$0xff] %v6305_v37  ;;  %v6316_v20 = vadd.f32 %v1479_v18, %v7639_v8  ;;  %v6328_v41 = vpop.f32.mrf.mxu1 }
 0x23a   : > { %v1481_v25 = vpop.f32.mrf.mxu0 }
 0x23b   : > { %7640 = vst [vmem:[#allocation48_spill] sm:$0xff] %v6316_v20  ;;  %v6322_v35 = vadd.f32 %v1481_v25, %v7641_v24  ;;  %v4940_v25 = vld [vmem:[%s5204_s12 + $0xd8] sm:$0xff]   ;;  %v6338_v24 = vpop.f32.mrf.mxu1 }
 0x23c   : > { %v6324_v31 = vpop.f32.mrf.mxu0  ;;  %7647 = vst [vmem:[#allocation98_spill] sm:$0xff] %v6338_v24 }
 0x23d   : > { %7642 = vst [vmem:[#allocation49_spill] sm:$0xff] %v6322_v35  ;;  %7643 = vst [vmem:[#allocation96_spill] sm:$0xff] %v6324_v31 }
 0x23e   : > { %v1487_v37 = vpop.f32.mrf.mxu0  ;;  %4507 = vmatmul.mubr.msk.bf16.gmra.mxu0 %vm538_vm1, %v5818_v9  ;;  %v7650_v9 = vld [vmem:[#allocation2_spill] sm:$0xff] }
 0x23f   : > { %v6331_v55 = vadd.f32 %v1487_v37, %v7644_v17  ;;  %2307 = vmatprep.mubr.bf16.mxu0 %v7502_v56  ;;  %v1188_v20 = vadd.f32 %v5829_v0, %v7650_v9  ;;  %v7651_v17 = vld [vmem:[#allocation3_spill] sm:$0xff] }
 0x240   : > { %v1489_v18 = vpop.f32.mrf.mxu0 }
 0x241   : > { %7645 = vst [vmem:[#allocation52_spill] sm:$0xff] %v6331_v55  ;;  %v6335_v14 = vadd.f32 %v1489_v18, %v5814_v38  ;;  %v1190_v55 = vadd.f32 %v5836_v6, %v7651_v17  ;;  %v6350_v38 = vpop.f32.mrf.mxu1 }
 0x242   : > { %v1491_v8 = vpop.f32.mrf.mxu0  ;;  %7652 = vst [vmem:[#allocation2_spill] sm:$0xff] %v6350_v38 }
 0x243   : > { %7646 = vst [vmem:[#allocation97_spill] sm:$0xff] %v6335_v14  ;;  %v6341_v35 = vadd.f32 %v1491_v8, %v5820_v42  ;;  %v7654_v42 = vld [vmem:[#allocation4_spill] sm:$0xff]  ;;  %v6359_v0 = vpop.f32.mrf.mxu1 }
 0x244   : > { %v6343_v31 = vpop.f32.mrf.mxu0  ;;  %v1192_v8 = vadd.f32 %v5839_v5, %v7654_v42 }
 0x245   : > { %7648 = vst [vmem:[#allocation99_spill] sm:$0xff] %v6341_v35  ;;  %7649 = vst [vmem:[#allocation100_spill] sm:$0xff] %v6343_v31  ;;  %v6365_v17 = vpop.f32.mrf.mxu1 }
 0x246   : > { %v1497_v37 = vpop.f32.mrf.mxu0  ;;  %4508 = vmatmul.mubr.msk.bf16.gmra.mxu0 %vm538_vm1, %v4940_v25  ;;  %7658 = vst [vmem:[#allocation103_spill] sm:$0xff] %v6365_v17 }
 0x247   : > { %v6352_v18 = vadd.f32 %v1497_v37, %v1188_v20  ;;  %3378 = vmatprep.mubr.bf16.mxu0 %v7502_v56  ;;  %v6369_v24 = vpop.f32.mrf.mxu1 }
 0x248   : > { %v1499_v14 = vpop.f32.mrf.mxu0  ;;  %7659 = vst [vmem:[#allocation104_spill] sm:$0xff] %v6369_v24 }
 0x249   : > { %7653 = vst [vmem:[#allocation3_spill] sm:$0xff] %v6352_v18  ;;  %v6357_v35 = vadd.f32 %v1499_v14, %v1190_v55  ;;  %v6372_v42 = vpop.f32.mrf.mxu1 }
 0x24a   : > { %v1501_v31 = vpop.f32.mrf.mxu0  ;;  %7660 = vst [vmem:[#allocation105_spill] sm:$0xff] %v6372_v42 }
 0x24b   : > { %7655 = vst [vmem:[#allocation4_spill] sm:$0xff] %v6357_v35  ;;  %v6361_v9 = vadd.f32 %v1501_v31, %v1192_v8 }
 0x24c   : > { %v6363_v25 = vpop.f32.mrf.mxu0 }
 0x24d   : > { %7656 = vst [vmem:[#allocation101_spill] sm:$0xff] %v6361_v9  ;;  %7657 = vst [vmem:[#allocation102_spill] sm:$0xff] %v6363_v25 }
 0x24e   : > { %v2079_v6 = vpop.f32.mrf.mxu0 }
 0x24f   : > { %v2318_v20 = vadd.f32 %v2079_v6, %v5853_v13  ;;  %v7661_v13 = vld [vmem:[#allocation54_spill] sm:$0xff] }
 0x250   : > { %v2081_v37 = vpop.f32.mrf.mxu0  ;;  %v1915_v6 = vadd.f32 %v5874_v3, %v7661_v13  ;;  %v7662_v13 = vld [vmem:[#allocation56_spill] sm:$0xff] }
 0x251   : > { %v2319_v18 = vadd.f32 %v2081_v37, %v5858_v19  ;;  %v1919_v19 = vadd.f32 %v5897_v32, %v5845_v10  ;;  %v6380_v37 = vpop.f32.mrf.mxu1 }
 0x252   : > { %v2083_v38 = vpop.f32.mrf.mxu0 }
 0x253   : > { %v2320_v5 = vadd.f32 %v2083_v38, %v5869_v39  ;;  %v6388_v3 = vpop.f32.mrf.mxu1 }
 0x254   : > { %v2085_v55 = vpop.f32.mrf.mxu0 }
 0x255   : > { %v2321_v42 = vadd.f32 %v2085_v55, %v1915_v6 }
 0x256   : > { %v2089_v14 = vpop.f32.mrf.mxu0 }
 0x257   : > { %v2322_v31 = vadd.f32 %v2089_v14, %v5882_v61 }
 0x258   : > { %v2091_v8 = vpop.f32.mrf.mxu0 }
 0x259   : > { %v2414_v9 = vmax.f32 %v2318_v20, %v2322_v31  ;;  %v2323_v25 = vadd.f32 %v2091_v8, %v5887_v46  ;;  %v6386_v46 = vld [vmem:[%s7453_s2] ss:$0 sm:$0xff] }
 0x25a   : > { %v2093_v35 = vpop.f32.mrf.mxu0 }
 0x25b   : > { %v2415_v39 = vmax.f32 %v2319_v18, %v2323_v25  ;;  %v2324_v38 = vadd.f32 %v2093_v35, %v5892_v53  ;;  %v6391_v53 = vpop.f32.mrf.mxu1 }
 0x25c   : > { %v2095_v24 = vpop.f32.mrf.mxu0 }
 0x25d   : > { %v2462_v17 = vmax.f32 %v2414_v9, %v2415_v39  ;;  %v2416_v61 = vmax.f32 %v2320_v5, %v2324_v38  ;;  %v2325_v14 = vadd.f32 %v2095_v24, %v1919_v19  ;;  %v1920_v24 = vadd.f32 %v5904_v51, %v5850_v2  ;;  %v6402_v19 = vpop.f32.mrf.mxu1 }
 0x25e   : > { %v2099_v20 = vpop.f32.mrf.mxu0  ;;  %v1924_v5 = vadd.f32 %v5937_v59, %v5879_v16  ;;  %v1922_v2 = vadd.f32 %v5915_v45, %v5867_v27  ;;  %v1926_v16 = vadd.f32 %v5956_v60, %v5890_v29 }
 0x25f   : > { %v2417_v31 = vmax.f32 %v2321_v42, %v2325_v14  ;;  %v2493_v32 = vadd.f32 %v6386_v46, %v2462_v17  ;;  %v1921_v42 = vadd.f32 %v5910_v4, %v7662_v13  ;;  %v1925_v17 = vadd.f32 %v5947_v43, %v5885_v50 }
 0x260   : > { %v2101_v10 = vpop.f32.mrf.mxu0  ;;  %v2326_v38 = vadd.f32 %v2099_v20, %v1920_v24  ;;  %v1927_v43 = vadd.f32 %v5966_v48, %v5895_v44 }
 0x261   : > { %v2463_v18 = vmax.f32 %v2416_v61, %v2417_v31  ;;  %v2517_v55 = vmax.f32 %v2493_v32, 0.0  ;;  %v2327_v59 = vadd.f32 %v2101_v10, %v1921_v42  ;;  %v7663_v31 = vld [vmem:[#allocation57_spill] sm:$0xff] }
 0x262   : > { %v2103_v25 = vpop.f32.mrf.mxu0  ;;  %v1923_v32 = vadd.f32 %v5922_v7, %v7663_v31 }
 0x263   : > { %v2494_v35 = vadd.f32 %v6386_v46, %v2463_v18  ;;  %v6414_v18 = vpop.f32.mrf.mxu1  ;;  %v2328_v20 = vadd.f32 %v2103_v25, %v1922_v2  ;;  %v4564_v25 = vcombine.low %v6311_v33, %v6311_v33 }
 0x264   : > { %v2105_v9 = vpop.f32.mrf.mxu0 }
 0x265   : > { %v2518_v8 = vmax.f32 %v2494_v35, 0.0  ;;  %v2329_v45 = vadd.f32 %v2105_v9, %v1923_v32  ;;  %v6416_v10 = vpop.f32.mrf.mxu1 }
 0x266   : > { %v2109_v6 = vpop.f32.mrf.mxu0 }
 0x267   : > { %v6404_v39 = vpack.c.bf16 %v2518_v8, %v2517_v55  ;;  %v2330_v61 = vadd.f32 %v2109_v6, %v1924_v5  ;;  %v6419_v44 = vpop.f32.mrf.mxu1 }
 0x268   : > { %v2111_v51 = vpop.f32.mrf.mxu0 }
 0x269   : > { %v2418_v14 = vmax.f32 %v2326_v38, %v2330_v61  ;;  %v2331_v4 = vadd.f32 %v2111_v51, %v1925_v17  ;;  %v7664_v17 = vld [vmem:[#allocation58_spill] sm:$0xff]  ;;  %v1932_v61 = vadd.f32 %v6019_v49, %v5925_v12  ;;  %v6432_v31 = vpop.f32.mrf.mxu1  ;;  %v7666_v49 = vld [vmem:[#allocation59_spill] sm:$0xff] }
 0x26a   : > { %v2113_v50 = vpop.f32.mrf.mxu0  ;;  %v1928_v38 = vadd.f32 %v5975_v21, %v7664_v17  ;;  %v2883_v21 = vsel %vm2684_vm2, %v4564_v25, 0  ;;  %v4980_v12 = vld [vmem:[%s7454_s3 + $0x64] ss:$8 sps:$4 sm:$0xff]  }
 0x26b   : > { %v2419_v35 = vmax.f32 %v2327_v59, %v2331_v4  ;;  %v2332_v24 = vadd.f32 %v2113_v50, %v1926_v16  ;;  %v1929_v16 = vadd.f32 %v5985_v26, %v5908_v15  ;;  %v7665_v59 = vld [vmem:[#allocation61_spill] sm:$0xff]  ;;  %v1930_v15 = vadd.f32 %v6000_v52, %v7666_v49  ;;  %v4978_v52 = vld [vmem:[%s7454_s3 + $0x60] ss:$8 sps:$4 sm:$0xff]  }
 0x26c   : > { %v2115_v27 = vpop.f32.mrf.mxu0 }
 0x26d   : > { %v2464_v5 = vmax.f32 %v2418_v14, %v2419_v35  ;;  %v2420_v55 = vmax.f32 %v2328_v20, %v2332_v24  ;;  %v2333_v29 = vadd.f32 %v2115_v27, %v1927_v43  ;;  %v1933_v14 = vadd.f32 %v6029_v30, %v7665_v59  ;;  %v7667_v24 = vld [vmem:[#allocation60_spill] sm:$0xff] }
 0x26e   : > { %v2119_v60 = vpop.f32.mrf.mxu0  ;;  %v1934_v30 = vadd.f32 %v6038_v11, %v5940_v28  ;;  %v1931_v27 = vadd.f32 %v6010_v57, %v7667_v24  ;;  %v6454_v11 = vpop.f32.mrf.mxu1  ;;  %v4983_v57 = vld [vmem:[%s7454_s3 + $0x54] ss:$8 sps:$4 sm:$0xff]   ;;  %v4987_v24 = vld [vmem:[%s7454_s3 + $0x30] ss:$8 sps:$4 sm:$0xff]  }
 0x26f   : > { %v2421_v8 = vmax.f32 %v2329_v45, %v2333_v29  ;;  %v2495_v7 = vadd.f32 %v6386_v46, %v2464_v5  ;;  %v2334_v32 = vadd.f32 %v2119_v60, %v1928_v38  ;;  %v7668_v5 = vld [vmem:[#allocation62_spill] sm:$0xff] }
 0x270   : > { %v2121_v13 = vpop.f32.mrf.mxu0  ;;  %v1935_v28 = vadd.f32 %v6048_v23, %v7668_v5  ;;  %v4981_v23 = vld [vmem:[%s7454_s3 + $0x50] ss:$8 sps:$4 sm:$0xff]   ;;  %v6462_v17 = vpop.f32.mrf.mxu1  ;;  %v4986_v38 = vld [vmem:[%s7454_s3 + $0x44] ss:$8 sps:$4 sm:$0xff]  }
 0x271   : > { %v2465_v42 = vmax.f32 %v2420_v55, %v2421_v8  ;;  %v2519_v2 = vmax.f32 %v2495_v7, 0.0  ;;  %v2335_v43 = vadd.f32 %v2121_v13, %v1929_v16  ;;  %v4984_v16 = vld [vmem:[%s7454_s3 + $0x40] ss:$8 sps:$4 sm:$0xff]  }
 0x272   : > { %v2123_v6 = vpop.f32.mrf.mxu0  ;;  %v6471_v59 = vpop.f32.mrf.mxu1 }
 0x273   : > { %v2496_v48 = vadd.f32 %v6386_v46, %v2465_v42  ;;  %v2336_v55 = vadd.f32 %v2123_v6, %v1930_v15 }
 0x274   : > { %v2125_v9 = vpop.f32.mrf.mxu0 }
 0x275   : > { %v2520_v51 = vmax.f32 %v2496_v48, 0.0  ;;  %v2337_v13 = vadd.f32 %v2125_v9, %v1931_v27  ;;  %v7673_v27 = vld [vmem:[#allocation68_spill] sm:$0xff] }
 0x276   : > { %v2129_v4 = vpop.f32.mrf.mxu0 }
 0x277   : > { %v6434_v33 = vpack.c.bf16 %v2520_v51, %v2519_v2  ;;  %v2338_v50 = vadd.f32 %v2129_v4, %v1932_v61  ;;  %v4989_v4 = vld [vmem:[%s7454_s3 + $0x34] ss:$8 sps:$4 sm:$0xff]  }
 0x278   : > { %v2131_v26 = vpop.f32.mrf.mxu0 }
 0x279   : > { %v2422_v20 = vmax.f32 %v2334_v32, %v2338_v50  ;;  %v2339_v35 = vadd.f32 %v2131_v26, %v1933_v14  ;;  %4542 = vmatmul.mubr.msk.bf16.vlgmr.msra.gmra.mxu1 %vm2659_vm3, %v6434_v33  ;;  %v7669_v50 = vld [vmem:[#allocation63_spill] sm:$0xff] }
 0x27a   : > { %v2133_v45 = vpop.f32.mrf.mxu0  ;;  %2733 = vmatprep.mubr.bf16.mxu1 %v7502_v56  ;;  %2889 = vmatpush1.bf16.msra.mxu1 %v2883_v21  ;;  %v1936_v21 = vadd.f32 %v6057_v1, %v7669_v50 }
 0x27b   : > { %v2423_v29 = vmax.f32 %v2335_v43, %v2339_v35  ;;  %v2340_v60 = vadd.f32 %v2133_v45, %v1934_v30  ;;  %2890 = vmatprep.subr.bf16.mxu1 %v4980_v12  ;;  %v7670_v12 = vld [vmem:[#allocation67_spill] sm:$0xff]  ;;  %v7671_v30 = vld [vmem:[#allocation64_spill] sm:$0xff]  ;;  %v1941_v45 = vadd.f32 %v6134_v63, %v7673_v27 }
 0x27c   : > { %v2135_v8 = vpop.f32.mrf.mxu0  ;;  %v1940_v49 = vadd.f32 %v6118_v54, %v7670_v12  ;;  %v7672_v43 = vld [vmem:[#allocation76_spill] sm:$0xff] }
 0x27d   : > { %v2466_v7 = vmax.f32 %v2422_v20, %v2423_v29  ;;  %v2424_v42 = vmax.f32 %v2336_v55, %v2340_v60  ;;  %v2341_v48 = vadd.f32 %v2135_v8, %v1935_v28  ;;  %v1937_v20 = vadd.f32 %v7672_v43, %v7671_v30  ;;  %v4992_v28 = vld [vmem:[%s7454_s3 + $0x24] ss:$8 sps:$4 sm:$0xff]   ;;  %v7674_v55 = vld [vmem:[#allocation65_spill] sm:$0xff] }
 0x27e   : > { %v2139_v25 = vpop.f32.mrf.mxu0  ;;  %2891 = vmatpush1.bf16.msra.mxu1 %v4978_v52  ;;  %v6488_v52 = vpop.f32.mrf.mxu1  ;;  %v7675_v29 = vld [vmem:[#allocation78_spill] sm:$0xff]  ;;  %v7676_v8 = vld [vmem:[#allocation69_spill] sm:$0xff] }
 0x27f   : > { %v2425_v6 = vmax.f32 %v2337_v13, %v2341_v48  ;;  %2892 = vmatprep.subr.bf16.mxu1 %v4983_v57  ;;  %v2497_v9 = vadd.f32 %v6386_v46, %v2466_v7  ;;  %v2342_v5 = vadd.f32 %v2139_v25, %v1936_v21  ;;  %v1938_v60 = vadd.f32 %v7675_v29, %v7674_v55  ;;  %v7677_v48 = vld [vmem:[#allocation66_spill] sm:$0xff]  ;;  %v7678_v25 = vld [vmem:[#allocation79_spill] sm:$0xff] }
 0x280   : > { %v2141_v61 = vpop.f32.mrf.mxu0  ;;  %v1942_v13 = vadd.f32 %v6149_v34, %v7676_v8  ;;  %v4998_v43 = vld [vmem:[%s7454_s3 + $0x4] ss:$8 sps:$4 sm:$0xff]   ;;  %v7682_v8 = vld [vmem:[#allocation73_spill] sm:$0xff] }
 0x281   : > { %v2467_v2 = vmax.f32 %v2424_v42, %v2425_v6  ;;  %v2521_v15 = vmax.f32 %v2497_v9, 0.0  ;;  %v2343_v7 = vadd.f32 %v2141_v61, %v1937_v20  ;;  %v7679_v9 = vld [vmem:[#allocation70_spill] sm:$0xff]  ;;  %v6509_v61 = vpop.f32.mrf.mxu1  ;;  %v7680_v29 = vld [vmem:[#allocation71_spill] sm:$0xff] }
 0x282   : > { %v2143_v51 = vpop.f32.mrf.mxu0  ;;  %2893 = vmatpush1.bf16.msra.mxu1 %v4981_v23  ;;  %v1939_v23 = vadd.f32 %v7678_v25, %v7677_v48  ;;  %v1943_v34 = vadd.f32 %v6165_v22, %v7679_v9  ;;  %v4993_v22 = vld [vmem:[%s7454_s3 + $0x10] ss:$8 sps:$4 sm:$0xff]   ;;  %v7687_v9 = vld [vmem:[#allocation91_spill] sm:$0xff] }
 0x283   : > { %v2498_v14 = vadd.f32 %v6386_v46, %v2467_v2  ;;  %2894 = vmatprep.subr.bf16.mxu1 %v4986_v38  ;;  %v4990_v38 = vld [vmem:[%s7454_s3 + $0x20] ss:$8 sps:$4 sm:$0xff]   ;;  %v2344_v2 = vadd.f32 %v2143_v51, %v1938_v60  ;;  %v6517_v30 = vpop.f32.mrf.mxu1  ;;  %v7684_v48 = vld [vmem:[#allocation72_spill] sm:$0xff] }
 0x284   : > { %v2145_v32 = vpop.f32.mrf.mxu0  ;;  %v7681_v60 = vld [vmem:[#allocation83_spill] sm:$0xff]  ;;  %v7685_v25 = vld [vmem:[#allocation84_spill] sm:$0xff] }
 0x285   : > { %v2522_v26 = vmax.f32 %v2498_v14, 0.0  ;;  %v2345_v21 = vadd.f32 %v2145_v32, %v1939_v23  ;;  %v6525_v32 = vld [vmem:[%s7454_s3 + $0x160] sm:$0xff]  ;;  %v1945_v23 = vadd.f32 %v7685_v25, %v7684_v48 }
 0x286   : > { %v2149_v35 = vpop.f32.mrf.mxu0  ;;  %2895 = vmatpush1.bf16.msra.mxu1 %v4984_v16 }
 0x287   : > { %v6490_v1 = vpack.c.bf16 %v2522_v26, %v2521_v15  ;;  %v2346_v54 = vadd.f32 %v2149_v35, %v1940_v49  ;;  %2896 = vmatprep.subr.bf16.mxu1 %v4989_v4  ;;  %v4995_v4 = vld [vmem:[%s7454_s3 + $0x14] ss:$8 sps:$4 sm:$0xff]  }
 0x288   : > { %v2151_v57 = vpop.f32.mrf.mxu0 }
 0x289   : > { %v2426_v63 = vmax.f32 %v2342_v5, %v2346_v54  ;;  %v2347_v42 = vadd.f32 %v2151_v57, %v1941_v45  ;;  %4543 = vmatmul.mubr.msk.bf16.gmra.mxu1 %vm2659_vm3, %v6490_v1  ;;  %v4996_v45 = vld [vmem:[%s7454_s3] ss:$8 sps:$4 sm:$0xff]   ;;  %v6531_v5 = vpop.f32.mrf.mxu1  ;;  %v1944_v57 = vadd.f32 %v7681_v60, %v7680_v29 }
 0x28a   : > { %v2153_v6 = vpop.f32.mrf.mxu0  ;;  %2743 = vmatprep.mubr.bf16.mxu1 %v7502_v56  ;;  %2897 = vmatpush1.bf16.msra.mxu1 %v4987_v24 }
 0x28b   : > { %v2427_v16 = vmax.f32 %v2343_v7, %v2347_v42  ;;  %v2348_v14 = vadd.f32 %v2153_v6, %v1942_v13  ;;  %2898 = vmatprep.subr.bf16.mxu1 %v4992_v28  ;;  %v4605_v28 = vcombine.high %v6525_v32, %v6525_v32  ;;  %v7683_v13 = vld [vmem:[#allocation90_spill] sm:$0xff] }
 0x28c   : > { %v2155_v50 = vpop.f32.mrf.mxu0  ;;  %v1948_v7 = vadd.f32 %v7683_v13, %v7682_v8 }
 0x28d   : > { %v2468_v12 = vmax.f32 %v2426_v63, %v2427_v16  ;;  %v2428_v49 = vmax.f32 %v2344_v2, %v2348_v14  ;;  %v2349_v15 = vadd.f32 %v2155_v50, %v1943_v34  ;;  %v6544_v2 = vpop.f32.mrf.mxu1  ;;  %v7688_v50 = vld [vmem:[#allocation6_spill] sm:$0xff] }
 0x28e   : > { %v2159_v26 = vpop.f32.mrf.mxu0  ;;  %2899 = vmatpush1.bf16.msra.mxu1 %v4990_v38  ;;  %v7686_v38 = vld [vmem:[#allocation8_spill] sm:$0xff] }
 0x28f   : > { %v2429_v51 = vmax.f32 %v2345_v21, %v2349_v15  ;;  %2900 = vmatprep.subr.bf16.mxu1 %v4995_v4  ;;  %v2499_v35 = vadd.f32 %v6386_v46, %v2468_v12  ;;  %v1949_v34 = vadd.f32 %v7687_v9, %v7686_v38  ;;  %v2350_v14 = vadd.f32 %v2159_v26, %v1944_v57  ;;  %v7689_v21 = vld [vmem:[#allocation86_spill] sm:$0xff]  ;;  %v7691_v26 = vld [vmem:[#allocation7_spill] sm:$0xff] }
 0x290   : > { %v2161_v20 = vpop.f32.mrf.mxu0  ;;  %v1946_v12 = vadd.f32 %v7689_v21, %v7688_v50  ;;  %v7695_v50 = vld [vmem:[#allocation75_spill] sm:$0xff] }
 0x291   : > { %v2469_v24 = vmax.f32 %v2428_v49, %v2429_v51  ;;  %v2523_v63 = vmax.f32 %v2499_v35, 0.0  ;;  %v7690_v49 = vld [vmem:[#allocation9_spill] sm:$0xff]  ;;  %v2351_v51 = vadd.f32 %v2161_v20, %v1945_v23  ;;  %v6563_v20 = vpop.f32.mrf.mxu1  ;;  %v1956_v21 = vadd.f32 %v6319_v40, %v7695_v50  ;;  %v7701_v40 = vld [vmem:[#allocation98_spill] sm:$0xff] }
 0x292   : > { %v2163_v27 = vpop.f32.mrf.mxu0  ;;  %2901 = vmatpush1.bf16.msra.mxu1 %v4993_v22  ;;  %v1950_v15 = vadd.f32 %v6255_v36, %v7690_v49 }
 0x293   : > { %v2500_v54 = vadd.f32 %v6386_v46, %v2469_v24  ;;  %2902 = vmatprep.subr.bf16.mxu1 %v4998_v43  ;;  %v7692_v24 = vld [vmem:[#allocation87_spill] sm:$0xff]  ;;  %v2352_v29 = vadd.f32 %v2163_v27, %v1946_v12  ;;  %v6565_v25 = vpop.f32.mrf.mxu1 }
 0x294   : > { %v2165_v55 = vpop.f32.mrf.mxu0 }
 0x295   : > { %v2524_v42 = vmax.f32 %v2500_v54, 0.0 }
 0x296   : > { %v2169_v6 = vpop.f32.mrf.mxu0  ;;  %2903 = vmatpush1.bf16.msra.mxu1 %v4996_v45  ;;  %v1947_v45 = vadd.f32 %v7692_v24, %v7691_v26 }
 0x297   : > { %v6546_v16 = vpack.c.bf16 %v2524_v42, %v2523_v63  ;;  %v2354_v4 = vadd.f32 %v2169_v6, %v1948_v7  ;;  %4606 = vmatprep.subr.msk.bf16.mxu1 %vm2684_vm2, %v4605_v28  ;;  %v7693_v28 = vld [vmem:[#allocation10_spill] sm:$0xff] }
 0x298   : > { %v2171_v22 = vpop.f32.mrf.mxu0  ;;  %v1951_v36 = vadd.f32 %v6265_v47, %v7693_v28  ;;  %v2353_v13 = vadd.f32 %v2165_v55, %v1947_v45  ;;  %v6568_v47 = vpop.f32.mrf.mxu1  ;;  %v7698_v28 = vld [vmem:[#allocation12_spill] sm:$0xff] }
 0x299   : > { %v2430_v43 = vmax.f32 %v2350_v14, %v2354_v4  ;;  %v2355_v35 = vadd.f32 %v2171_v22, %v1949_v34  ;;  %4544 = vmatmul.mubr.msk.bf16.gmra.mxu1 %vm2659_vm3, %v6546_v16  ;;  %4647 = vmatmul.mubr.msk.bf16.vlgmr.msra.gmra.mxu0 %vm2659_vm3, %v6546_v16  ;;  %v7694_v4 = vld [vmem:[#allocation74_spill] sm:$0xff] }
 0x29a   : > { %v2173_v54 = vpop.f32.mrf.mxu0  ;;  %2753 = vmatprep.mubr.bf16.mxu1 %v7502_v56  ;;  %3388 = vmatprep.mubr.bf16.mxu0 %v7502_v56  ;;  %v1952_v55 = vadd.f32 %v6274_v62, %v7694_v4  ;;  %v6579_v26 = vpop.f32.mrf.mxu1  ;;  %v7699_v62 = vld [vmem:[#allocation94_spill] sm:$0xff] }
 0x29b   : > { %v2431_v60 = vmax.f32 %v2351_v51, %v2355_v35  ;;  %v2356_v57 = vadd.f32 %v2173_v54, %v1950_v15  ;;  %v7696_v15 = vld [vmem:[#allocation11_spill] sm:$0xff] }
 0x29c   : > { %v2175_v8 = vpop.f32.mrf.mxu0  ;;  %v1953_v22 = vadd.f32 %v6284_v58, %v7696_v15 }
 0x29d   : > { %v2470_v7 = vmax.f32 %v2430_v43, %v2431_v60  ;;  %v2432_v63 = vmax.f32 %v2352_v29, %v2356_v57  ;;  %v2357_v42 = vadd.f32 %v2175_v8, %v1951_v36  ;;  %v7697_v43 = vld [vmem:[#allocation14_spill] sm:$0xff]  ;;  %v1954_v36 = vadd.f32 %v7699_v62, %v7698_v28  ;;  %v7700_v29 = vld [vmem:[#allocation15_spill] sm:$0xff] }
 0x29e   : > { %v2179_v48 = vpop.f32.mrf.mxu0  ;;  %v1957_v35 = vadd.f32 %v6328_v41, %v7697_v43  ;;  %v1958_v60 = vadd.f32 %v7701_v40, %v7700_v29  ;;  %v7702_v41 = vld [vmem:[#allocation13_spill] sm:$0xff]  ;;  %v7707_v29 = vld [vmem:[#allocation80_spill] sm:$0xff] }
 0x29f   : > { %v2433_v23 = vmax.f32 %v2353_v13, %v2357_v42  ;;  %v2501_v38 = vadd.f32 %v6386_v46, %v2470_v7  ;;  %v2358_v45 = vadd.f32 %v2179_v48, %v1952_v55  ;;  %v7703_v7 = vld [vmem:[#allocation43_spill] sm:$0xff]  ;;  %v7704_v48 = vld [vmem:[#allocation16_spill] sm:$0xff]  ;;  %v1964_v40 = vadd.f32 %v6380_v37, %v7707_v29 }
 0x2a0   : > { %v2181_v6 = vpop.f32.mrf.mxu0 }
 0x2a1   : > { %v2471_v9 = vmax.f32 %v2432_v63, %v2433_v23  ;;  %v2525_v12 = vmax.f32 %v2501_v38, 0.0  ;;  %v2359_v8 = vadd.f32 %v2181_v6, %v1953_v22  ;;  %v1955_v63 = vadd.f32 %v7703_v7, %v7702_v41  ;;  %v7705_v23 = vld [vmem:[#allocation2_spill] sm:$0xff]  ;;  %v6597_v6 = vpop.f32.mrf.mxu1  ;;  %v7710_v7 = vld [vmem:[#allocation20_spill] sm:$0xff] }
 0x2a2   : > { %v2183_v34 = vpop.f32.mrf.mxu0  ;;  %v1959_v38 = vadd.f32 %v7705_v23, %v7704_v48 }
 0x2a3   : > { %v2502_v27 = vadd.f32 %v6386_v46, %v2471_v9  ;;  %v2360_v9 = vadd.f32 %v2183_v34, %v1954_v36  ;;  %v6599_v22 = vpop.f32.mrf.mxu1  ;;  %v7706_v36 = vld [vmem:[#allocation77_spill] sm:$0xff] }
 0x2a4   : > { %v2185_v14 = vpop.f32.mrf.mxu0 }
 0x2a5   : > { %v2526_v49 = vmax.f32 %v2502_v27, 0.0  ;;  %v2361_v50 = vadd.f32 %v2185_v14, %v1955_v63  ;;  %v6602_v28 = vpop.f32.mrf.mxu1  ;;  %v1960_v14 = vadd.f32 %v6359_v0, %v7706_v36  ;;  %v1965_v63 = vadd.f32 %v6388_v3, %v7710_v7  ;;  %v7712_v0 = vld [vmem:[#allocation104_spill] sm:$0xff]  ;;  %v7714_v3 = vld [vmem:[#allocation19_spill] sm:$0xff] }
 0x2a6   : > { %v2189_v51 = vpop.f32.mrf.mxu0 }
 0x2a7   : > { %v6581_v24 = vpack.c.bf16 %v2526_v49, %v2525_v12  ;;  %v2362_v54 = vadd.f32 %v2189_v51, %v1956_v21 }
 0x2a8   : > { %v2191_v57 = vpop.f32.mrf.mxu0 }
 0x2a9   : > { %v2434_v13 = vmax.f32 %v2358_v45, %v2362_v54  ;;  %v2363_v58 = vadd.f32 %v2191_v57, %v1957_v35  ;;  %4545 = vmatmul.mubr.msk.bf16.gmra.mxu1 %vm2659_vm3, %v6581_v24  ;;  %4648 = vmatmul.mubr.msk.bf16.gmra.mxu0 %vm2659_vm3, %v6581_v24 }
 0x2aa   : > { %v2193_v42 = vpop.f32.mrf.mxu0  ;;  %2763 = vmatprep.mubr.bf16.mxu1 %v7502_v56  ;;  %3398 = vmatprep.mubr.bf16.mxu0 %v7502_v56 }
 0x2ab   : > { %v2435_v27 = vmax.f32 %v2359_v8, %v2363_v58  ;;  %v2364_v4 = vadd.f32 %v2193_v42, %v1958_v60  ;;  %v7708_v8 = vld [vmem:[#allocation17_spill] sm:$0xff]  ;;  %v6613_v42 = vpop.f32.mrf.mxu1 }
 0x2ac   : > { %v2195_v55 = vpop.f32.mrf.mxu0 }
 0x2ad   : > { %v2472_v21 = vmax.f32 %v2434_v13, %v2435_v27  ;;  %v2436_v12 = vmax.f32 %v2360_v9, %v2364_v4  ;;  %v2365_v49 = vadd.f32 %v2195_v55, %v1959_v38  ;;  %v7709_v13 = vld [vmem:[#allocation103_spill] sm:$0xff]  ;;  %v7711_v9 = vld [vmem:[#allocation18_spill] sm:$0xff]  ;;  %v7713_v4 = vld [vmem:[#allocation21_spill] sm:$0xff] }
 0x2ae   : > { %v2199_v15 = vpop.f32.mrf.mxu0  ;;  %v1961_v58 = vadd.f32 %v7709_v13, %v7708_v8  ;;  %v1962_v27 = vadd.f32 %v7712_v0, %v7711_v9  ;;  %v1966_v37 = vadd.f32 %v6391_v53, %v7713_v4  ;;  %v7717_v9 = vld [vmem:[#allocation81_spill] sm:$0xff]  ;;  %v7718_v0 = vld [vmem:[#allocation82_spill] sm:$0xff] }
 0x2af   : > { %v2437_v51 = vmax.f32 %v2361_v50, %v2365_v49  ;;  %v2503_v35 = vadd.f32 %v6386_v46, %v2472_v21  ;;  %v2366_v23 = vadd.f32 %v2199_v15, %v1960_v14  ;;  %v7715_v49 = vld [vmem:[#allocation105_spill] sm:$0xff] }
 0x2b0   : > { %v2201_v43 = vpop.f32.mrf.mxu0  ;;  %v1963_v15 = vadd.f32 %v7715_v49, %v7714_v3 }
 0x2b1   : > { %v2473_v45 = vmax.f32 %v2436_v12, %v2437_v51  ;;  %v2527_v60 = vmax.f32 %v2503_v35, 0.0  ;;  %v2367_v50 = vadd.f32 %v2201_v43, %v1961_v58  ;;  %v7716_v35 = vld [vmem:[#allocation22_spill] sm:$0xff]  ;;  %v6631_v43 = vpop.f32.mrf.mxu1 }
 0x2b2   : > { %v2203_v54 = vpop.f32.mrf.mxu0  ;;  %v1967_v53 = vadd.f32 %v6402_v19, %v7716_v35 }
 0x2b3   : > { %v2504_v34 = vadd.f32 %v6386_v46, %v2473_v45  ;;  %v2368_v45 = vadd.f32 %v2203_v54, %v1962_v27  ;;  %v6633_v13 = vpop.f32.mrf.mxu1  ;;  %v1972_v27 = vadd.f32 %v6454_v11, %v7718_v0 }
 0x2b4   : > { %v2205_v62 = vpop.f32.mrf.mxu0 }
 0x2b5   : > { %v2528_v57 = vmax.f32 %v2504_v34, 0.0  ;;  %v2369_v29 = vadd.f32 %v2205_v62, %v1963_v15  ;;  %v6636_v19 = vpop.f32.mrf.mxu1  ;;  %v1968_v62 = vadd.f32 %v6414_v18, %v7717_v9 }
 0x2b6   : > { %v2209_v41 = vpop.f32.mrf.mxu0 }
 0x2b7   : > { %v6615_v48 = vpack.c.bf16 %v2528_v57, %v2527_v60  ;;  %v2370_v38 = vadd.f32 %v2209_v41, %v1964_v40  ;;  %v6647_v49 = vpop.f32.mrf.mxu1 }
 0x2b8   : > { %v2211_v55 = vpop.f32.mrf.mxu0 }
 0x2b9   : > { %v2438_v21 = vmax.f32 %v2366_v23, %v2370_v38  ;;  %v2371_v12 = vadd.f32 %v2211_v55, %v1965_v63  ;;  %4546 = vmatmul.mubr.msk.bf16.gmra.mxu1 %vm2659_vm3, %v6615_v48  ;;  %4649 = vmatmul.mubr.msk.bf16.gmra.mxu0 %vm2659_vm3, %v6615_v48  ;;  %v7719_v55 = vld [vmem:[#allocation23_spill] sm:$0xff] }
 0x2ba   : > { %v2213_v51 = vpop.f32.mrf.mxu0  ;;  %2773 = vmatprep.mubr.bf16.mxu1 %v7502_v56  ;;  %3408 = vmatprep.mubr.bf16.mxu0 %v7502_v56 }
 0x2bb   : > { %v2439_v34 = vmax.f32 %v2367_v50, %v2371_v12  ;;  %v2372_v36 = vadd.f32 %v2213_v51, %v1966_v37  ;;  %v1969_v50 = vadd.f32 %v6416_v10, %v7719_v55  ;;  %v7720_v12 = vld [vmem:[#allocation26_spill] sm:$0xff] }
 0x2bc   : > { %v2215_v14 = vpop.f32.mrf.mxu0  ;;  %v1973_v3 = vadd.f32 %v6462_v17, %v7720_v12  ;;  %v7723_v17 = vld [vmem:[#allocation25_spill] sm:$0xff]  ;;  %v7726_v12 = vld [vmem:[#allocation88_spill] sm:$0xff] }
 0x2bd   : > { %v2474_v40 = vmax.f32 %v2438_v21, %v2439_v34  ;;  %v2440_v60 = vmax.f32 %v2368_v45, %v2372_v36  ;;  %v2373_v57 = vadd.f32 %v2215_v14, %v1967_v53  ;;  %v7721_v53 = vld [vmem:[#allocation24_spill] sm:$0xff]  ;;  %v7722_v45 = vld [vmem:[#allocation27_spill] sm:$0xff] }
 0x2be   : > { %v2219_v8 = vpop.f32.mrf.mxu0  ;;  %v1970_v18 = vadd.f32 %v6419_v44, %v7721_v53  ;;  %v1974_v11 = vadd.f32 %v6471_v59, %v7722_v45  ;;  %v7724_v44 = vld [vmem:[#allocation28_spill] sm:$0xff]  ;;  %v7727_v53 = vld [vmem:[#allocation29_spill] sm:$0xff] }
 0x2bf   : > { %v2441_v58 = vmax.f32 %v2369_v29, %v2373_v57  ;;  %v2505_v7 = vadd.f32 %v6386_v46, %v2474_v40  ;;  %v2374_v51 = vadd.f32 %v2219_v8, %v1968_v62  ;;  %v1971_v29 = vadd.f32 %v6432_v31, %v7723_v17 }
 0x2c0   : > { %v2221_v41 = vpop.f32.mrf.mxu0  ;;  %v1975_v59 = vadd.f32 %v6488_v52, %v7724_v44 }
 0x2c1   : > { %v2475_v63 = vmax.f32 %v2440_v60, %v2441_v58  ;;  %v2529_v4 = vmax.f32 %v2505_v7, 0.0  ;;  %v2375_v36 = vadd.f32 %v2221_v41, %v1969_v50  ;;  %v6665_v60 = vpop.f32.mrf.mxu1 }
 0x2c2   : > { %v2223_v23 = vpop.f32.mrf.mxu0 }
 0x2c3   : > { %v2506_v54 = vadd.f32 %v6386_v46, %v2475_v63  ;;  %v2376_v57 = vadd.f32 %v2223_v23, %v1970_v18  ;;  %v6667_v31 = vpop.f32.mrf.mxu1  ;;  %v1977_v18 = vadd.f32 %v6517_v30, %v7727_v53  ;;  %v7734_v53 = vld [vmem:[#allocation92_spill] sm:$0xff] }
 0x2c4   : > { %v2225_v38 = vpop.f32.mrf.mxu0 }
 0x2c5   : > { %v2530_v37 = vmax.f32 %v2506_v54, 0.0  ;;  %v2377_v7 = vadd.f32 %v2225_v38, %v1971_v29  ;;  %v6670_v52 = vpop.f32.mrf.mxu1  ;;  %v7729_v29 = vld [vmem:[#allocation30_spill] sm:$0xff] }
 0x2c6   : > { %v2229_v21 = vpop.f32.mrf.mxu0 }
 0x2c7   : > { %v6649_v15 = vpack.c.bf16 %v2530_v37, %v2529_v4  ;;  %v2378_v35 = vadd.f32 %v2229_v21, %v1972_v27  ;;  %v7725_v21 = vld [vmem:[#allocation85_spill] sm:$0xff] }
 0x2c8   : > { %v2231_v34 = vpop.f32.mrf.mxu0  ;;  %v1976_v38 = vadd.f32 %v6509_v61, %v7725_v21  ;;  %v1978_v61 = vadd.f32 %v6531_v5, %v7729_v29  ;;  %v7732_v5 = vld [vmem:[#allocation33_spill] sm:$0xff] }
 0x2c9   : > { %v2442_v14 = vmax.f32 %v2374_v51, %v2378_v35  ;;  %v2379_v10 = vadd.f32 %v2231_v34, %v1973_v3  ;;  %4547 = vmatmul.mubr.msk.bf16.gmra.mxu1 %vm2659_vm3, %v6649_v15  ;;  %4650 = vmatmul.mubr.msk.bf16.gmra.mxu0 %vm2659_vm3, %v6649_v15  ;;  %v1980_v3 = vadd.f32 %v6563_v20, %v7726_v12  ;;  %v7736_v29 = vld [vmem:[#allocation93_spill] sm:$0xff] }
 0x2ca   : > { %v2233_v40 = vpop.f32.mrf.mxu0  ;;  %2783 = vmatprep.mubr.bf16.mxu1 %v7502_v56  ;;  %3418 = vmatprep.mubr.bf16.mxu0 %v7502_v56 }
 0x2cb   : > { %v2443_v8 = vmax.f32 %v2375_v36, %v2379_v10  ;;  %v2380_v58 = vadd.f32 %v2233_v40, %v1974_v11  ;;  %v7728_v11 = vld [vmem:[#allocation89_spill] sm:$0xff]  ;;  %v6681_v36 = vpop.f32.mrf.mxu1  ;;  %v7730_v40 = vld [vmem:[#allocation32_spill] sm:$0xff] }
 0x2cc   : > { %v2235_v41 = vpop.f32.mrf.mxu0  ;;  %v1981_v34 = vadd.f32 %v6565_v25, %v7728_v11  ;;  %v1982_v20 = vadd.f32 %v6568_v47, %v7730_v40  ;;  %v7731_v25 = vld [vmem:[#allocation31_spill] sm:$0xff]  ;;  %v1983_v47 = vadd.f32 %v6579_v26, %v7732_v5 }
 0x2cd   : > { %v2476_v63 = vmax.f32 %v2442_v14, %v2443_v8  ;;  %v2444_v54 = vmax.f32 %v2376_v57, %v2380_v58  ;;  %v2381_v9 = vadd.f32 %v2235_v41, %v1975_v59  ;;  %v1979_v8 = vadd.f32 %v6544_v2, %v7731_v25  ;;  %v6699_v41 = vpop.f32.mrf.mxu1 }
 0x2ce   : > { %v2239_v62 = vpop.f32.mrf.mxu0 }
 0x2cf   : > { %v2445_v0 = vmax.f32 %v2377_v7, %v2381_v9  ;;  %v2507_v4 = vadd.f32 %v6386_v46, %v2476_v63  ;;  %v2382_v10 = vadd.f32 %v2239_v62, %v1976_v38  ;;  %v6701_v2 = vpop.f32.mrf.mxu1 }
 0x2d0   : > { %v2241_v27 = vpop.f32.mrf.mxu0 }
 0x2d1   : > { %v2477_v37 = vmax.f32 %v2444_v54, %v2445_v0  ;;  %v2531_v51 = vmax.f32 %v2507_v4, 0.0  ;;  %v2383_v59 = vadd.f32 %v2241_v27, %v1977_v18  ;;  %v6704_v26 = vpop.f32.mrf.mxu1  ;;  %v1988_v18 = vadd.f32 %v6631_v43, %v7734_v53 }
 0x2d2   : > { %v2243_v55 = vpop.f32.mrf.mxu0 }
 0x2d3   : > { %v2508_v23 = vadd.f32 %v6386_v46, %v2477_v37  ;;  %v2384_v7 = vadd.f32 %v2243_v55, %v1978_v61  ;;  %v1989_v61 = vadd.f32 %v6633_v13, %v7736_v29  ;;  %v6715_v40 = vpop.f32.mrf.mxu1  ;;  %v7739_v13 = vld [vmem:[#allocation37_spill] sm:$0xff] }
 0x2d4   : > { %v2245_v50 = vpop.f32.mrf.mxu0  ;;  %v1987_v5 = vadd.f32 %v6613_v42, %v7739_v13 }
 0x2d5   : > { %v2532_v35 = vmax.f32 %v2508_v23, 0.0  ;;  %v2385_v62 = vadd.f32 %v2245_v50, %v1979_v8 }
 0x2d6   : > { %v2249_v45 = vpop.f32.mrf.mxu0 }
 0x2d7   : > { %v6683_v14 = vpack.c.bf16 %v2532_v35, %v2531_v51  ;;  %v2386_v17 = vadd.f32 %v2249_v45, %v1980_v3  ;;  %v7733_v35 = vld [vmem:[#allocation34_spill] sm:$0xff] }
 0x2d8   : > { %v2251_v44 = vpop.f32.mrf.mxu0  ;;  %v1984_v50 = vadd.f32 %v6597_v6, %v7733_v35 }
 0x2d9   : > { %v2446_v57 = vmax.f32 %v2382_v10, %v2386_v17  ;;  %v2387_v30 = vadd.f32 %v2251_v44, %v1981_v34  ;;  %4548 = vmatmul.mubr.msk.bf16.gmra.mxu1 %vm2659_vm3, %v6683_v14  ;;  %4651 = vmatmul.mubr.msk.bf16.gmra.mxu0 %vm2659_vm3, %v6683_v14  ;;  %v7735_v34 = vld [vmem:[#allocation35_spill] sm:$0xff] }
 0x2da   : > { %v2253_v58 = vpop.f32.mrf.mxu0  ;;  %2793 = vmatprep.mubr.bf16.mxu1 %v7502_v56  ;;  %3428 = vmatprep.mubr.bf16.mxu0 %v7502_v56  ;;  %v1985_v10 = vadd.f32 %v6599_v22, %v7735_v34  ;;  %v7742_v34 = vld [vmem:[#allocation47_spill] sm:$0xff] }
 0x2db   : > { %v2447_v63 = vmax.f32 %v2383_v59, %v2387_v30  ;;  %v2388_v54 = vadd.f32 %v2253_v58, %v1982_v20  ;;  %v7738_v30 = vld [vmem:[#allocation38_spill] sm:$0xff] }
 0x2dc   : > { %v2255_v9 = vpop.f32.mrf.mxu0  ;;  %v1990_v43 = vadd.f32 %v6636_v19, %v7738_v30  ;;  %v6733_v19 = vpop.f32.mrf.mxu1 }
 0x2dd   : > { %v2478_v0 = vmax.f32 %v2446_v57, %v2447_v63  ;;  %v2448_v27 = vmax.f32 %v2384_v7, %v2388_v54  ;;  %v2389_v4 = vadd.f32 %v2255_v9, %v1983_v47  ;;  %v7737_v57 = vld [vmem:[#allocation36_spill] sm:$0xff] }
 0x2de   : > { %v2259_v37 = vpop.f32.mrf.mxu0  ;;  %v1986_v6 = vadd.f32 %v6602_v28, %v7737_v57  ;;  %v7740_v47 = vld [vmem:[#allocation40_spill] sm:$0xff]  ;;  %v7745_v57 = vld [vmem:[#allocation45_spill] sm:$0xff] }
 0x2df   : > { %v2449_v23 = vmax.f32 %v2385_v62, %v2389_v4  ;;  %v2509_v38 = vadd.f32 %v6386_v46, %v2478_v0  ;;  %v2390_v44 = vadd.f32 %v2259_v37, %v1984_v50  ;;  %v1991_v7 = vadd.f32 %v6647_v49, %v7740_v47  ;;  %v6737_v49 = vpop.f32.mrf.mxu1 }
 0x2e0   : > { %v2261_v21 = vpop.f32.mrf.mxu0  ;;  %v4604_v62 = vcombine.low %v6525_v32, %v6525_v32 }
 0x2e1   : > { %v2479_v12 = vmax.f32 %v2448_v27, %v2449_v23  ;;  %v2533_v45 = vmax.f32 %v2509_v38, 0.0  ;;  %v2391_v8 = vadd.f32 %v2261_v21, %v1985_v10  ;;  %v6750_v50 = vpop.f32.mrf.mxu1  ;;  %v1996_v10 = vadd.f32 %v6699_v41, %v7742_v34  ;;  %v5015_v34 = vld [vmem:[%s7454_s3 + $0x114] ss:$8 sps:$4 sm:$0xff]  }
 0x2e2   : > { %v2263_v3 = vpop.f32.mrf.mxu0  ;;  %v3096_v38 = vsel %vm2684_vm2, %v4604_v62, 0 }
 0x2e3   : > { %v2510_v55 = vadd.f32 %v6386_v46, %v2479_v12  ;;  %v2392_v63 = vadd.f32 %v2263_v3, %v1986_v6  ;;  %v5003_v12 = vld [vmem:[%s7454_s3 + $0x154] ss:$8 sps:$4 sm:$0xff]   ;;  %v7746_v6 = vld [vmem:[#allocation51_spill] sm:$0xff] }
 0x2e4   : > { %v2265_v51 = vpop.f32.mrf.mxu0  ;;  %v1174_v30 = vadd.f32 %v7746_v6, %v7745_v57  ;;  %v5018_v57 = vld [vmem:[%s7454_s3 + $0x104] ss:$8 sps:$4 sm:$0xff]  }
 0x2e5   : > { %v2534_v11 = vmax.f32 %v2510_v55, 0.0  ;;  %v2393_v27 = vadd.f32 %v2265_v51, %v1987_v5  ;;  %v5001_v51 = vld [vmem:[%s7454_s3 + $0x150] ss:$8 sps:$4 sm:$0xff]  }
 0x2e6   : > { %v2269_v17 = vpop.f32.mrf.mxu0 }
 0x2e7   : > { %v6717_v20 = vpack.c.bf16 %v2534_v11, %v2533_v45  ;;  %v2394_v59 = vadd.f32 %v2269_v17, %v1988_v18  ;;  %v5006_v18 = vld [vmem:[%s7454_s3 + $0x144] ss:$8 sps:$4 sm:$0xff]   ;;  %v7741_v11 = vld [vmem:[#allocation41_spill] sm:$0xff] }
 0x2e8   : > { %v2271_v25 = vpop.f32.mrf.mxu0 }
 0x2e9   : > { %v2450_v58 = vmax.f32 %v2390_v44, %v2394_v59  ;;  %v2395_v22 = vadd.f32 %v2271_v25, %v1989_v61  ;;  %4549 = vmatmul.mubr.msk.bf16.gmra.mxu1 %vm2659_vm3, %v6717_v20  ;;  %4652 = vmatmul.mubr.msk.bf16.gmra.mxu0 %vm2659_vm3, %v6717_v20  ;;  %v7743_v61 = vld [vmem:[#allocation39_spill] sm:$0xff]  ;;  %v7744_v44 = vld [vmem:[#allocation46_spill] sm:$0xff] }
 0x2ea   : > { %v2273_v28 = vpop.f32.mrf.mxu0  ;;  %2920 = vmatprep.mubr.bf16.mxu1 %v7502_v56  ;;  %3438 = vmatprep.mubr.bf16.mxu0 %v7502_v56  ;;  %v1164_v59 = vadd.f32 %v7744_v44, %v7743_v61  ;;  %v5013_v61 = vld [vmem:[%s7454_s3 + $0x110] ss:$8 sps:$4 sm:$0xff]  }
 0x2eb   : > { %v2451_v54 = vmax.f32 %v2391_v8, %v2395_v22  ;;  %v2396_v9 = vadd.f32 %v2273_v28, %v1990_v43  ;;  %v7747_v43 = vld [vmem:[#allocation42_spill] sm:$0xff]  ;;  %v6771_v22 = vpop.f32.mrf.mxu1 }
 0x2ec   : > { %v2275_v0 = vpop.f32.mrf.mxu0  ;;  %v1993_v25 = vadd.f32 %v6667_v31, %v7747_v43  ;;  %v5009_v31 = vld [vmem:[%s7454_s3 + $0x134] ss:$8 sps:$4 sm:$0xff]  }
 0x2ed   : > { %v2480_v4 = vmax.f32 %v2450_v58, %v2451_v54  ;;  %v2452_v42 = vmax.f32 %v2392_v63, %v2396_v9  ;;  %v2397_v37 = vadd.f32 %v2275_v0, %v1991_v7  ;;  %v7748_v58 = vld [vmem:[#allocation48_spill] sm:$0xff]  ;;  %v7749_v7 = vld [vmem:[#allocation95_spill] sm:$0xff]  ;;  %v7752_v0 = vld [vmem:[#allocation49_spill] sm:$0xff] }
 0x2ee   : > { %v2279_v23 = vpop.f32.mrf.mxu0  ;;  %v1997_v41 = vadd.f32 %v6701_v2, %v7748_v58  ;;  %v1589_v28 = vadd.f32 %v7749_v7, %v1164_v59  ;;  %v7750_v63 = vld [vmem:[#allocation96_spill] sm:$0xff]  ;;  %v1998_v2 = vadd.f32 %v6704_v26, %v7752_v0  ;;  %v1903_v26 = vpop.f32.mrf.mxu1  ;;  %v7758_v7 = vld [vmem:[#allocation55_spill] sm:$0xff] }
 0x2ef   : > { %v2453_v21 = vmax.f32 %v2393_v27, %v2397_v37  ;;  %v2511_v55 = vadd.f32 %v6386_v46, %v2480_v4  ;;  %v1593_v54 = vadd.f32 %v7750_v63, %v1174_v30  ;;  %v7751_v9 = vld [vmem:[#allocation44_spill] sm:$0xff] }
 0x2f0   : > { %v2281_v3 = vpop.f32.mrf.mxu0  ;;  %v1994_v62 = vadd.f32 %v6670_v52, %v7751_v9  ;;  %v5007_v52 = vld [vmem:[%s7454_s3 + $0x130] ss:$8 sps:$4 sm:$0xff]   ;;  %v5016_v9 = vld [vmem:[%s7454_s3 + $0x100] ss:$8 sps:$4 sm:$0xff]  }
 0x2f1   : > { %v2481_v35 = vmax.f32 %v2452_v42, %v2453_v21  ;;  %4567 = vmatmul.mubr.msk.bf16.vlgmr.msra.gmra.mxu1 %vm2659_vm3, %v6404_v39  ;;  %v1992_v39 = vadd.f32 %v6665_v60, %v7741_v11  ;;  %v2535_v17 = vmax.f32 %v2511_v55, 0.0  ;;  %v5004_v60 = vld [vmem:[%s7454_s3 + $0x140] ss:$8 sps:$4 sm:$0xff]   ;;  %v2399_v4 = vadd.f32 %v2281_v3, %v1993_v25  ;;  %v1905_v11 = vpop.f32.mrf.mxu1  ;;  %v7753_v30 = vld [vmem:[#allocation52_spill] sm:$0xff] }
 0x2f2   : > { %v2283_v32 = vpop.f32.mrf.mxu0  ;;  %3102 = vmatpush1.bf16.msra.mxu1 %v3096_v38  ;;  %2930 = vmatprep.mubr.bf16.mxu1 %v7502_v56  ;;  %v1999_v21 = vadd.f32 %v6715_v40, %v1593_v54  ;;  %v2000_v43 = vadd.f32 %v6733_v19, %v7753_v30  ;;  %v7754_v25 = vld [vmem:[#allocation3_spill] sm:$0xff]  ;;  %v7760_v19 = vld [vmem:[#allocation4_spill] sm:$0xff] }
 0x2f3   : > { %v2512_v53 = vadd.f32 %v6386_v46, %v2481_v35  ;;  %3103 = vmatprep.subr.bf16.mxu1 %v5003_v12  ;;  %v2398_v5 = vadd.f32 %v2279_v23, %v1992_v39  ;;  %v1995_v23 = vadd.f32 %v6681_v36, %v1589_v28  ;;  %v2400_v12 = vadd.f32 %v2283_v32, %v1994_v62  ;;  %v5010_v32 = vld [vmem:[%s7454_s3 + $0x120] ss:$8 sps:$4 sm:$0xff]   ;;  %v1907_v44 = vpop.f32.mrf.mxu1 }
 0x2f4   : > { %v2285_v45 = vpop.f32.mrf.mxu0  ;;  %v2005_v62 = vadd.f32 %v1905_v11, %v7760_v19  ;;  %v5042_v19 = vld [vmem:[%s7454_s3 + $0x1e0] ss:$8 sps:$4 sm:$0xff]  }
 0x2f5   : > { %v2536_v29 = vmax.f32 %v2512_v53, 0.0  ;;  %v2401_v40 = vadd.f32 %v2285_v45, %v1995_v23  ;;  %v1909_v0 = vpop.f32.mrf.mxu1  ;;  %v7762_v23 = vld [vmem:[#allocation102_spill] sm:$0xff] }
 0x2f6   : > { %v2289_v8 = vpop.f32.mrf.mxu0  ;;  %3104 = vmatpush1.bf16.msra.mxu1 %v5001_v51 }
 0x2f7   : > { %v6773_v13 = vpack.c.bf16 %v2536_v29, %v2535_v17  ;;  %v2402_v47 = vadd.f32 %v2289_v8, %v1996_v10  ;;  %3105 = vmatprep.subr.bf16.mxu1 %v5006_v18  ;;  %v2004_v8 = vadd.f32 %v1903_v26, %v7754_v25  ;;  %v7764_v26 = vld [vmem:[#allocation101_spill] sm:$0xff] }
 0x2f8   : > { %v2291_v27 = vpop.f32.mrf.mxu0 }
 0x2f9   : > { %v2454_v42 = vmax.f32 %v2398_v5, %v2402_v47  ;;  %v2403_v37 = vadd.f32 %v2291_v27, %v1997_v41  ;;  %4568 = vmatmul.mubr.msk.bf16.gmra.mxu1 %vm2659_vm3, %v6434_v33  ;;  %4653 = vmatmul.mubr.msk.bf16.gmra.mxu0 %vm2659_vm3, %v6773_v13  ;;  %v5012_v33 = vld [vmem:[%s7454_s3 + $0x124] ss:$8 sps:$4 sm:$0xff]   ;;  %v7756_v5 = vld [vmem:[#allocation53_spill] sm:$0xff] }
 0x2fa   : > { %v2293_v38 = vpop.f32.mrf.mxu0  ;;  %2940 = vmatprep.mubr.bf16.mxu1 %v7502_v56  ;;  %3106 = vmatpush1.bf16.msra.mxu1 %v5004_v60  ;;  %v7755_v41 = vld [vmem:[#allocation50_spill] sm:$0xff] }
 0x2fb   : > { %v2455_v3 = vmax.f32 %v2399_v4, %v2403_v37  ;;  %v2404_v55 = vadd.f32 %v2293_v38, %v1998_v2  ;;  %3448 = vmatprep.mubr.bf16.mxu0 %v7502_v56  ;;  %3107 = vmatprep.subr.bf16.mxu1 %v5009_v31  ;;  %v1184_v47 = vadd.f32 %v7756_v5, %v7755_v41  ;;  %v7757_v31 = vld [vmem:[#allocation5_spill] sm:$0xff]  ;;  %v7761_v37 = vld [vmem:[#allocation100_spill] sm:$0xff]  ;;  %v7763_v38 = vld [vmem:[#allocation99_spill] sm:$0xff] }
 0x2fc   : > { %v2295_v36 = vpop.f32.mrf.mxu0  ;;  %v1194_v28 = vadd.f32 %v7758_v7, %v7757_v31  ;;  %v5029_v41 = vld [vmem:[%s7454_s3 + $0x234] ss:$8 sps:$4 sm:$0xff]   ;;  %v5027_v5 = vld [vmem:[%s7454_s3 + $0x230] ss:$8 sps:$4 sm:$0xff]  }
 0x2fd   : > { %v2482_v35 = vmax.f32 %v2454_v42, %v2455_v3  ;;  %v2456_v51 = vmax.f32 %v2400_v12, %v2404_v55  ;;  %v2405_v53 = vadd.f32 %v2295_v36, %v1999_v21  ;;  %v5021_v42 = vld [vmem:[%s7454_s3 + $0xf4] ss:$8 sps:$4 sm:$0xff]   ;;  %v2006_v12 = vadd.f32 %v1907_v44, %v7764_v26  ;;  %v5098_v44 = vld [vmem:[%s7453_s2] ss:$0 sm:$0xff]  ;;  %v5033_v7 = vld [vmem:[%s7454_s3 + $0x210] ss:$8 sps:$4 sm:$0xff]  }
 0x2fe   : > { %v2299_v18 = vpop.f32.mrf.mxu0  ;;  %3108 = vmatpush1.bf16.msra.mxu1 %v5007_v52  ;;  %v1601_v21 = vadd.f32 %v7762_v23, %v1194_v28  ;;  %v2002_v52 = vadd.f32 %v6750_v50, %v7763_v38  ;;  %v4669_v55 = vld [vmem:[%s7454_s3 + $0x250] sm:$0xff]  ;;  %v5036_v28 = vld [vmem:[%s7454_s3 + $0x200] ss:$8 sps:$4 sm:$0xff]  }
 0x2ff   : > { %v2457_v39 = vmax.f32 %v2401_v40, %v2405_v53  ;;  %3109 = vmatprep.subr.bf16.mxu1 %v5012_v33  ;;  %v2513_v17 = vadd.f32 %v6386_v46, %v2482_v35  ;;  %v2406_v27 = vadd.f32 %v2299_v18, %v2000_v43  ;;  %v5019_v53 = vld [vmem:[%s7454_s3 + $0xf0] ss:$8 sps:$4 sm:$0xff]   ;;  %v4684_v25 = vcombine.low %v4669_v55, %v4669_v55  ;;  %v5035_v31 = vld [vmem:[%s7454_s3 + $0x214] ss:$8 sps:$4 sm:$0xff]  }
 0x300   : > { %v2301_v10 = vpop.f32.mrf.mxu0 }
 0x301   : > { %v2483_v45 = vmax.f32 %v2456_v51, %v2457_v39  ;;  %4569 = vmatmul.mubr.msk.bf16.gmra.mxu1 %vm2659_vm3, %v6490_v1  ;;  %v2537_v60 = vmax.f32 %v2513_v17, 0.0  ;;  %v2007_v51 = vadd.f32 %v1909_v0, %v1601_v21  ;;  %v4685_v39 = vcombine.high %v4669_v55, %v4669_v55 }
 0x302   : > { %v2303_v29 = vpop.f32.mrf.mxu0  ;;  %2950 = vmatprep.mubr.bf16.mxu1 %v7502_v56  ;;  %3110 = vmatpush1.bf16.msra.mxu1 %v5010_v32 }
 0x303   : > { %v2514_v59 = vadd.f32 %v6386_v46, %v2483_v45  ;;  %3111 = vmatprep.subr.bf16.mxu1 %v5015_v34  ;;  %v7759_v46 = vld [vmem:[#allocation97_spill] sm:$0xff]  ;;  %v2408_v18 = vadd.f32 %v2303_v29, %v2002_v52 }
 0x304   : > { %v2305_v6 = vpop.f32.mrf.mxu0  ;;  %v2001_v63 = vadd.f32 %v6737_v49, %v7759_v46  ;;  %v1597_v49 = vadd.f32 %v7761_v37, %v1184_v47  ;;  %v5030_v47 = vld [vmem:[%s7454_s3 + $0x220] ss:$8 sps:$4 sm:$0xff]   ;;  %v5041_v46 = vld [vmem:[%s7454_s3 + $0x1f4] ss:$8 sps:$4 sm:$0xff]  }
 0x305   : > { %v2538_v58 = vmax.f32 %v2514_v59, 0.0 }
 0x306   : > { %v2309_v54 = vpop.f32.mrf.mxu0  ;;  %3112 = vmatpush1.bf16.msra.mxu1 %v5013_v61  ;;  %v2407_v33 = vadd.f32 %v2301_v10, %v2001_v63  ;;  %v2003_v35 = vadd.f32 %v6771_v22, %v1597_v49  ;;  %v5039_v63 = vld [vmem:[%s7454_s3 + $0x1f0] ss:$8 sps:$4 sm:$0xff]  }
 0x307   : > { %v6828_v2 = vpack.c.bf16 %v2538_v58, %v2537_v60  ;;  %v2410_v4 = vadd.f32 %v2309_v54, %v2004_v8  ;;  %3113 = vmatprep.subr.bf16.mxu1 %v5018_v57  ;;  %v3586_v8 = vsel %vm2684_vm2, %v4684_v25, 0  ;;  %v5026_v60 = vld [vmem:[%s7454_s3 + $0x244] ss:$8 sps:$4 sm:$0xff]   ;;  %v5024_v58 = vld [vmem:[%s7454_s3 + $0x240] ss:$8 sps:$4 sm:$0xff]  }
 0x308   : > { %v2311_v3 = vpop.f32.mrf.mxu0  ;;  %v2409_v10 = vadd.f32 %v2305_v6, %v2003_v35  ;;  %v5051_v25 = vld [vmem:[%s7456_s5 + $0x8] sm:$0xff]  }
 0x309   : > { %v2458_v36 = vmax.f32 %v2406_v27, %v2410_v4  ;;  %v2411_v40 = vadd.f32 %v2311_v3, %v2005_v62  ;;  %4570 = vmatmul.mubr.msk.bf16.gmra.mxu1 %vm2659_vm3, %v6546_v16  ;;  %4654 = vmatmul.mubr.msk.bf16.gmra.mxu0 %vm2659_vm3, %v6828_v2 }
 0x30a   : > { %v2313_v50 = vpop.f32.mrf.mxu0  ;;  %2960 = vmatprep.mubr.bf16.mxu1 %v7502_v56  ;;  %3114 = vmatpush1.bf16.msra.mxu1 %v5016_v9  ;;  %v5044_v9 = vld [vmem:[%s7454_s3 + $0x1e4] ss:$8 sps:$4 sm:$0xff]  }
 0x30b   : > { %v2459_v32 = vmax.f32 %v2407_v33, %v2411_v40  ;;  %v2412_v11 = vadd.f32 %v2313_v50, %v2006_v12  ;;  %3115 = vmatprep.subr.bf16.mxu1 %v5021_v42 }
 0x30c   : > { %v2315_v34 = vpop.f32.mrf.mxu0 }
 0x30d   : > { %v2484_v17 = vmax.f32 %v2458_v36, %v2459_v32  ;;  %v2460_v45 = vmax.f32 %v2408_v18, %v2412_v11  ;;  %v2413_v61 = vadd.f32 %v2315_v34, %v2007_v51  ;;  %v5045_v18 = vld [vmem:[%s7456_s5 + $0x48] sm:$0xff]   ;;  %v7464_v32 = vmov 0.0  }
 0x30e   : > { %3116 = vmatpush1.bf16.msra.mxu1 %v5019_v53  ;;  %4788 = vmatprep.subr.bf16.mxu0 %v7464_v32 }
 0x30f   : > { %v2461_v22 = vmax.f32 %v2409_v10, %v2413_v61  ;;  %4686 = vmatprep.subr.msk.bf16.mxu1 %vm2684_vm2, %v4685_v39  ;;  %v2515_v59 = vadd.f32 %v5098_v44, %v2484_v17  ;;  %4789 = vmatpush3.bf16.msra.mxu0 %v5045_v18 }
 0x310   : > { %4790 = vmatprep.subr.bf16.mxu0 %v7464_v32  ;;  %4798 = vmatprep.mubr.msk.bf16.mxu0 %vm5109_vm4, %v7464_v32 }
 0x311   : > { %v2485_v57 = vmax.f32 %v2460_v45, %v2461_v22  ;;  %4571 = vmatmul.mubr.msk.bf16.gmra.mxu1 %vm2659_vm3, %v6581_v24  ;;  %v2539_v6 = vmax.f32 %v2515_v59, 0.0  ;;  %v5047_v45 = vld [vmem:[%s7456_s5 + $0x40] sm:$0xff]   ;;  %v5048_v22 = vld [vmem:[%s7456_s5 + $0x18] sm:$0xff]  }
 0x312   : > { %2970 = vmatprep.mubr.bf16.mxu1 %v7502_v56 }
 0x313   : > { %v2516_v29 = vadd.f32 %v5098_v44, %v2485_v57  ;;  %4791 = vmatpush3.bf16.msra.mxu0 %v5047_v45 }
 0x314   : > { %4792 = vmatprep.subr.bf16.mxu0 %v7464_v32 }
 0x315   : > { %v2540_v30 = vmax.f32 %v2516_v29, 0.0 }
 0x317   : > { %v6857_v43 = vpack.c.bf16 %v2540_v30, %v2539_v6  ;;  %v5049_v6 = vld [vmem:[%s7456_s5 + $0x10] sm:$0xff]  }
 0x319   : > { %4572 = vmatmul.mubr.msk.bf16.gmra.mxu1 %vm2659_vm3, %v6615_v48 }
 0x31a   : > { %2980 = vmatprep.mubr.bf16.mxu1 %v7502_v56 }
 0x321   : > { %4573 = vmatmul.mubr.msk.bf16.gmra.mxu1 %vm2659_vm3, %v6649_v15 }
 0x322   : > { %2990 = vmatprep.mubr.bf16.mxu1 %v7502_v56 }
 0x329   : > { %4574 = vmatmul.mubr.msk.bf16.gmra.mxu1 %vm2659_vm3, %v6683_v14 }
 0x32a   : > { %3133 = vmatprep.mubr.bf16.mxu1 %v7502_v56 }
 0x331   : > { %4607 = vmatmul.mubr.msk.bf16.vlgmr.msra.gmra.mxu1 %vm2659_vm3, %v6490_v1  ;;  %v5032_v1 = vld [vmem:[%s7454_s3 + $0x224] ss:$8 sps:$4 sm:$0xff]  }
 0x332   : > { %3592 = vmatpush1.bf16.msra.mxu1 %v3586_v8  ;;  %3143 = vmatprep.mubr.bf16.mxu1 %v7502_v56 }
 0x333   : > { %3593 = vmatprep.subr.bf16.mxu1 %v5026_v60 }
 0x336   : > { %3594 = vmatpush1.bf16.msra.mxu1 %v5024_v58  ;;  %v5052_v58 = vld [vmem:[%s7456_s5] sm:$0xff]  }
 0x337   : > { %3595 = vmatprep.subr.bf16.mxu1 %v5029_v41 }
 0x339   : > { %4608 = vmatmul.mubr.msk.bf16.gmra.mxu1 %vm2659_vm3, %v6546_v16  ;;  %v5038_v16 = vld [vmem:[%s7454_s3 + $0x204] ss:$8 sps:$4 sm:$0xff]   ;;  %v6914_v54 = vpop.f32.mrf.mxu1 }
 0x33a   : > { %3153 = vmatprep.mubr.bf16.mxu1 %v7502_v56  ;;  %3596 = vmatpush1.bf16.msra.mxu1 %v5027_v5  ;;  %v5050_v5 = vld [vmem:[%s7456_s5 + $0x38] sm:$0xff]  }
 0x33b   : > { %3597 = vmatprep.subr.bf16.mxu1 %v5032_v1  ;;  %v6925_v62 = vpop.f32.mrf.mxu1  ;;  %4793 = vmatpush3.bf16.msra.mxu0 %v5050_v5 }
 0x33c   : > { %4794 = vmatprep.subr.bf16.mxu0 %v7464_v32 }
 0x33d   : > { %v6927_v0 = vpop.f32.mrf.mxu1 }
 0x33e   : > { %3598 = vmatpush1.bf16.msra.mxu1 %v5030_v47 }
 0x33f   : > { %3599 = vmatprep.subr.bf16.mxu1 %v5035_v31  ;;  %v6932_v27 = vpop.f32.mrf.mxu1 }
 0x341   : > { %4609 = vmatmul.mubr.msk.bf16.gmra.mxu1 %vm2659_vm3, %v6581_v24 }
 0x342   : > { %3163 = vmatprep.mubr.bf16.mxu1 %v7502_v56  ;;  %3600 = vmatpush1.bf16.msra.mxu1 %v5033_v7 }
 0x343   : > { %3601 = vmatprep.subr.bf16.mxu1 %v5038_v16 }
 0x346   : > { %3602 = vmatpush1.bf16.msra.mxu1 %v5036_v28  ;;  %v5053_v28 = vld [vmem:[%s7456_s5 + $0x30] sm:$0xff]  }
 0x347   : > { %3603 = vmatprep.subr.bf16.mxu1 %v5041_v46  ;;  %4795 = vmatpush3.bf16.msra.mxu0 %v5053_v28 }
 0x348   : > { %4796 = vmatprep.subr.bf16.mxu0 %v7464_v32 }
 0x349   : > { %4610 = vmatmul.mubr.msk.bf16.gmra.mxu1 %vm2659_vm3, %v6615_v48  ;;  %v6934_v4 = vpop.f32.mrf.mxu1 }
 0x34a   : > { %3173 = vmatprep.mubr.bf16.mxu1 %v7502_v56  ;;  %3604 = vmatpush1.bf16.msra.mxu1 %v5039_v63 }
 0x34b   : > { %3605 = vmatprep.subr.bf16.mxu1 %v5044_v9  ;;  %v6936_v42 = vpop.f32.mrf.mxu1  ;;  %v5054_v9 = vld [vmem:[%s7456_s5 + $0x28] sm:$0xff]  }
 0x34c   : > { %4797 = vmatpush3.bf16.msra.mxu0 %v5054_v9 }
 0x34d   : > { %v6941_v37 = vpop.f32.mrf.mxu1  ;;  %4816 = vmatprep.subr.bf16.mxu0 %v7464_v32 }
 0x34e   : > { %3606 = vmatpush1.bf16.msra.mxu1 %v5042_v19 }
 0x34f   : > { %v6943_v49 = vpop.f32.mrf.mxu1  ;;  %4802 = vmatprep.subr.bf16.mxu1 %v7464_v32 }
 0x350   : > { %7765 = vst [vmem:[#allocation54_spill] sm:$0xff] %v6943_v49 }
 0x351   : > { %4611 = vmatmul.mubr.msk.bf16.gmra.mxu1 %vm2659_vm3, %v6649_v15 }
 0x352   : > { %3183 = vmatprep.mubr.bf16.mxu1 %v7502_v56 }
 0x359   : > { %4612 = vmatmul.mubr.msk.bf16.gmra.mxu1 %vm2659_vm3, %v6683_v14  ;;  %v6948_v23 = vpop.f32.mrf.mxu1 }
 0x35a   : > { %3193 = vmatprep.mubr.bf16.mxu1 %v7502_v56 }
 0x35b   : > { %v6950_v21 = vpop.f32.mrf.mxu1 }
 0x35d   : > { %v6955_v38 = vpop.f32.mrf.mxu1 }
 0x35f   : > { %v6957_v52 = vpop.f32.mrf.mxu1 }
 0x361   : > { %4613 = vmatmul.mubr.msk.bf16.gmra.mxu1 %vm2659_vm3, %v6717_v20 }
 0x362   : > { %3203 = vmatprep.mubr.bf16.mxu1 %v7502_v56 }
 0x369   : > { %4614 = vmatmul.mubr.msk.bf16.gmra.mxu1 %vm2659_vm3, %v6773_v13  ;;  %v6959_v26 = vpop.f32.mrf.mxu1 }
 0x36a   : > { %3623 = vmatprep.mubr.bf16.mxu1 %v7502_v56 }
 0x36b   : > { %v6964_v12 = vpop.f32.mrf.mxu1 }
 0x36d   : > { %v6966_v3 = vpop.f32.mrf.mxu1 }
 0x36e   : > { %7766 = vst [vmem:[#allocation56_spill] sm:$0xff] %v6966_v3 }
 0x36f   : > { %v6971_v55 = vpop.f32.mrf.mxu1 }
 0x370   : > { %7767 = vst [vmem:[#allocation57_spill] sm:$0xff] %v6971_v55 }
 0x371   : > { %4687 = vmatmul.mubr.msk.bf16.vlgmr.msra.gmra.mxu1 %vm2659_vm3, %v6581_v24 }
 0x372   : > { %3633 = vmatprep.mubr.bf16.mxu1 %v7502_v56 }
 0x379   : > { %4688 = vmatmul.mubr.msk.bf16.gmra.mxu1 %vm2659_vm3, %v6615_v48  ;;  %v6973_v33 = vpop.f32.mrf.mxu1 }
 0x37a   : > { %3643 = vmatprep.mubr.bf16.mxu1 %v7502_v56 }
 0x37b   : > { %v6978_v24 = vpop.f32.mrf.mxu1 }
 0x37d   : > { %v6980_v36 = vpop.f32.mrf.mxu1 }
 0x37f   : > { %v6985_v48 = vpop.f32.mrf.mxu1 }
 0x381   : > { %4689 = vmatmul.mubr.msk.bf16.gmra.mxu1 %vm2659_vm3, %v6649_v15 }
 0x382   : > { %3653 = vmatprep.mubr.bf16.mxu1 %v7502_v56 }
 0x389   : > { %4690 = vmatmul.mubr.msk.bf16.gmra.mxu1 %vm2659_vm3, %v6683_v14  ;;  %v6987_v40 = vpop.f32.mrf.mxu1 }
 0x38a   : > { %3663 = vmatprep.mubr.bf16.mxu1 %v7502_v56 }
 0x38b   : > { %v6989_v35 = vpop.f32.mrf.mxu1 }
 0x38d   : > { %v6994_v15 = vpop.f32.mrf.mxu1 }
 0x38f   : > { %v6996_v51 = vpop.f32.mrf.mxu1 }
 0x391   : > { %4691 = vmatmul.mubr.msk.bf16.gmra.mxu1 %vm2659_vm3, %v6717_v20 }
 0x392   : > { %3673 = vmatprep.mubr.bf16.mxu1 %v7502_v56 }
 0x399   : > { %4692 = vmatmul.mubr.msk.bf16.gmra.mxu1 %vm2659_vm3, %v6773_v13  ;;  %v7001_v14 = vpop.f32.mrf.mxu1 }
 0x39a   : > { %3683 = vmatprep.mubr.bf16.mxu1 %v7502_v56 }
 0x39b   : > { %v7003_v50 = vpop.f32.mrf.mxu1 }
 0x39d   : > { %v7008_v20 = vpop.f32.mrf.mxu1 }
 0x39f   : > { %v7010_v53 = vpop.f32.mrf.mxu1 }
 0x3a1   : > { %4693 = vmatmul.mubr.msk.bf16.gmra.mxu1 %vm2659_vm3, %v6828_v2 }
 0x3a2   : > { %3693 = vmatprep.mubr.bf16.mxu1 %v7502_v56  ;;  %v5046_v56 = vld [vmem:[%s7456_s5 + $0x20] sm:$0xff]  }
 0x3a3   : > { %4803 = vmatpush3.bf16.msra.mxu1 %v5046_v56 }
 0x3a4   : > { %4804 = vmatprep.subr.bf16.mxu1 %v7464_v32 }
 0x3a7   : > { %4805 = vmatpush3.bf16.msra.mxu1 %v5048_v22 }
 0x3a8   : > { %4806 = vmatprep.subr.bf16.mxu1 %v7464_v32 }
 0x3a9   : > { %v7015_v13 = vpop.f32.mrf.mxu1  ;;  %4694 = vmatmul.mubr.msk.bf16.gmra.mxu1 %vm2659_vm3, %v6857_v43 }
 0x3aa   : > { %4812 = vmatprep.mubr.msk.bf16.mxu1 %vm5109_vm4, %v7464_v32 }
 0x3ab   : > { %v7024_v2 = vpop.f32.mrf.mxu1  ;;  %4807 = vmatpush3.bf16.msra.mxu1 %v5049_v6 }
 0x3ac   : > { %4808 = vmatprep.subr.bf16.mxu1 %v7464_v32 }
 0x3ad   : > { %v7027_v11 = vpop.f32.mrf.mxu1 }
 0x3af   : > { %v7030_v39 = vpop.f32.mrf.mxu1  ;;  %4809 = vmatpush3.bf16.msra.mxu1 %v5051_v25 }
 0x3b0   : > { %4810 = vmatprep.subr.bf16.mxu1 %v7464_v32 }
 0x3b1   : > { %v7032_v34 = vpop.f32.mrf.mxu1 }
 0x3b3   : > { %v7034_v10 = vpop.f32.mrf.mxu1  ;;  %4811 = vmatpush3.bf16.msra.mxu1 %v5052_v58 }
 0x3b4   : > { %4830 = vmatprep.subr.bf16.mxu1 %v7464_v32 }
 0x3b5   : > { %v7036_v17 = vpop.f32.mrf.mxu1 }
 0x3b7   : > { %v7041_v61 = vpop.f32.mrf.mxu1 }
 0x3b9   : > { %v7046_v44 = vpop.f32.mrf.mxu1 }
 0x3bb   : > { %v7049_v59 = vpop.f32.mrf.mxu1 }
 0x3bd   : > { %v7052_v57 = vpop.f32.mrf.mxu1 }
 0x3bf   : > { %v7054_v29 = vpop.f32.mrf.mxu1 }
 0x3c0   : > { %7768 = vst [vmem:[#allocation58_spill] sm:$0xff] %v7054_v29  ;;  %v2923_v29 = vadd.f32 %v7032_v34, %v6914_v54 }
 0x3c1   : > { %v7059_v30 = vpop.f32.mrf.mxu1 }
 0x3c3   : > { %v7061_v43 = vpop.f32.mrf.mxu1 }
 0x3c5   : > { %v7067_v8 = vpop.f32.mrf.mxu1 }
 0x3c7   : > { %v7069_v60 = vpop.f32.mrf.mxu1 }
 0x3c9   : > { %v7075_v41 = vpop.f32.mrf.mxu1 }
 0x3cb   : > { %v7080_v1 = vpop.f32.mrf.mxu1 }
 0x3cd   : > { %v7085_v47 = vpop.f32.mrf.mxu1 }
 0x3ce   : > { %7769 = vst [vmem:[#allocation61_spill] sm:$0xff] %v7085_v47 }
 0x3cf   : > { %v7090_v31 = vpop.f32.mrf.mxu1 }
 0x3d0   : > { %7770 = vst [vmem:[#allocation59_spill] sm:$0xff] %v7090_v31 }
 0x3d1   : > { %v7092_v7 = vpop.f32.mrf.mxu1 }
 0x3d3   : > { %v7094_v16 = vpop.f32.mrf.mxu1 }
 0x3d5   : > { %v7099_v46 = vpop.f32.mrf.mxu1 }
 0x3d7   : > { %v7102_v63 = vpop.f32.mrf.mxu1 }
 0x3d9   : > { %v7107_v19 = vpop.f32.mrf.mxu1 }
 0x3db   : > { %v7110_v18 = vpop.f32.mrf.mxu1 }
 0x3dd   : > { %v7112_v56 = vpop.f32.mrf.mxu1 }
 0x3df   : > { %v7114_v45 = vpop.f32.mrf.mxu1 }
 0x3e1   : > { %v7116_v22 = vpop.f32.mrf.mxu1 }
 0x3e3   : > { %v7118_v6 = vpop.f32.mrf.mxu1 }
 0x3e5   : > { %v7120_v25 = vpop.f32.mrf.mxu1 }
 0x3e7   : > { %v2988_v58 = vpop.f32.mrf.mxu1 }
 0x3e8   : > { %v7123_v5 = vadd.f32 %v2988_v58, %v7010_v53 }
 0x3e9   : > { %v2992_v28 = vpop.f32.mrf.mxu1 }
 0x3ea   : > { %v7126_v9 = vadd.f32 %v2992_v28, %v7015_v13  ;;  %v2925_v13 = vadd.f32 %v7034_v10, %v6925_v62  ;;  %v2935_v10 = vadd.f32 %v7049_v59, %v6936_v42 }
 0x3eb   : > { %v2994_v32 = vpop.f32.mrf.mxu1 }
 0x3ec   : > { %v7129_v31 = vadd.f32 %v2994_v32, %v7024_v2  ;;  %v2927_v32 = vadd.f32 %v7036_v17, %v6927_v0 }
 0x3ed   : > { %v2996_v55 = vpop.f32.mrf.mxu1 }
 0x3ee   : > { %v7132_v47 = vadd.f32 %v2996_v55, %v7027_v11  ;;  %v2929_v11 = vadd.f32 %v7041_v61, %v6932_v27  ;;  %v7163_v27 = vpop.f32.mrf.mxu0 }
 0x3ef   : > { %v2998_v3 = vpop.f32.mrf.mxu1 }
 0x3f0   : > { %v7137_v49 = vadd.f32 %v2998_v3, %v7030_v39  ;;  %v2933_v39 = vadd.f32 %v7046_v44, %v6934_v4  ;;  %v2943_v4 = vadd.f32 %v7059_v30, %v6948_v23  ;;  %v7173_v42 = vpop.f32.mrf.mxu0 }
 0x3f1   : > { %v3135_v53 = vpop.f32.mrf.mxu1 }
 0x3f2   : > { %7771 = vst [vmem:[#allocation60_spill] sm:$0xff] %v7137_v49  ;;  %v7141_v58 = vadd.f32 %v3135_v53, %v2923_v29  ;;  %v7183_v23 = vpop.f32.mrf.mxu0 }
 0x3f3   : > { %v3137_v28 = vpop.f32.mrf.mxu1 }
 0x3f4   : > { %v7145_v2 = vadd.f32 %v3137_v28, %v2925_v13  ;;  %v2945_v13 = vadd.f32 %v7061_v43, %v6950_v21  ;;  %v2953_v21 = vadd.f32 %v7075_v41, %v6959_v26  ;;  %v2963_v26 = vadd.f32 %v7092_v7, %v6973_v33 }
 0x3f5   : > { %v3139_v55 = vpop.f32.mrf.mxu1  ;;  %v2969_v33 = vadd.f32 %v7102_v63, %v6985_v48  ;;  %v2977_v48 = vadd.f32 %v7112_v56, %v6994_v15  ;;  %v2985_v15 = vadd.f32 %v7118_v6, %v7003_v50 }
 0x3f6   : > { %v7149_v54 = vadd.f32 %v3139_v55, %v2927_v32  ;;  %v2947_v32 = vadd.f32 %v7067_v8, %v6955_v38  ;;  %v2955_v38 = vadd.f32 %v7080_v1, %v6964_v12  ;;  %v2965_v12 = vadd.f32 %v7094_v16, %v6978_v24 }
 0x3f7   : > { %v3141_v3 = vpop.f32.mrf.mxu1  ;;  %v2973_v24 = vadd.f32 %v7107_v19, %v6987_v40  ;;  %v2979_v40 = vadd.f32 %v7114_v45, %v6996_v51  ;;  %v2987_v51 = vadd.f32 %v7120_v25, %v7008_v20 }
 0x3f8   : > { %v7153_v34 = vadd.f32 %v3141_v3, %v2929_v11  ;;  %v2949_v3 = vadd.f32 %v7069_v60, %v6957_v52 }
 0x3f9   : > { %v3145_v62 = vpop.f32.mrf.mxu1 }
 0x3fa   : > { %v7157_v29 = vadd.f32 %v3145_v62, %v2933_v39 }
 0x3fb   : > { %v3147_v0 = vpop.f32.mrf.mxu1 }
 0x3fc   : > { %v7159_v17 = vadd.f32 %v3147_v0, %v2935_v10  ;;  %v7193_v10 = vpop.f32.mrf.mxu0 }
 0x3fd   : > { %v7161_v53 = vpop.f32.mrf.mxu1 }
 0x3fe   : > { %v7197_v60 = vpop.f32.mrf.mxu0 }
 0x3ff   : > { %v7165_v61 = vpop.f32.mrf.mxu1 }
 0x400   : > { %v7205_v41 = vpop.f32.mrf.mxu0 }
 0x401   : > { %v3155_v44 = vpop.f32.mrf.mxu1  ;;  %v3464_v49 = vadd.f32 %v7205_v41, %v7159_v17 }
 0x402   : > { %v7171_v28 = vadd.f32 %v3155_v44, %v2943_v4 }
 0x403   : > { %v3157_v59 = vpop.f32.mrf.mxu1 }
 0x404   : > { %v7177_v55 = vadd.f32 %v3157_v59, %v2945_v13 }
 0x405   : > { %v3159_v11 = vpop.f32.mrf.mxu1 }
 0x406   : > { %v7181_v39 = vadd.f32 %v3159_v11, %v2947_v32  ;;  %v2967_v32 = vadd.f32 %v7099_v46, %v6980_v36  ;;  %v2975_v36 = vadd.f32 %v7110_v18, %v6989_v35  ;;  %v2983_v35 = vadd.f32 %v7116_v22, %v7001_v14 }
 0x407   : > { %v3161_v30 = vpop.f32.mrf.mxu1 }
 0x408   : > { %v7187_v43 = vadd.f32 %v3161_v30, %v2949_v3  ;;  %v7215_v3 = vpop.f32.mrf.mxu0 }
 0x409   : > { %v3165_v62 = vpop.f32.mrf.mxu1 }
 0x40a   : > { %v7191_v8 = vadd.f32 %v3165_v62, %v2953_v21  ;;  %v7225_v62 = vpop.f32.mrf.mxu0 }
 0x40b   : > { %v3167_v0 = vpop.f32.mrf.mxu1 }
 0x40c   : > { %v7195_v52 = vadd.f32 %v3167_v0, %v2955_v38  ;;  %v7231_v0 = vpop.f32.mrf.mxu0 }
 0x40d   : > { %v7199_v4 = vpop.f32.mrf.mxu1 }
 0x40f   : > { %v7201_v44 = vpop.f32.mrf.mxu1 }
 0x411   : > { %v3175_v13 = vpop.f32.mrf.mxu1 }
 0x412   : > { %v7209_v1 = vadd.f32 %v3175_v13, %v2963_v26 }
 0x413   : > { %v3177_v59 = vpop.f32.mrf.mxu1 }
 0x414   : > { %v7213_v11 = vadd.f32 %v3177_v59, %v2965_v12  ;;  %v7241_v12 = vpop.f32.mrf.mxu0 }
 0x415   : > { %v3179_v30 = vpop.f32.mrf.mxu1 }
 0x416   : > { %v7219_v7 = vadd.f32 %v3179_v30, %v2967_v32  ;;  %v7251_v30 = vpop.f32.mrf.mxu0 }
 0x417   : > { %v3181_v21 = vpop.f32.mrf.mxu1 }
 0x418   : > { %v7223_v16 = vadd.f32 %v3181_v21, %v2969_v33  ;;  %v7259_v14 = vpop.f32.mrf.mxu0 }
 0x419   : > { %v3185_v38 = vpop.f32.mrf.mxu1 }
 0x41a   : > { %v7229_v46 = vadd.f32 %v3185_v38, %v2973_v24  ;;  %v3410_v50 = vpop.f32.mrf.mxu0 }
 0x41b   : > { %v3187_v26 = vpop.f32.mrf.mxu1 }
 0x41c   : > { %v7235_v63 = vadd.f32 %v3187_v26, %v2975_v36  ;;  %v3412_v20 = vpop.f32.mrf.mxu0 }
 0x41d   : > { %v3189_v13 = vpop.f32.mrf.mxu1 }
 0x41e   : > { %v7239_v19 = vadd.f32 %v3189_v13, %v2977_v48 }
 0x41f   : > { %v3191_v59 = vpop.f32.mrf.mxu1 }
 0x420   : > { %v7245_v18 = vadd.f32 %v3191_v59, %v2979_v40  ;;  %v7274_v40 = vpop.f32.mrf.mxu0 }
 0x421   : > { %v3195_v32 = vpop.f32.mrf.mxu1 }
 0x422   : > { %v7249_v56 = vadd.f32 %v3195_v32, %v2983_v35 }
 0x423   : > { %v3197_v33 = vpop.f32.mrf.mxu1 }
 0x424   : > { %v7255_v45 = vadd.f32 %v3197_v33, %v2985_v15 }
 0x425   : > { %v3199_v21 = vpop.f32.mrf.mxu1 }
 0x426   : > { %v7257_v24 = vadd.f32 %v3199_v21, %v2987_v51  ;;  %v7776_v51 = vld [vmem:[#allocation58_spill] sm:$0xff] }
 0x427   : > { %v3201_v22 = vpop.f32.mrf.mxu1 }
 0x428   : > { %7772 = vst [vmem:[#allocation62_spill] sm:$0xff] %v7257_v24  ;;  %v7262_v38 = vadd.f32 %v3201_v22, %v7123_v5  ;;  %v7276_v5 = vpop.f32.mrf.mxu0 }
 0x429   : > { %v3205_v6 = vpop.f32.mrf.mxu1 }
 0x42a   : > { %7773 = vst [vmem:[#allocation63_spill] sm:$0xff] %v7262_v38  ;;  %v7265_v36 = vadd.f32 %v3205_v6, %v7126_v9  ;;  %v2937_v9 = vadd.f32 %v7052_v57, %v6941_v37  ;;  %v7280_v15 = vpop.f32.mrf.mxu0  ;;  %v3459_v6 = vadd.f32 %v7163_v27, %v7141_v58  ;;  %v3460_v38 = vadd.f32 %v7173_v42, %v7145_v2 }
 0x42b   : > { %v3207_v26 = vpop.f32.mrf.mxu1  ;;  %v3462_v2 = vadd.f32 %v7193_v10, %v7153_v34 }
 0x42c   : > { %v7268_v48 = vadd.f32 %v3207_v26, %v7129_v31  ;;  %v7775_v31 = vld [vmem:[#allocation54_spill] sm:$0xff]  ;;  %v3220_v22 = vadd.f32 %v7161_v53, %v2937_v9  ;;  %v3463_v26 = vadd.f32 %v7197_v60, %v7157_v29  ;;  %v3461_v53 = vadd.f32 %v7183_v23, %v7149_v54 }
 0x42d   : > { %v7270_v25 = vpop.f32.mrf.mxu1  ;;  %v2939_v21 = vadd.f32 %v7776_v51, %v7775_v31  ;;  %v7294_v31 = vpop.f32.mrf.mxu0 }
 0x42e   : > { %v3465_v60 = vadd.f32 %v7215_v3, %v3220_v22 }
 0x42f   : > { %v7272_v13 = vpop.f32.mrf.mxu1  ;;  %v3221_v37 = vadd.f32 %v7165_v61, %v2939_v21  ;;  %v7302_v41 = vpop.f32.mrf.mxu0 }
 0x430   : > { %7774 = vst [vmem:[#allocation67_spill] sm:$0xff] %v7272_v13 }
 0x431   : > { %v3625_v59 = vpop.f32.mrf.mxu1  ;;  %v3466_v17 = vadd.f32 %v7225_v62, %v3221_v37  ;;  %v7309_v10 = vpop.f32.mrf.mxu0 }
 0x432   : > { %v3704_v57 = vadd.f32 %v3625_v59, %v3459_v6  ;;  %v7778_v6 = vld [vmem:[#allocation61_spill] sm:$0xff] }
 0x433   : > { %v3627_v35 = vpop.f32.mrf.mxu1 }
 0x434   : > { %v3705_v27 = vadd.f32 %v3627_v35, %v3460_v38 }
 0x435   : > { %v3629_v32 = vpop.f32.mrf.mxu1 }
 0x436   : > { %v3706_v42 = vadd.f32 %v3629_v32, %v3461_v53  ;;  %v7312_v32 = vpop.f32.mrf.mxu0  ;;  %v7780_v53 = vld [vmem:[#allocation59_spill] sm:$0xff] }
 0x437   : > { %v3631_v33 = vpop.f32.mrf.mxu1 }
 0x438   : > { %v3707_v21 = vadd.f32 %v3631_v33, %v3462_v2  ;;  %v7777_v33 = vld [vmem:[#allocation56_spill] sm:$0xff] }
 0x439   : > { %v3635_v24 = vpop.f32.mrf.mxu1 }
 0x43a   : > { %v3708_v13 = vadd.f32 %v3635_v24, %v3463_v26  ;;  %v2957_v26 = vadd.f32 %v7778_v6, %v7777_v33 }
 0x43b   : > { %v3637_v58 = vpop.f32.mrf.mxu1 }
 0x43c   : > { %v3736_v9 = vmax.f32 %v3704_v57, %v3708_v13  ;;  %v3709_v29 = vadd.f32 %v3637_v58, %v3464_v49  ;;  %v7307_v49 = vld [vmem:[%s7455_s4] ss:$0 sm:$0xff]  ;;  %v7779_v57 = vld [vmem:[#allocation57_spill] sm:$0xff] }
 0x43d   : > { %v3639_v61 = vpop.f32.mrf.mxu1  ;;  %v2959_v58 = vadd.f32 %v7780_v53, %v7779_v57 }
 0x43e   : > { %v3737_v24 = vmax.f32 %v3705_v27, %v3709_v29  ;;  %v3710_v59 = vadd.f32 %v3639_v61, %v3465_v60  ;;  %v3467_v27 = vadd.f32 %v7231_v0, %v7171_v28  ;;  %v3228_v29 = vadd.f32 %v7199_v4, %v2957_v26  ;;  %v5062_v26 = vld [vmem:[%s7456_s5 + $0x88] sm:$0xff]  }
 0x43f   : > { %v3641_v51 = vpop.f32.mrf.mxu1  ;;  %v3471_v61 = vadd.f32 %v3410_v50, %v7191_v8  ;;  %v3229_v28 = vadd.f32 %v7201_v44, %v2959_v58  ;;  %v3469_v8 = vadd.f32 %v7251_v30, %v7181_v39  ;;  %v5061_v44 = vld [vmem:[%s7456_s5 + $0x90] sm:$0xff]  }
 0x440   : > { %v3752_v54 = vmax.f32 %v3736_v9, %v3737_v24  ;;  %v3738_v23 = vmax.f32 %v3706_v42, %v3710_v59  ;;  %v3711_v38 = vadd.f32 %v3641_v51, %v3466_v17  ;;  %v3432_v42 = vpop.f32.mrf.mxu0  ;;  %v3468_v24 = vadd.f32 %v7241_v12, %v7177_v55  ;;  %v5059_v51 = vld [vmem:[%s7456_s5 + $0x98] sm:$0xff]  }
 0x441   : > { %v3645_v3 = vpop.f32.mrf.mxu1  ;;  %v3472_v17 = vadd.f32 %v3412_v20, %v7195_v52  ;;  %v3473_v52 = vadd.f32 %v7274_v40, %v3228_v29  ;;  %v3470_v20 = vadd.f32 %v7259_v14, %v7187_v43 }
 0x442   : > { %v3739_v34 = vmax.f32 %v3707_v21, %v3711_v38  ;;  %v3767_v35 = vadd.f32 %v7307_v49, %v3752_v54  ;;  %v3712_v4 = vadd.f32 %v3645_v3, %v3467_v27  ;;  %v3434_v12 = vpop.f32.mrf.mxu0  ;;  %v7781_v3 = vmov 0.0   ;;  %v5063_v27 = vld [vmem:[%s7456_s5 + $0x80] sm:$0xff]  }
 0x443   : > { %v3647_v13 = vpop.f32.mrf.mxu1 }
 0x444   : > { %v3753_v62 = vmax.f32 %v3738_v23, %v3739_v34  ;;  %v3775_v60 = vmax.f32 %v3767_v35, 0.0  ;;  %v3713_v54 = vadd.f32 %v3647_v13, %v3468_v24  ;;  %v3474_v13 = vadd.f32 %v7276_v5, %v3229_v28  ;;  %v3436_v33 = vpop.f32.mrf.mxu0  ;;  %v5055_v28 = vld [vmem:[%s7456_s5 + $0x70] sm:$0xff]  }
 0x445   : > { %v3649_v22 = vpop.f32.mrf.mxu1  ;;  %v3475_v24 = vadd.f32 %v7280_v15, %v7209_v1  ;;  %v5064_v1 = vld [vmem:[%s7456_s5 + $0x78] sm:$0xff]  }
 0x446   : > { %v3768_v37 = vadd.f32 %v7307_v49, %v3753_v62  ;;  %v3714_v39 = vadd.f32 %v3649_v22, %v3469_v8  ;;  %v7347_v22 = vpop.f32.mrf.mxu0  ;;  %v3480_v8 = vadd.f32 %v3432_v42, %v7235_v63  ;;  %v3478_v63 = vadd.f32 %v7309_v10, %v7223_v16 }
 0x447   : > { %v3651_v9 = vpop.f32.mrf.mxu1 }
 0x448   : > { %v3776_v2 = vmax.f32 %v3768_v37, 0.0  ;;  %v3715_v35 = vadd.f32 %v3651_v9, %v3470_v20  ;;  %v7355_v29 = vpop.f32.mrf.mxu0 }
 0x449   : > { %v3655_v59 = vpop.f32.mrf.mxu1 }
 0x44a   : > { %v3783_v0 = vpack.c.bf16 %v3776_v2, %v3775_v60  ;;  %v3716_v21 = vadd.f32 %v3655_v59, %v3471_v61  ;;  %v3479_v59 = vadd.f32 %v7312_v32, %v7229_v46  ;;  %v3444_v46 = vpop.f32.mrf.mxu0 }
 0x44b   : > { %v3657_v50 = vpop.f32.mrf.mxu1 }
 0x44c   : > { %v3740_v23 = vmax.f32 %v3712_v4, %v3716_v21  ;;  %v3717_v55 = vadd.f32 %v3657_v50, %v3472_v17  ;;  %4813 = vmatmul.mubr.msk.bf16.vlgmr.msra.gmra.mxu1 %vm3838_vm5, %v3783_v0  ;;  %v3476_v17 = vadd.f32 %v7294_v31, %v7213_v11  ;;  %v3477_v11 = vadd.f32 %v7302_v41, %v7219_v7 }
 0x44d   : > { %v3659_v38 = vpop.f32.mrf.mxu1  ;;  %4831 = vmatpush3.bf16.msra.mxu1 %v5059_v51  ;;  %4840 = vmatprep.mubr.msk.bf16.mxu1 %vm5109_vm4, %v7781_v3 }
 0x44e   : > { %v3741_v30 = vmax.f32 %v3713_v54, %v3717_v55  ;;  %v3718_v34 = vadd.f32 %v3659_v38, %v3473_v52  ;;  %4832 = vmatprep.subr.bf16.mxu1 %v7781_v3  ;;  %v3481_v54 = vadd.f32 %v3434_v12, %v7239_v19  ;;  %v5056_v55 = vld [vmem:[%s7456_s5 + $0x68] sm:$0xff]   ;;  %v3446_v19 = vpop.f32.mrf.mxu0 }
 0x44f   : > { %v3661_v40 = vpop.f32.mrf.mxu1 }
 0x450   : > { %v3754_v62 = vmax.f32 %v3740_v23, %v3741_v30  ;;  %v3742_v43 = vmax.f32 %v3714_v39, %v3718_v34  ;;  %v3719_v14 = vadd.f32 %v3661_v40, %v3474_v13  ;;  %v3482_v23 = vadd.f32 %v3436_v33, %v7245_v18  ;;  %v3450_v18 = vpop.f32.mrf.mxu0  ;;  %v5057_v39 = vld [vmem:[%s7456_s5 + $0x60] sm:$0xff]  }
 0x451   : > { %v3665_v6 = vpop.f32.mrf.mxu1  ;;  %4833 = vmatpush3.bf16.msra.mxu1 %v5061_v44  ;;  %v3483_v33 = vadd.f32 %v7347_v22, %v7249_v56  ;;  %v5060_v56 = vld [vmem:[%s7456_s5 + $0x50] sm:$0xff]  }
 0x452   : > { %v3743_v37 = vmax.f32 %v3715_v35, %v3719_v14  ;;  %4834 = vmatprep.subr.bf16.mxu1 %v7781_v3  ;;  %v3769_v57 = vadd.f32 %v7307_v49, %v3754_v62  ;;  %v3720_v4 = vadd.f32 %v3665_v6, %v3475_v24  ;;  %v3452_v35 = vpop.f32.mrf.mxu0  ;;  %v7782_v22 = vld [vmem:[#allocation60_spill] sm:$0xff] }
 0x453   : > { %v3667_v5 = vpop.f32.mrf.mxu1 }
 0x454   : > { %v3755_v53 = vmax.f32 %v3742_v43, %v3743_v37  ;;  %v3777_v2 = vmax.f32 %v3769_v57, 0.0  ;;  %v3721_v31 = vadd.f32 %v3667_v5, %v3476_v17  ;;  %v5058_v43 = vld [vmem:[%s7456_s5 + $0x58] sm:$0xff]   ;;  %v3487_v57 = vadd.f32 %v3450_v18, %v7265_v36  ;;  %v7784_v36 = vld [vmem:[#allocation62_spill] sm:$0xff] }
 0x455   : > { %v3669_v58 = vpop.f32.mrf.mxu1  ;;  %4835 = vmatpush3.bf16.msra.mxu1 %v5062_v26  ;;  %v3244_v26 = vadd.f32 %v7270_v25, %v7132_v47  ;;  %v3485_v24 = vadd.f32 %v3444_v46, %v7784_v36 }
 0x456   : > { %v3770_v9 = vadd.f32 %v7307_v49, %v3755_v53  ;;  %4836 = vmatprep.subr.bf16.mxu1 %v7781_v3  ;;  %v3722_v7 = vadd.f32 %v3669_v58, %v3477_v11  ;;  %v3454_v53 = vpop.f32.mrf.mxu0  ;;  %v3484_v58 = vadd.f32 %v7355_v29, %v7255_v45 }
 0x457   : > { %v3671_v60 = vpop.f32.mrf.mxu1 }
 0x458   : > { %v3778_v61 = vmax.f32 %v3770_v9, 0.0  ;;  %v3723_v16 = vadd.f32 %v3671_v60, %v3478_v63  ;;  %v3488_v9 = vadd.f32 %v3452_v35, %v7268_v48  ;;  %v7783_v60 = vld [vmem:[#allocation67_spill] sm:$0xff]  ;;  %v3456_v48 = vpop.f32.mrf.mxu0 }
 0x459   : > { %v3675_v51 = vpop.f32.mrf.mxu1  ;;  %4837 = vmatpush3.bf16.msra.mxu1 %v5063_v27 }
 0x45a   : > { %v3784_v0 = vpack.c.bf16 %v3778_v61, %v3777_v2  ;;  %v3724_v21 = vadd.f32 %v3675_v51, %v3479_v59  ;;  %4838 = vmatprep.subr.bf16.mxu1 %v7781_v3  ;;  %v3245_v2 = vadd.f32 %v7783_v60, %v7782_v22  ;;  %v3489_v51 = vadd.f32 %v3454_v53, %v3244_v26  ;;  %v4750_v26 = vld [vmem:[%s7457_s6] ss:$0 sm:$0xff] }
 0x45b   : > { %v3677_v15 = vpop.f32.mrf.mxu1 }
 0x45c   : > { %v3744_v32 = vmax.f32 %v3720_v4, %v3724_v21  ;;  %v3725_v50 = vadd.f32 %v3677_v15, %v3480_v8  ;;  %4799 = vmatmul.mubr.msk.bf16.vlgmr.msra.gmra.mxu0 %vm3838_vm5, %v3784_v0  ;;  %v3490_v11 = vadd.f32 %v3456_v48, %v3245_v2  ;;  %v4751_v2 = vld [vmem:[%s7459_s8] ss:$0 sm:$0xff] }
 0x45d   : > { %4817 = vmatpush3.bf16.msra.mxu0 %v5055_v28  ;;  %v3679_v42 = vpop.f32.mrf.mxu1  ;;  %4826 = vmatprep.mubr.msk.bf16.mxu0 %vm5109_vm4, %v7781_v3  ;;  %v7785_v28 = vld [vmem:[#allocation63_spill] sm:$0xff] }
 0x45e   : > { %v3745_v41 = vmax.f32 %v3721_v31, %v3725_v50  ;;  %v3726_v52 = vadd.f32 %v3679_v42, %v3481_v54  ;;  %4818 = vmatprep.subr.bf16.mxu0 %v7781_v3  ;;  %4839 = vmatpush3.bf16.msra.mxu1 %v5064_v1  ;;  %v3486_v0 = vadd.f32 %v3446_v19, %v7785_v28 }
 0x45f   : > { %v3681_v12 = vpop.f32.mrf.mxu1 }
 0x460   : > { %v3756_v10 = vmax.f32 %v3744_v32, %v3745_v41  ;;  %v3746_v20 = vmax.f32 %v3722_v7, %v3726_v52  ;;  %v3727_v38 = vadd.f32 %v3681_v12, %v3482_v23  ;;  %v5065_v52 = vld [vmem:[%s7458_s7 + $0x18] ss:$0 sps:$4 sm:$0x11]   ;;  %v5066_v12 = vld [vmem:[%s7458_s7 + $0x10] sm:$0xff]  }
 0x461   : > { %4819 = vmatpush3.bf16.msra.mxu0 %v5056_v55  ;;  %v3685_v44 = vpop.f32.mrf.mxu1  ;;  %v4184_v19 = vsel %vm4182_vm6, %v5065_v52, 0 }
 0x462   : > { %v3747_v30 = vmax.f32 %v3723_v16, %v3727_v38  ;;  %4820 = vmatprep.subr.bf16.mxu0 %v7781_v3  ;;  %v3771_v13 = vadd.f32 %v7307_v49, %v3756_v10  ;;  %v3728_v25 = vadd.f32 %v3685_v44, %v3483_v33  ;;  %v5068_v16 = vld [vmem:[%s7458_s7] sm:$0xff]  }
 0x463   : > { %v3687_v34 = vpop.f32.mrf.mxu1 }
 0x464   : > { %v3757_v40 = vmax.f32 %v3746_v20, %v3747_v30  ;;  %v3779_v37 = vmax.f32 %v3771_v13, 0.0  ;;  %v3729_v45 = vadd.f32 %v3687_v34, %v3484_v58 }
 0x465   : > { %4821 = vmatpush3.bf16.msra.mxu0 %v5057_v39  ;;  %v3689_v62 = vpop.f32.mrf.mxu1 }
 0x466   : > { %v3772_v14 = vadd.f32 %v7307_v49, %v3757_v40  ;;  %4822 = vmatprep.subr.bf16.mxu0 %v7781_v3  ;;  %v3730_v21 = vadd.f32 %v3689_v62, %v3485_v24 }
 0x467   : > { %v3691_v6 = vpop.f32.mrf.mxu1 }
 0x468   : > { %v3780_v5 = vmax.f32 %v3772_v14, 0.0  ;;  %v3731_v31 = vadd.f32 %v3691_v6, %v3486_v0 }
 0x469   : > { %4823 = vmatpush3.bf16.msra.mxu0 %v5058_v43  ;;  %v3695_v27 = vpop.f32.mrf.mxu1 }
 0x46a   : > { %v3785_v47 = vpack.c.bf16 %v3780_v5, %v3779_v37  ;;  %v3732_v61 = vadd.f32 %v3695_v27, %v3487_v57  ;;  %4824 = vmatprep.subr.bf16.mxu0 %v7781_v3 }
 0x46b   : > { %v3697_v59 = vpop.f32.mrf.mxu1 }
 0x46c   : > { %v3748_v29 = vmax.f32 %v3728_v25, %v3732_v61  ;;  %v3733_v17 = vadd.f32 %v3697_v59, %v3488_v9 }
 0x46d   : > { %4825 = vmatpush3.bf16.msra.mxu0 %v5060_v56  ;;  %v3699_v4 = vpop.f32.mrf.mxu1 }
 0x46e   : > { %v3749_v8 = vmax.f32 %v3729_v45, %v3733_v17  ;;  %v3734_v1 = vadd.f32 %v3699_v4, %v3489_v51  ;;  %4844 = vmatprep.subr.bf16.mxu0 %v7781_v3 }
 0x46f   : > { %v3701_v15 = vpop.f32.mrf.mxu1 }
 0x470   : > { %v3758_v32 = vmax.f32 %v3748_v29, %v3749_v8  ;;  %v3750_v46 = vmax.f32 %v3730_v21, %v3734_v1  ;;  %v3735_v50 = vadd.f32 %v3701_v15, %v3490_v11  ;;  %4827 = vmatmul.mubr.msk.bf16.vlgmr.msra.gmra.mxu0 %vm3838_vm5, %v3785_v47 }
 0x471   : > { %4852 = vmatprep.mubr.msk.bf16.mxu0 %vm5109_vm4, %v7781_v3  ;;  %4845 = vmatpush3.bf16.msra.mxu0 %v4184_v19 }
 0x472   : > { %v3751_v54 = vmax.f32 %v3731_v31, %v3735_v50  ;;  %v3773_v63 = vadd.f32 %v7307_v49, %v3758_v32  ;;  %4846 = vmatprep.subr.bf16.mxu0 %v7781_v3 }
 0x474   : > { %v3759_v42 = vmax.f32 %v3750_v46, %v3751_v54  ;;  %v3781_v55 = vmax.f32 %v3773_v63, 0.0 }
 0x475   : > { %4847 = vmatpush3.bf16.msra.mxu0 %v5066_v12 }
 0x476   : > { %v3774_v23 = vadd.f32 %v7307_v49, %v3759_v42  ;;  %4848 = vmatprep.subr.bf16.mxu0 %v7781_v3  ;;  %v5067_v49 = vld [vmem:[%s7458_s7 + $0x8] sm:$0xff]  }
 0x478   : > { %v3782_v7 = vmax.f32 %v3774_v23, 0.0 }
 0x479   : > { %4849 = vmatpush3.bf16.msra.mxu0 %v5067_v49 }
 0x47a   : > { %v3786_v41 = vpack.c.bf16 %v3782_v7, %v3781_v55  ;;  %4850 = vmatprep.subr.bf16.mxu0 %v7781_v3 }
 0x47c   : > { %4841 = vmatmul.mubr.msk.bf16.vlgmr.msra.gmra.mxu1 %vm3838_vm5, %v3786_v41 }
 0x47d   : > { %4851 = vmatpush3.bf16.msra.mxu0 %v5068_v16 }
 0x50c   : > { %v3950_v10 = vpop.f32.mrf.mxu1 }
 0x50e   : > { %v4814_v20 = vpop.f32.mrf.mxu1 }
 0x510   : > { %v3953_v38 = vpop.f32.mrf.mxu1 }
 0x512   : > { %v4815_v18 = vpop.f32.mrf.mxu1 }
 0x51c   : > { %v3876_v44 = vpop.f32.mrf.mxu0 }
 0x51d   : > { %v3951_v43 = vadd.f32 %v3950_v10, %v3876_v44 }
 0x51e   : > { %v4800_v39 = vpop.f32.mrf.mxu0 }
 0x520   : > { %v3879_v30 = vpop.f32.mrf.mxu0 }
 0x521   : > { %v3954_v33 = vadd.f32 %v3953_v38, %v3879_v30 }
 0x522   : > { %v4801_v34 = vpop.f32.mrf.mxu0 }
 0x530   : > { %v4035_v13 = vpop.f32.mrf.mxu0 }
 0x531   : > { %v4042_v14 = vadd.f32 %v4035_v13, %v3951_v43 }
 0x532   : > { %v4828_v40 = vpop.f32.mrf.mxu0 }
 0x534   : > { %v4038_v35 = vpop.f32.mrf.mxu0 }
 0x535   : > { %v4043_v5 = vadd.f32 %v4038_v35, %v3954_v33 }
 0x536   : > { %v4829_v62 = vpop.f32.mrf.mxu0 }
 0x53c   : > { %v4122_v3 = vpop.f32.mrf.mxu1 }
 0x53d   : > { %v4129_v6 = vadd.f32 %v4122_v3, %v4042_v14 }
 0x53e   : > { %v4842_v37 = vpop.f32.mrf.mxu1 }
 0x53f   : > { %v4138_v53 = vadd.f32 %v4750_v26, %v4129_v6 }
 0x540   : > { %v4125_v57 = vpop.f32.mrf.mxu1 }
 0x541   : > { %v4130_v58 = vadd.f32 %v4125_v57, %v4043_v5  ;;  %v4140_v56 = vmax.f32 %v4138_v53, 0.0 }
 0x542   : > { %v4843_v27 = vpop.f32.mrf.mxu1 }
 0x543   : > { %v4139_v9 = vadd.f32 %v4750_v26, %v4130_v58 }
 0x545   : > { %v4141_v22 = vmax.f32 %v4139_v9, 0.0 }
 0x547   : > { %v4142_v60 = vpack.c.bf16 %v4141_v22, %v4140_v56 }
 0x549   : > { %4853 = vmatmul.mubr.msk.bf16.vlgmr.msra.gmra.mxu0 %vm4178_vm7, %v4142_v60 }
 0x609   : > { %v4220_v47 = vpop.f32.mrf.mxu0 }
 0x60a   : > { %v4221_v25 = vadd.f32 %v4751_v2, %v4220_v47 }
 0x60b   : > { %v4854_v61 = vpop.f32.mrf.mxu0 }
 0x60c   : > { %v4228_v36 = vsel %vm4227_vm8, %v4221_v25, -inf }
 0x60d   : > { %4229 = vmax.xlane.f32.xlu0 %v4228_v36  ;;  %v4223_v24 = vpop.f32.mrf.mxu0 }
 0x60e   : > { %v4224_v59 = vadd.f32 %v4751_v2, %v4223_v24 }
 0x60f   : > { %v4855_v45 = vpop.f32.mrf.mxu0 }
 0x610   : > { %v4231_v29 = vsel %vm4227_vm8, %v4224_v59, -inf }
 0x611   : > { %4232 = vmax.xlane.f32.xlu0 %v4231_v29 }
 0x696   : > { %v4230_v17 = vpop.xlane.xlu0 %4229 }
 0x697   : > { %v4234_v51 = vsub.f32 %v4221_v25, %v4230_v17 }
 0x699   : > { %v4236_v48 = vmul.f32 1.442695, %v4234_v51 }
 0x69a   : > { %v4233_v28 = vpop.xlane.xlu0 %4232 }
 0x69b   : > { %5069 = vpow2.f32 %v4236_v48  ;;  %v4235_v0 = vsub.f32 %v4224_v59, %v4233_v28 }
 0x69d   : > { %v4238_v4 = vmul.f32 1.442695, %v4235_v0 }
 0x69f   : > { %5071 = vpow2.f32 %v4238_v4 }
 0x6a8   : > { %v5070_v21 = vpop.eup %5069 }
 0x6a9   : > { %v4240_v8 = vsel %vm4227_vm8, %v5070_v21, 0.0 }
 0x6aa   : > { %4241 = vadd.xlane.f32.xlu1 %v4240_v8 }
 0x6ac   : > { %v5072_v1 = vpop.eup %5071 }
 0x6ad   : > { %v4243_v11 = vsel %vm4227_vm8, %v5072_v1, 0.0 }
 0x6ae   : > { %4244 = vadd.xlane.f32.xlu1 %v4243_v11 }
 0x733   : > { %v4242_v15 = vpop.xlane.xlu1 %4241 }
 0x734   : > { %5073 = vlog2.f32 %v4242_v15 }
 0x737   : > { %v4245_v31 = vpop.xlane.xlu1 %4244 }
 0x738   : > { %5075 = vlog2.f32 %v4245_v31 }
 0x741   : > { %v5074_v32 = vpop.eup %5073 }
 0x742   : > { %v4247_v46 = vmul.f32 0.6931472, %v5074_v32 }
 0x744   : > { %v4250_v50 = vadd.f32 %v4247_v46, %v4230_v17 }
 0x745   : > { %v5076_v54 = vpop.eup %5075 }
 0x746   : > { %v4252_v63 = vsub.f32 %v4221_v25, %v4250_v50  ;;  %v4249_v42 = vmul.f32 0.6931472, %v5076_v54 }
 0x748   : > { %4254 = vst.msk [vmem:[%s332_s25] sm:$0xff] %vm4227_vm8, %v4252_v63  ;;  %v4251_v23 = vadd.f32 %v4249_v42, %v4233_v28 }
 0x74a   : > { %v4253_v55 = vsub.f32 %v4224_v59, %v4251_v23 }
 0x74c   : > { %4255 = vst.msk [vmem:[%s332_s25 + $0x8] sm:$0xff] %vm4227_vm8, %v4253_v55 }
 0x74d PF: > { %s19_s30 = sadd.s32 1, %s5105_s30  }
 0x74e   : > { %p16_p5 = scmp.ge.s32.totalorder %s19_s30, 4  }
 0x750   :  { %18 = sbr.rel (!%p16_p5) target bundleno = 1 (0x1), region = 97 }

</bundles_post_ra>
